<compile_context>
chip_gen: v7x
topology: tpu7x:2x2x1
jax: 0.10.0
libtpu: 0.0.40
codegen_flags: <defaults>
</compile_context>

<pallas_src>
import functools

import jax
import jax.numpy as jnp
from jax import lax
from jax.experimental import pallas as pl
from jax.experimental.pallas import tpu as pltpu


def _wsilu(x):
    return jax.nn.sigmoid(4.0 * x) * x


def _round_up(v, m):
    return (v + m - 1) // m * m


def _depth_conv_block_kernel(H, W, Cp, shortcut,
                             x_ref, aw, ab, w1, b1, dww, dwb, w2, b2,
                             fw1a, fb1a, fw1b, fb1b, fw2, fb2, qs, o_ref):
    HW = H * W
    x = x_ref[0]                                  # (H, W, Cin) bf16
    x2 = x.reshape(HW, x.shape[-1])

    # adaptor (identity padding projection when the module has none) -> (HW, Cp) f32
    xf = jnp.dot(x2, aw[...], preferred_element_type=jnp.float32) + ab[...]

    # ---- dc branch: 1x1 -> WSiLU -> depthwise 3x3 -> 1x1, residual ----
    t = jnp.dot(xf.astype(jnp.bfloat16), w1[...],
                preferred_element_type=jnp.float32) + b1[...]
    t = _wsilu(t).reshape(H, W, Cp)

    # depthwise 3x3, padding=1, without a padded scratch buffer:
    #   H shifts: whole-row slice + concat (vreg granular, no relayout)
    #   W shifts: sublane roll on the XLU + iota edge mask
    dwall = dww[...]                              # (9, Cp) f32
    wi = lax.broadcasted_iota(jnp.int32, (H, W, Cp), 1)
    not_last = wi < (W - 1)
    not_first = wi > 0

    zrow = jnp.zeros((1, W, Cp), jnp.float32)
    rows = (jnp.concatenate([zrow, t[:H - 1]], axis=0),   # in[h-1]
            t,                                            # in[h]
            jnp.concatenate([t[1:], zrow], axis=0))       # in[h+1]

    acc = jnp.broadcast_to(dwb[...].reshape(1, 1, Cp), (H, W, Cp))
    for dy in range(3):
        r = rows[dy]
        for dx in range(3):
            ox = dx - 1
            if ox == 0:
                tap = r
            else:
                tap = pltpu.roll(r, shift=(-ox) % W, axis=1)
                tap = jnp.where(not_last if ox == 1 else not_first, tap, 0.0)
            acc = acc + tap * dwall[dy * 3 + dx]

    t = acc.reshape(HW, Cp)
    out = jnp.dot(t.astype(jnp.bfloat16), w2[...],
                  preferred_element_type=jnp.float32) + b2[...] + xf

    # ---- ffn branch: split chunk halves -> WSiLU each -> add -> 1x1, residual ----
    ob = out.astype(jnp.bfloat16)
    f = (_wsilu(jnp.dot(ob, fw1a[...], preferred_element_type=jnp.float32) + fb1a[...]) +
         _wsilu(jnp.dot(ob, fw1b[...], preferred_element_type=jnp.float32) + fb1b[...]))
    out = jnp.dot(f.astype(jnp.bfloat16), fw2[...],
                  preferred_element_type=jnp.float32) + fb2[...] + out

    if shortcut:
        out = out + xf
    out = out * qs[...]                           # quant_step (padded lanes stay zero)

    o_ref[0] = out.reshape(H, W, Cp).astype(o_ref.dtype)


def depth_conv_block(x_nchw, params, *, shortcut=False, quant_step=None,
                     to_cat=None, cat_at_front=True):
    N, Cin, H, W = x_nchw.shape
    Cout = params['dc0_w'].shape[0]
    Cp = _round_up(Cout, 128)        # lane-dense main channel width
    Hp = _round_up(2 * Cout, 128)    # lane-dense width of each ffn chunk half
    out_dtype = x_nchw.dtype

    # NCHW -> NHWC fused with bf16 cast (single XLA pass, halves HBM read)
    x = jnp.transpose(x_nchw, (0, 2, 3, 1)).astype(jnp.bfloat16)

    def mat(w, rows, cols):    # (O, I, 1, 1) -> zero-padded (rows, cols) bf16 right-matmul
        m = jnp.transpose(w[:, :, 0, 0], (1, 0)).astype(jnp.float32)
        m = jnp.pad(m, ((0, rows - m.shape[0]), (0, cols - m.shape[1])))
        return m.astype(jnp.bfloat16)

    def vec(b, cols):          # (C,) -> zero-padded (1, cols) f32
        v = jnp.asarray(b, jnp.float32).reshape(1, -1)
        return jnp.pad(v, ((0, 0), (0, cols - v.shape[1])))

    if 'adaptor_w' in params:
        aw = mat(params['adaptor_w'], Cin, Cp)
        ab = vec(params['adaptor_b'], Cp)
    else:
        aw = jnp.eye(Cin, Cp, dtype=jnp.bfloat16)       # identity: just lane-pads channels
        ab = jnp.zeros((1, Cp), jnp.float32)

    w1 = mat(params['dc0_w'], Cp, Cp)
    b1 = vec(params['dc0_b'], Cp)
    dww = jnp.transpose(params['dc2_w'][:, 0], (1, 2, 0)).reshape(9, Cout)
    dww = jnp.pad(dww.astype(jnp.float32), ((0, 0), (0, Cp - Cout)))
    dwb = vec(params['dc2_b'], Cp)
    w2 = mat(params['dc3_w'], Cp, Cp)
    b2 = vec(params['dc3_b'], Cp)

    fw1 = params['ffn0_w']
    fb1 = params['ffn0_b']
    fw1a = mat(fw1[:2 * Cout], Cp, Hp)
    fb1a = vec(fb1[:2 * Cout], Hp)
    fw1b = mat(fw1[2 * Cout:], Cp, Hp)
    fb1b = vec(fb1[2 * Cout:], Hp)
    fw2 = mat(params['ffn2_w'], Hp, Cp)
    fb2 = vec(params['ffn2_b'], Cp)

    if quant_step is None:
        qs = jnp.ones((1, Cp), jnp.float32)
    else:
        q = jnp.asarray(quant_step, jnp.float32).reshape(-1)
        q = jnp.broadcast_to(q, (Cout,))
        qs = jnp.pad(q.reshape(1, -1), ((0, 0), (0, Cp - Cout)))

    weights = [aw, ab, w1, b1, dww, dwb, w2, b2,
               fw1a, fb1a, fw1b, fb1b, fw2, fb2, qs]

    in_specs = [pl.BlockSpec((1, H, W, Cin), lambda n: (n, 0, 0, 0))]
    in_specs += [pl.BlockSpec(a.shape, lambda n: (0, 0)) for a in weights]

    kernel = functools.partial(_depth_conv_block_kernel, H, W, Cp, shortcut)

    out = pl.pallas_call(
        kernel,
        out_shape=jax.ShapeDtypeStruct((N, H, W, Cp), out_dtype),
        grid_spec=pltpu.PrefetchScalarGridSpec(
            num_scalar_prefetch=0,
            grid=(N,),
            in_specs=in_specs,
            out_specs=pl.BlockSpec((1, H, W, Cp), lambda n: (n, 0, 0, 0))),
        compiler_params=pltpu.CompilerParams(
            dimension_semantics=("parallel",)),
    )(x, *weights)

    # drop padded lanes + NHWC -> NCHW (fuses into one XLA pass)
    out_nchw = jnp.transpose(out[..., :Cout], (0, 3, 1, 2))
    if to_cat is not None:
        pair = (to_cat, out_nchw) if cat_at_front else (out_nchw, to_cat)
        out_nchw = jnp.concatenate(pair, axis=1)
    return out_nchw


# -------------------------- pure-JAX reference -------------------------------
def _conv1x1_ref(x, w, b):
    y = lax.conv_general_dilated(x, w, (1, 1), 'VALID',
                                 dimension_numbers=('NCHW', 'OIHW', 'NCHW'))
    return y + b.reshape(1, -1, 1, 1)


def _dwconv3_ref(x, w, b):
    y = lax.conv_general_dilated(x, w, (1, 1), ((1, 1), (1, 1)),
                                 dimension_numbers=('NCHW', 'OIHW', 'NCHW'),
                                 feature_group_count=x.shape[1])
    return y + b.reshape(1, -1, 1, 1)


def ref_forward(x, p, *, shortcut=False, quant_step=None, to_cat=None,
                cat_at_front=True):
    def wsilu(v):
        return jax.nn.sigmoid(4.0 * v) * v

    if 'adaptor_w' in p:
        x = _conv1x1_ref(x, p['adaptor_w'], p['adaptor_b'])
    t = wsilu(_conv1x1_ref(x, p['dc0_w'], p['dc0_b']))
    t = _dwconv3_ref(t, p['dc2_w'], p['dc2_b'])
    t = _conv1x1_ref(t, p['dc3_w'], p['dc3_b'])
    out = t + x
    f = wsilu(_conv1x1_ref(out, p['ffn0_w'], p['ffn0_b']))
    c = f.shape[1] // 2
    f = f[:, :c] + f[:, c:]
    f = _conv1x1_ref(f, p['ffn2_w'], p['ffn2_b'])
    out = f + out
    if shortcut:
        out = out + x
    if quant_step is not None:
        out = out * quant_step
    if to_cat is not None:
        pair = (to_cat, out) if cat_at_front else (out, to_cat)
        out = jnp.concatenate(pair, axis=1)
    return out


if __name__ == "__main__":
    in_ch, out_ch = 4, 8          # in_ch != out_ch -> adaptor present
    N, H, W = 2, 16, 16
    shortcut = True

    key = jax.random.PRNGKey(0)
    ks = jax.random.split(key, 16)

    def w_init(k, shape):
        return jax.random.normal(k, shape, jnp.float32) * 0.1

    params = {
        'adaptor_w': w_init(ks[0], (out_ch, in_ch, 1, 1)),
        'adaptor_b': w_init(ks[1], (out_ch,)),
        'dc0_w': w_init(ks[2], (out_ch, out_ch, 1, 1)),
        'dc0_b': w_init(ks[3], (out_ch,)),
        'dc2_w': w_init(ks[4], (out_ch, 1, 3, 3)),        # depthwise, groups=out_ch
        'dc2_b': w_init(ks[5], (out_ch,)),
        'dc3_w': w_init(ks[6], (out_ch, out_ch, 1, 1)),
        'dc3_b': w_init(ks[7], (out_ch,)),
        'ffn0_w': w_init(ks[8], (out_ch * 4, out_ch, 1, 1)),
        'ffn0_b': w_init(ks[9], (out_ch * 4,)),
        'ffn2_w': w_init(ks[10], (out_ch, out_ch * 2, 1, 1)),
        'ffn2_b': w_init(ks[11], (out_ch,)),
    }

    x = jax.random.normal(ks[12], (N, in_ch, H, W), jnp.float32)
    quant_step = 0.9 + 0.2 * jax.random.uniform(ks[13], (1, out_ch, 1, 1),
                                                jnp.float32)
    to_cat = jax.random.normal(ks[14], (N, 3, H, W), jnp.float32)

    y = depth_conv_block(x, params, shortcut=shortcut, quant_step=quant_step,
                         to_cat=to_cat, cat_at_front=True)
    y = jax.block_until_ready(y)

    y_ref = ref_forward(x, params, shortcut=shortcut, quant_step=quant_step,
                        to_cat=to_cat, cat_at_front=True)
    y_ref = jax.block_until_ready(y_ref)

    assert y.shape == y_ref.shape, (y.shape, y_ref.shape)
    max_diff = float(jnp.max(jnp.abs(y - y_ref)))
    assert max_diff < 5e-2, f"max abs diff too large: {max_diff}"
    print("KERNEL_OK")
</pallas_src>

<mosaic_0001>
module attributes {stable_mosaic.version = 11 : i64} {
  func.func @_depth_conv_block_kernel(%arg0: i32, %arg1: memref<1x16x16x4xbf16, #tpu.memory_space<vmem>>, %arg2: memref<4x128xbf16, #tpu.memory_space<vmem>>, %arg3: memref<1x128xf32, #tpu.memory_space<vmem>>, %arg4: memref<128x128xbf16, #tpu.memory_space<vmem>>, %arg5: memref<1x128xf32, #tpu.memory_space<vmem>>, %arg6: memref<9x128xf32, #tpu.memory_space<vmem>>, %arg7: memref<1x128xf32, #tpu.memory_space<vmem>>, %arg8: memref<128x128xbf16, #tpu.memory_space<vmem>>, %arg9: memref<1x128xf32, #tpu.memory_space<vmem>>, %arg10: memref<128x128xbf16, #tpu.memory_space<vmem>>, %arg11: memref<1x128xf32, #tpu.memory_space<vmem>>, %arg12: memref<128x128xbf16, #tpu.memory_space<vmem>>, %arg13: memref<1x128xf32, #tpu.memory_space<vmem>>, %arg14: memref<128x128xbf16, #tpu.memory_space<vmem>>, %arg15: memref<1x128xf32, #tpu.memory_space<vmem>>, %arg16: memref<1x128xf32, #tpu.memory_space<vmem>>, %arg17: memref<1x16x16x128xf32, #tpu.memory_space<vmem>>) attributes {dimension_semantics = [#tpu.dimension_semantics<parallel>], iteration_bounds = array<i64: 2>, scalar_prefetch = 0 : i64, scratch_operands = 0 : i64, tpu.core_type = #tpu.core_type<tc>, window_params = [{transform_indices = @transform_0, window_bounds = array<i64: 1, 16, 16, 4>}, {pipeline_mode = #tpu.pipeline_mode<synchronous>, transform_indices = @transform_1, window_bounds = array<i64: 4, 128>}, {pipeline_mode = #tpu.pipeline_mode<synchronous>, transform_indices = @transform_2, window_bounds = array<i64: 1, 128>}, {pipeline_mode = #tpu.pipeline_mode<synchronous>, transform_indices = @transform_3, window_bounds = array<i64: 128, 128>}, {pipeline_mode = #tpu.pipeline_mode<synchronous>, transform_indices = @transform_4, window_bounds = array<i64: 1, 128>}, {pipeline_mode = #tpu.pipeline_mode<synchronous>, transform_indices = @transform_5, window_bounds = array<i64: 9, 128>}, {pipeline_mode = #tpu.pipeline_mode<synchronous>, transform_indices = @transform_6, window_bounds = array<i64: 1, 128>}, {pipeline_mode = #tpu.pipeline_mode<synchronous>, transform_indices = @transform_7, window_bounds = array<i64: 128, 128>}, {pipeline_mode = #tpu.pipeline_mode<synchronous>, transform_indices = @transform_8, window_bounds = array<i64: 1, 128>}, {pipeline_mode = #tpu.pipeline_mode<synchronous>, transform_indices = @transform_9, window_bounds = array<i64: 128, 128>}, {pipeline_mode = #tpu.pipeline_mode<synchronous>, transform_indices = @transform_10, window_bounds = array<i64: 1, 128>}, {pipeline_mode = #tpu.pipeline_mode<synchronous>, transform_indices = @transform_11, window_bounds = array<i64: 128, 128>}, {pipeline_mode = #tpu.pipeline_mode<synchronous>, transform_indices = @transform_12, window_bounds = array<i64: 1, 128>}, {pipeline_mode = #tpu.pipeline_mode<synchronous>, transform_indices = @transform_13, window_bounds = array<i64: 128, 128>}, {pipeline_mode = #tpu.pipeline_mode<synchronous>, transform_indices = @transform_14, window_bounds = array<i64: 1, 128>}, {pipeline_mode = #tpu.pipeline_mode<synchronous>, transform_indices = @transform_15, window_bounds = array<i64: 1, 128>}, {transform_indices = @transform_16, window_bounds = array<i64: 1, 16, 16, 128>}]} {
    %c0 = arith.constant 0 : index
    %c0_0 = arith.constant 0 : index
    %c0_1 = arith.constant 0 : index
    %c0_2 = arith.constant 0 : index
    %0 = vector.load %arg1[%c0, %c0_0, %c0_1, %c0_2] : memref<1x16x16x4xbf16, #tpu.memory_space<vmem>>, vector<1x16x16x4xbf16>
    %1 = vector.shape_cast %0 : vector<1x16x16x4xbf16> to vector<16x16x4xbf16>
    %2 = vector.shape_cast %1 : vector<16x16x4xbf16> to vector<256x4xbf16>
    %c0_3 = arith.constant 0 : index
    %c0_4 = arith.constant 0 : index
    %3 = vector.load %arg2[%c0_3, %c0_4] : memref<4x128xbf16, #tpu.memory_space<vmem>>, vector<4x128xbf16>
    %cst = arith.constant dense<0.000000e+00> : vector<256x128xf32>
    %4 = tpu.matmul %2, %3, %cst {dimension_numbers = #tpu.dot_dimension_numbers<[1], [0], [0], [1], [0, 0, 1, 1], [], []>} : vector<256x4xbf16>, vector<4x128xbf16>, vector<256x128xf32> -> vector<256x128xf32>
    %c0_5 = arith.constant 0 : index
    %c0_6 = arith.constant 0 : index
    %5 = vector.load %arg3[%c0_5, %c0_6] : memref<1x128xf32, #tpu.memory_space<vmem>>, vector<1x128xf32>
    %6 = vector.broadcast %5 : vector<1x128xf32> to vector<256x128xf32>
    %7 = arith.addf %4, %6 : vector<256x128xf32>
    %8 = arith.truncf %7 : vector<256x128xf32> to vector<256x128xbf16>
    %c0_7 = arith.constant 0 : index
    %c0_8 = arith.constant 0 : index
    %9 = vector.load %arg4[%c0_7, %c0_8] : memref<128x128xbf16, #tpu.memory_space<vmem>>, vector<128x128xbf16>
    %cst_9 = arith.constant dense<0.000000e+00> : vector<256x128xf32>
    %10 = tpu.matmul %8, %9, %cst_9 {dimension_numbers = #tpu.dot_dimension_numbers<[1], [0], [0], [1], [0, 0, 1, 1], [], []>} : vector<256x128xbf16>, vector<128x128xbf16>, vector<256x128xf32> -> vector<256x128xf32>
    %c0_10 = arith.constant 0 : index
    %c0_11 = arith.constant 0 : index
    %11 = vector.load %arg5[%c0_10, %c0_11] : memref<1x128xf32, #tpu.memory_space<vmem>>, vector<1x128xf32>
    %12 = vector.broadcast %11 : vector<1x128xf32> to vector<256x128xf32>
    %13 = arith.addf %10, %12 : vector<256x128xf32>
    %cst_12 = arith.constant 4.000000e+00 : f32
    %14 = vector.broadcast %cst_12 : f32 to vector<256x128xf32>
    %15 = arith.mulf %14, %13 : vector<256x128xf32>
    %16 = arith.negf %15 : vector<256x128xf32>
    %17 = math.exp %16 : vector<256x128xf32>
    %cst_13 = arith.constant 1.000000e+00 : f32
    %18 = vector.broadcast %cst_13 : f32 to vector<256x128xf32>
    %19 = arith.addf %18, %17 : vector<256x128xf32>
    %20 = arith.divf %18, %19 : vector<256x128xf32>
    %21 = arith.mulf %20, %13 : vector<256x128xf32>
    %22 = vector.shape_cast %21 : vector<256x128xf32> to vector<16x16x128xf32>
    %c0_14 = arith.constant 0 : index
    %c0_15 = arith.constant 0 : index
    %23 = vector.load %arg6[%c0_14, %c0_15] : memref<9x128xf32, #tpu.memory_space<vmem>>, vector<9x128xf32>
    %24 = tpu.iota {dimensions = array<i32: 1>} : vector<16x16x128xi32>
    %c15_i32 = arith.constant 15 : i32
    %25 = vector.broadcast %c15_i32 : i32 to vector<16x16x128xi32>
    %26 = arith.cmpi slt, %24, %25 : vector<16x16x128xi32>
    %c0_i32 = arith.constant 0 : i32
    %27 = vector.broadcast %c0_i32 : i32 to vector<16x16x128xi32>
    %28 = arith.cmpi sgt, %24, %27 : vector<16x16x128xi32>
    %cst_16 = arith.constant 0.000000e+00 : f32
    %29 = vector.broadcast %cst_16 : f32 to vector<1x16x128xf32>
    %30 = vector.extract_strided_slice %22 {offsets = [0, 0, 0], sizes = [15, 16, 128], strides = [1, 1, 1]} : vector<16x16x128xf32> to vector<15x16x128xf32>
    %31 = tpu.concatenate %29, %30 in 0 : vector<1x16x128xf32>, vector<15x16x128xf32> -> vector<16x16x128xf32>
    %32 = vector.extract_strided_slice %22 {offsets = [1, 0, 0], sizes = [15, 16, 128], strides = [1, 1, 1]} : vector<16x16x128xf32> to vector<15x16x128xf32>
    %33 = tpu.concatenate %32, %29 in 0 : vector<15x16x128xf32>, vector<1x16x128xf32> -> vector<16x16x128xf32>
    %c0_17 = arith.constant 0 : index
    %c0_18 = arith.constant 0 : index
    %34 = vector.load %arg7[%c0_17, %c0_18] : memref<1x128xf32, #tpu.memory_space<vmem>>, vector<1x128xf32>
    %35 = vector.shape_cast %34 : vector<1x128xf32> to vector<1x1x128xf32>
    %36 = vector.shape_cast %35 : vector<1x1x128xf32> to vector<1x1x128xf32>
    %37 = vector.broadcast %36 : vector<1x1x128xf32> to vector<16x16x128xf32>
    %c1_i32 = arith.constant 1 : i32
    %38 = tpu.dynamic_rotate %31 by %c1_i32 dim 1 : vector<16x16x128xf32>, i32 -> vector<16x16x128xf32>
    %cst_19 = arith.constant 0.000000e+00 : f32
    %39 = vector.broadcast %cst_19 : f32 to vector<16x16x128xf32>
    %40 = arith.select %28, %38, %39 : vector<16x16x128xi1>, vector<16x16x128xf32>
    %41 = vector.extract_strided_slice %23 {offsets = [0, 0], sizes = [1, 128], strides = [1, 1]} : vector<9x128xf32> to vector<1x128xf32>
    %42 = vector.shape_cast %41 : vector<1x128xf32> to vector<128xf32>
    %43 = vector.shape_cast %42 : vector<128xf32> to vector<1x1x128xf32>
    %44 = vector.broadcast %43 : vector<1x1x128xf32> to vector<16x16x128xf32>
    %45 = arith.mulf %40, %44 : vector<16x16x128xf32>
    %46 = arith.addf %37, %45 : vector<16x16x128xf32>
    %47 = vector.extract_strided_slice %23 {offsets = [1, 0], sizes = [1, 128], strides = [1, 1]} : vector<9x128xf32> to vector<1x128xf32>
    %48 = vector.shape_cast %47 : vector<1x128xf32> to vector<128xf32>
    %49 = vector.shape_cast %48 : vector<128xf32> to vector<1x1x128xf32>
    %50 = vector.broadcast %49 : vector<1x1x128xf32> to vector<16x16x128xf32>
    %51 = arith.mulf %31, %50 : vector<16x16x128xf32>
    %52 = arith.addf %46, %51 : vector<16x16x128xf32>
    %c15_i32_20 = arith.constant 15 : i32
    %53 = tpu.dynamic_rotate %31 by %c15_i32_20 dim 1 : vector<16x16x128xf32>, i32 -> vector<16x16x128xf32>
    %cst_21 = arith.constant 0.000000e+00 : f32
    %54 = vector.broadcast %cst_21 : f32 to vector<16x16x128xf32>
    %55 = arith.select %26, %53, %54 : vector<16x16x128xi1>, vector<16x16x128xf32>
    %56 = vector.extract_strided_slice %23 {offsets = [2, 0], sizes = [1, 128], strides = [1, 1]} : vector<9x128xf32> to vector<1x128xf32>
    %57 = vector.shape_cast %56 : vector<1x128xf32> to vector<128xf32>
    %58 = vector.shape_cast %57 : vector<128xf32> to vector<1x1x128xf32>
    %59 = vector.broadcast %58 : vector<1x1x128xf32> to vector<16x16x128xf32>
    %60 = arith.mulf %55, %59 : vector<16x16x128xf32>
    %61 = arith.addf %52, %60 : vector<16x16x128xf32>
    %c1_i32_22 = arith.constant 1 : i32
    %62 = tpu.dynamic_rotate %22 by %c1_i32_22 dim 1 : vector<16x16x128xf32>, i32 -> vector<16x16x128xf32>
    %cst_23 = arith.constant 0.000000e+00 : f32
    %63 = vector.broadcast %cst_23 : f32 to vector<16x16x128xf32>
    %64 = arith.select %28, %62, %63 : vector<16x16x128xi1>, vector<16x16x128xf32>
    %65 = vector.extract_strided_slice %23 {offsets = [3, 0], sizes = [1, 128], strides = [1, 1]} : vector<9x128xf32> to vector<1x128xf32>
    %66 = vector.shape_cast %65 : vector<1x128xf32> to vector<128xf32>
    %67 = vector.shape_cast %66 : vector<128xf32> to vector<1x1x128xf32>
    %68 = vector.broadcast %67 : vector<1x1x128xf32> to vector<16x16x128xf32>
    %69 = arith.mulf %64, %68 : vector<16x16x128xf32>
    %70 = arith.addf %61, %69 : vector<16x16x128xf32>
    %71 = vector.extract_strided_slice %23 {offsets = [4, 0], sizes = [1, 128], strides = [1, 1]} : vector<9x128xf32> to vector<1x128xf32>
    %72 = vector.shape_cast %71 : vector<1x128xf32> to vector<128xf32>
    %73 = vector.shape_cast %72 : vector<128xf32> to vector<1x1x128xf32>
    %74 = vector.broadcast %73 : vector<1x1x128xf32> to vector<16x16x128xf32>
    %75 = arith.mulf %22, %74 : vector<16x16x128xf32>
    %76 = arith.addf %70, %75 : vector<16x16x128xf32>
    %c15_i32_24 = arith.constant 15 : i32
    %77 = tpu.dynamic_rotate %22 by %c15_i32_24 dim 1 : vector<16x16x128xf32>, i32 -> vector<16x16x128xf32>
    %cst_25 = arith.constant 0.000000e+00 : f32
    %78 = vector.broadcast %cst_25 : f32 to vector<16x16x128xf32>
    %79 = arith.select %26, %77, %78 : vector<16x16x128xi1>, vector<16x16x128xf32>
    %80 = vector.extract_strided_slice %23 {offsets = [5, 0], sizes = [1, 128], strides = [1, 1]} : vector<9x128xf32> to vector<1x128xf32>
    %81 = vector.shape_cast %80 : vector<1x128xf32> to vector<128xf32>
    %82 = vector.shape_cast %81 : vector<128xf32> to vector<1x1x128xf32>
    %83 = vector.broadcast %82 : vector<1x1x128xf32> to vector<16x16x128xf32>
    %84 = arith.mulf %79, %83 : vector<16x16x128xf32>
    %85 = arith.addf %76, %84 : vector<16x16x128xf32>
    %c1_i32_26 = arith.constant 1 : i32
    %86 = tpu.dynamic_rotate %33 by %c1_i32_26 dim 1 : vector<16x16x128xf32>, i32 -> vector<16x16x128xf32>
    %cst_27 = arith.constant 0.000000e+00 : f32
    %87 = vector.broadcast %cst_27 : f32 to vector<16x16x128xf32>
    %88 = arith.select %28, %86, %87 : vector<16x16x128xi1>, vector<16x16x128xf32>
    %89 = vector.extract_strided_slice %23 {offsets = [6, 0], sizes = [1, 128], strides = [1, 1]} : vector<9x128xf32> to vector<1x128xf32>
    %90 = vector.shape_cast %89 : vector<1x128xf32> to vector<128xf32>
    %91 = vector.shape_cast %90 : vector<128xf32> to vector<1x1x128xf32>
    %92 = vector.broadcast %91 : vector<1x1x128xf32> to vector<16x16x128xf32>
    %93 = arith.mulf %88, %92 : vector<16x16x128xf32>
    %94 = arith.addf %85, %93 : vector<16x16x128xf32>
    %95 = vector.extract_strided_slice %23 {offsets = [7, 0], sizes = [1, 128], strides = [1, 1]} : vector<9x128xf32> to vector<1x128xf32>
    %96 = vector.shape_cast %95 : vector<1x128xf32> to vector<128xf32>
    %97 = vector.shape_cast %96 : vector<128xf32> to vector<1x1x128xf32>
    %98 = vector.broadcast %97 : vector<1x1x128xf32> to vector<16x16x128xf32>
    %99 = arith.mulf %33, %98 : vector<16x16x128xf32>
    %100 = arith.addf %94, %99 : vector<16x16x128xf32>
    %c15_i32_28 = arith.constant 15 : i32
    %101 = tpu.dynamic_rotate %33 by %c15_i32_28 dim 1 : vector<16x16x128xf32>, i32 -> vector<16x16x128xf32>
    %cst_29 = arith.constant 0.000000e+00 : f32
    %102 = vector.broadcast %cst_29 : f32 to vector<16x16x128xf32>
    %103 = arith.select %26, %101, %102 : vector<16x16x128xi1>, vector<16x16x128xf32>
    %104 = vector.extract_strided_slice %23 {offsets = [8, 0], sizes = [1, 128], strides = [1, 1]} : vector<9x128xf32> to vector<1x128xf32>
    %105 = vector.shape_cast %104 : vector<1x128xf32> to vector<128xf32>
    %106 = vector.shape_cast %105 : vector<128xf32> to vector<1x1x128xf32>
    %107 = vector.broadcast %106 : vector<1x1x128xf32> to vector<16x16x128xf32>
    %108 = arith.mulf %103, %107 : vector<16x16x128xf32>
    %109 = arith.addf %100, %108 : vector<16x16x128xf32>
    %110 = vector.shape_cast %109 : vector<16x16x128xf32> to vector<256x128xf32>
    %111 = arith.truncf %110 : vector<256x128xf32> to vector<256x128xbf16>
    %c0_30 = arith.constant 0 : index
    %c0_31 = arith.constant 0 : index
    %112 = vector.load %arg8[%c0_30, %c0_31] : memref<128x128xbf16, #tpu.memory_space<vmem>>, vector<128x128xbf16>
    %cst_32 = arith.constant dense<0.000000e+00> : vector<256x128xf32>
    %113 = tpu.matmul %111, %112, %cst_32 {dimension_numbers = #tpu.dot_dimension_numbers<[1], [0], [0], [1], [0, 0, 1, 1], [], []>} : vector<256x128xbf16>, vector<128x128xbf16>, vector<256x128xf32> -> vector<256x128xf32>
    %c0_33 = arith.constant 0 : index
    %c0_34 = arith.constant 0 : index
    %114 = vector.load %arg9[%c0_33, %c0_34] : memref<1x128xf32, #tpu.memory_space<vmem>>, vector<1x128xf32>
    %115 = vector.broadcast %114 : vector<1x128xf32> to vector<256x128xf32>
    %116 = arith.addf %113, %115 : vector<256x128xf32>
    %117 = arith.addf %116, %7 : vector<256x128xf32>
    %118 = arith.truncf %117 : vector<256x128xf32> to vector<256x128xbf16>
    %c0_35 = arith.constant 0 : index
    %c0_36 = arith.constant 0 : index
    %119 = vector.load %arg10[%c0_35, %c0_36] : memref<128x128xbf16, #tpu.memory_space<vmem>>, vector<128x128xbf16>
    %cst_37 = arith.constant dense<0.000000e+00> : vector<256x128xf32>
    %120 = tpu.matmul %118, %119, %cst_37 {dimension_numbers = #tpu.dot_dimension_numbers<[1], [0], [0], [1], [0, 0, 1, 1], [], []>} : vector<256x128xbf16>, vector<128x128xbf16>, vector<256x128xf32> -> vector<256x128xf32>
    %c0_38 = arith.constant 0 : index
    %c0_39 = arith.constant 0 : index
    %121 = vector.load %arg11[%c0_38, %c0_39] : memref<1x128xf32, #tpu.memory_space<vmem>>, vector<1x128xf32>
    %122 = vector.broadcast %121 : vector<1x128xf32> to vector<256x128xf32>
    %123 = arith.addf %120, %122 : vector<256x128xf32>
    %cst_40 = arith.constant 4.000000e+00 : f32
    %124 = vector.broadcast %cst_40 : f32 to vector<256x128xf32>
    %125 = arith.mulf %124, %123 : vector<256x128xf32>
    %126 = arith.negf %125 : vector<256x128xf32>
    %127 = math.exp %126 : vector<256x128xf32>
    %cst_41 = arith.constant 1.000000e+00 : f32
    %128 = vector.broadcast %cst_41 : f32 to vector<256x128xf32>
    %129 = arith.addf %128, %127 : vector<256x128xf32>
    %130 = arith.divf %128, %129 : vector<256x128xf32>
    %131 = arith.mulf %130, %123 : vector<256x128xf32>
    %c0_42 = arith.constant 0 : index
    %c0_43 = arith.constant 0 : index
    %132 = vector.load %arg12[%c0_42, %c0_43] : memref<128x128xbf16, #tpu.memory_space<vmem>>, vector<128x128xbf16>
    %cst_44 = arith.constant dense<0.000000e+00> : vector<256x128xf32>
    %133 = tpu.matmul %118, %132, %cst_44 {dimension_numbers = #tpu.dot_dimension_numbers<[1], [0], [0], [1], [0, 0, 1, 1], [], []>} : vector<256x128xbf16>, vector<128x128xbf16>, vector<256x128xf32> -> vector<256x128xf32>
    %c0_45 = arith.constant 0 : index
    %c0_46 = arith.constant 0 : index
    %134 = vector.load %arg13[%c0_45, %c0_46] : memref<1x128xf32, #tpu.memory_space<vmem>>, vector<1x128xf32>
    %135 = vector.broadcast %134 : vector<1x128xf32> to vector<256x128xf32>
    %136 = arith.addf %133, %135 : vector<256x128xf32>
    %cst_47 = arith.constant 4.000000e+00 : f32
    %137 = vector.broadcast %cst_47 : f32 to vector<256x128xf32>
    %138 = arith.mulf %137, %136 : vector<256x128xf32>
    %139 = arith.negf %138 : vector<256x128xf32>
    %140 = math.exp %139 : vector<256x128xf32>
    %cst_48 = arith.constant 1.000000e+00 : f32
    %141 = vector.broadcast %cst_48 : f32 to vector<256x128xf32>
    %142 = arith.addf %141, %140 : vector<256x128xf32>
    %143 = arith.divf %141, %142 : vector<256x128xf32>
    %144 = arith.mulf %143, %136 : vector<256x128xf32>
    %145 = arith.addf %131, %144 : vector<256x128xf32>
    %146 = arith.truncf %145 : vector<256x128xf32> to vector<256x128xbf16>
    %c0_49 = arith.constant 0 : index
    %c0_50 = arith.constant 0 : index
    %147 = vector.load %arg14[%c0_49, %c0_50] : memref<128x128xbf16, #tpu.memory_space<vmem>>, vector<128x128xbf16>
    %cst_51 = arith.constant dense<0.000000e+00> : vector<256x128xf32>
    %148 = tpu.matmul %146, %147, %cst_51 {dimension_numbers = #tpu.dot_dimension_numbers<[1], [0], [0], [1], [0, 0, 1, 1], [], []>} : vector<256x128xbf16>, vector<128x128xbf16>, vector<256x128xf32> -> vector<256x128xf32>
    %c0_52 = arith.constant 0 : index
    %c0_53 = arith.constant 0 : index
    %149 = vector.load %arg15[%c0_52, %c0_53] : memref<1x128xf32, #tpu.memory_space<vmem>>, vector<1x128xf32>
    %150 = vector.broadcast %149 : vector<1x128xf32> to vector<256x128xf32>
    %151 = arith.addf %148, %150 : vector<256x128xf32>
    %152 = arith.addf %151, %117 : vector<256x128xf32>
    %153 = arith.addf %152, %7 : vector<256x128xf32>
    %c0_54 = arith.constant 0 : index
    %c0_55 = arith.constant 0 : index
    %154 = vector.load %arg16[%c0_54, %c0_55] : memref<1x128xf32, #tpu.memory_space<vmem>>, vector<1x128xf32>
    %155 = vector.broadcast %154 : vector<1x128xf32> to vector<256x128xf32>
    %156 = arith.mulf %153, %155 : vector<256x128xf32>
    %157 = vector.shape_cast %156 : vector<256x128xf32> to vector<16x16x128xf32>
    %c0_56 = arith.constant 0 : index
    %c0_57 = arith.constant 0 : index
    %c0_58 = arith.constant 0 : index
    %c0_59 = arith.constant 0 : index
    %158 = vector.load %arg17[%c0_56, %c0_57, %c0_58, %c0_59] : memref<1x16x16x128xf32, #tpu.memory_space<vmem>>, vector<1x16x16x128xf32>
    %159 = vector.shape_cast %158 : vector<1x16x16x128xf32> to vector<16x16x128xf32>
    %160 = vector.shape_cast %157 : vector<16x16x128xf32> to vector<1x16x16x128xf32>
    tpu.vector_store %arg17[%c0_56, %c0_57, %c0_58, %c0_59], %160 {strides = array<i32>} : memref<1x16x16x128xf32, #tpu.memory_space<vmem>>, vector<1x16x16x128xf32>,
    return
  }
  func.func @transform_0(%arg0: i32) -> (i32, i32, i32, i32) {
    %c0_i32 = arith.constant 0 : i32
    %c0_i32_0 = arith.constant 0 : i32
    %c0_i32_1 = arith.constant 0 : i32
    %c0_i32_2 = arith.constant 0 : i32
    return %arg0, %c0_i32, %c0_i32_0, %c0_i32_1 : i32, i32, i32, i32
  }
  func.func @transform_1(%arg0: i32) -> (i32, i32) {
    %c0_i32 = arith.constant 0 : i32
    %c0_i32_0 = arith.constant 0 : i32
    %c0_i32_1 = arith.constant 0 : i32
    return %c0_i32, %c0_i32_0 : i32, i32
  }
  func.func @transform_2(%arg0: i32) -> (i32, i32) {
    %c0_i32 = arith.constant 0 : i32
    %c0_i32_0 = arith.constant 0 : i32
    %c0_i32_1 = arith.constant 0 : i32
    return %c0_i32, %c0_i32_0 : i32, i32
  }
  func.func @transform_3(%arg0: i32) -> (i32, i32) {
    %c0_i32 = arith.constant 0 : i32
    %c0_i32_0 = arith.constant 0 : i32
    %c0_i32_1 = arith.constant 0 : i32
    return %c0_i32, %c0_i32_0 : i32, i32
  }
  func.func @transform_4(%arg0: i32) -> (i32, i32) {
    %c0_i32 = arith.constant 0 : i32
    %c0_i32_0 = arith.constant 0 : i32
    %c0_i32_1 = arith.constant 0 : i32
    return %c0_i32, %c0_i32_0 : i32, i32
  }
  func.func @transform_5(%arg0: i32) -> (i32, i32) {
    %c0_i32 = arith.constant 0 : i32
    %c0_i32_0 = arith.constant 0 : i32
    %c0_i32_1 = arith.constant 0 : i32
    return %c0_i32, %c0_i32_0 : i32, i32
  }
  func.func @transform_6(%arg0: i32) -> (i32, i32) {
    %c0_i32 = arith.constant 0 : i32
    %c0_i32_0 = arith.constant 0 : i32
    %c0_i32_1 = arith.constant 0 : i32
    return %c0_i32, %c0_i32_0 : i32, i32
  }
  func.func @transform_7(%arg0: i32) -> (i32, i32) {
    %c0_i32 = arith.constant 0 : i32
    %c0_i32_0 = arith.constant 0 : i32
    %c0_i32_1 = arith.constant 0 : i32
    return %c0_i32, %c0_i32_0 : i32, i32
  }
  func.func @transform_8(%arg0: i32) -> (i32, i32) {
    %c0_i32 = arith.constant 0 : i32
    %c0_i32_0 = arith.constant 0 : i32
    %c0_i32_1 = arith.constant 0 : i32
    return %c0_i32, %c0_i32_0 : i32, i32
  }
  func.func @transform_9(%arg0: i32) -> (i32, i32) {
    %c0_i32 = arith.constant 0 : i32
    %c0_i32_0 = arith.constant 0 : i32
    %c0_i32_1 = arith.constant 0 : i32
    return %c0_i32, %c0_i32_0 : i32, i32
  }
  func.func @transform_10(%arg0: i32) -> (i32, i32) {
    %c0_i32 = arith.constant 0 : i32
    %c0_i32_0 = arith.constant 0 : i32
    %c0_i32_1 = arith.constant 0 : i32
    return %c0_i32, %c0_i32_0 : i32, i32
  }
  func.func @transform_11(%arg0: i32) -> (i32, i32) {
    %c0_i32 = arith.constant 0 : i32
    %c0_i32_0 = arith.constant 0 : i32
    %c0_i32_1 = arith.constant 0 : i32
    return %c0_i32, %c0_i32_0 : i32, i32
  }
  func.func @transform_12(%arg0: i32) -> (i32, i32) {
    %c0_i32 = arith.constant 0 : i32
    %c0_i32_0 = arith.constant 0 : i32
    %c0_i32_1 = arith.constant 0 : i32
    return %c0_i32, %c0_i32_0 : i32, i32
  }
  func.func @transform_13(%arg0: i32) -> (i32, i32) {
    %c0_i32 = arith.constant 0 : i32
    %c0_i32_0 = arith.constant 0 : i32
    %c0_i32_1 = arith.constant 0 : i32
    return %c0_i32, %c0_i32_0 : i32, i32
  }
  func.func @transform_14(%arg0: i32) -> (i32, i32) {
    %c0_i32 = arith.constant 0 : i32
    %c0_i32_0 = arith.constant 0 : i32
    %c0_i32_1 = arith.constant 0 : i32
    return %c0_i32, %c0_i32_0 : i32, i32
  }
  func.func @transform_15(%arg0: i32) -> (i32, i32) {
    %c0_i32 = arith.constant 0 : i32
    %c0_i32_0 = arith.constant 0 : i32
    %c0_i32_1 = arith.constant 0 : i32
    return %c0_i32, %c0_i32_0 : i32, i32
  }
  func.func @transform_16(%arg0: i32) -> (i32, i32, i32, i32) {
    %c0_i32 = arith.constant 0 : i32
    %c0_i32_0 = arith.constant 0 : i32
    %c0_i32_1 = arith.constant 0 : i32
    %c0_i32_2 = arith.constant 0 : i32
    return %arg0, %c0_i32, %c0_i32_0, %c0_i32_1 : i32, i32, i32, i32
  }
}

</mosaic_0001>

<bundles_post_ra>
// kernel: tpu_custom_call.1
= control target key start
LH: loop header
LB: loop body
LE: loop exit
PB: predicated region body
PF: predicated region fallthrough
CT: control target
= control target key end

     0   :  { %s7999_s0 = inlined_call_operand.vmem [shape: bf16[2,16,16,4], index: 0, kind: input, shape index: {}]   ;;  %s8000_s1 = inlined_call_operand.vmem [shape: bf16[4,128], index: 1, kind: input, shape index: {}]   ;;  %s8001_s2 = inlined_call_operand.hbm [shape: f32[1,128], index: 2, kind: input, shape index: {}]   ;;  %s8002_s3 = inlined_call_operand.vmem [shape: bf16[128,128], index: 3, kind: input, shape index: {}]   ;;  %s8003_s4 = inlined_call_operand.hbm [shape: f32[1,128], index: 4, kind: input, shape index: {}]   ;;  %s8004_s5 = inlined_call_operand.vmem [shape: f32[9,128], index: 5, kind: input, shape index: {}]   ;;  %s8005_s6 = inlined_call_operand.vmem [shape: f32[1,128], index: 6, kind: input, shape index: {}]   ;;  %s8006_s7 = inlined_call_operand.vmem [shape: bf16[128,128], index: 7, kind: input, shape index: {}]   ;;  %s8007_s8 = inlined_call_operand.vmem [shape: f32[1,128], index: 8, kind: input, shape index: {}]   ;;  %s8008_s9 = inlined_call_operand.vmem [shape: bf16[128,128], index: 9, kind: input, shape index: {}]   ;;  %s8009_s10 = inlined_call_operand.vmem [shape: f32[1,128], index: 10, kind: input, shape index: {}]   ;;  %s8010_s11 = inlined_call_operand.vmem [shape: bf16[128,128], index: 11, kind: input, shape index: {}]   ;;  %s8011_s12 = inlined_call_operand.vmem [shape: f32[1,128], index: 12, kind: input, shape index: {}]   ;;  %s8012_s13 = inlined_call_operand.vmem [shape: bf16[128,128], index: 13, kind: input, shape index: {}]   ;;  %s8013_s14 = inlined_call_operand.vmem [shape: f32[1,128], index: 14, kind: input, shape index: {}]   ;;  %s8014_s15 = inlined_call_operand.vmem [shape: f32[1,128], index: 15, kind: input, shape index: {}]   ;;  %s8015_s16 = inlined_call_operand.hbm [shape: f32[2,16,16,128], index: 16, kind: output, shape index: {}]  }
   0x1   :  { %8150 = sst [smem:[#allocation105_spill]] %s7999_s0 }
   0x2   :  { %8151 = sst [smem:[#allocation106_spill]] %s8015_s16 }
   0x3   :  { %21 = vsyncpa [#allocation3], 0 }
   0x4   :  { %22 = vsyncpa [#allocation6], 0 }
   0x5   :  { %23 = vsyncpa [#allocation4], 0 }
   0x6   :  { %25 = vsyncpa [#allocation4 + $0x1], 0  ;;  %s5341_s21 = smov 0   ;;  %s5343_s22 = smov 0  }
   0x7   :  { %s5345_s23 = smov 0   ;;  %s5347_s24 = smov 0  }
   0x8 LB: > { %8152 = sst [smem:[#allocation11_spill]] %s5237_s21  ;;  %s5362_s25 = sadd.s32 4294967295, %s5249_s24   ;;  %s5249_s24 = sphi %s5347_s24, %s8505_s24   ;;  %s5245_s23 = sphi %s5345_s23, %s8507_s23   ;;  %s5241_s22 = sphi %s5343_s22, %s8509_s22   ;;  %s5237_s21 = sphi %s5341_s21, %s8508_s21  }
   0x9   : > { %8153 = sst [smem:[#allocation12_spill]] %s5245_s23  ;;  %s3994_s26 = sadd.s32 4294967294, %s5249_s24  }
   0xa   : > { %8154 = sst [smem:[#allocation13_spill]] %s5249_s24  ;;  %s5366_s27 = sadd.s32 1, %s5249_s24  }
   0xb   : > { %8155 = sst [smem:[#allocation14_spill]] %s5366_s27  ;;  %s379_s28 = sadd.s32 1, %s5245_s23 }
   0xc   : > { %s376_s29 = ssub.s32 %s5249_s24, %s5366_s27  ;;  %p389_p0 = scmp.ne.s32.totalorder %s5245_s23, %s5241_s22 }
   0xd   : > { %p377_p1 = scmp.eq.s32.totalorder %s376_s29, 0  ;;  %p390_p2 = scmp.eq.s32.totalorder %s5362_s25, 1 }
   0xe   : > { %p395_p3 = scmp.ne.s32.totalorder %s5241_s22, %s5237_s21  ;;  %p396_p4 = scmp.eq.s32.totalorder %s3994_s26, 1 }
   0xf   : > { %s5377_s30 = scalar_select %p377_p1, %s5245_s23, %s379_s28  }
  0x10   : > { %p5379_p5 = por %p390_p2, %p389_p0  ;;  %p5383_p6 = por %p396_p4, %p395_p3 }
  0x11   : > { %8156 = sst [smem:[#allocation15_spill]] %s5377_s30  ;;  %p3995_p7 = scmp.ge.s32.totalorder %s5249_s24, 1 }
  0x12   : > { %s8157_s0 = scalar_select %p5379_p5, 1, 0 }
  0x13   : > { %s8158_s17 = scalar_select %p5383_p6, 1, 0 }
  0x14   : > { %p403_p8 = scmp.lt.s32.totalorder %s5249_s24, 3  ;;  %p8022_p9 = scmp.eq.s32.totalorder %s5362_s25, 0 }
  0x15   : > { %8159 = sst [smem:[#allocation16_spill]] %s8158_s17  ;;  %s5251_s19 = smov [#allocation2]  }
  0x16   : > { %p5390_p10 = pnand %p3995_p7, %p403_p8  ;;  %s419_s20 = sshll.u32 %s5251_s19, 4  ;;  %s420_s20 = int_to_ptr.vmem [resolvable:$true] %s419_s20 }
  0x17   : > { %s5252_s26 = smov [#allocation5]   ;;  %s5123_s27 = scalar_lea.hbm %s8001_s2, 16 }
  0x18   : > { %s8160_s18 = scalar_select %p5390_p10, 1, 0 }
  0x19   : > { %p4627_p11 = pneg %p5390_p10  ;;  %s433_s28 = sshll.u32 %s5252_s26, 4  ;;  %s5402_s28 = int_to_ptr.vmem [resolvable:$true] %s433_s28 }
  0x1a   : > { %p5124_p13 = scmp.ne.s32.totalorder %s8001_s2, %s5123_s27  ;;  %p5130_p3 = scmp.lt.u32.totalorder %s5123_s27, %s8001_s2 }
  0x1b   : > { %p5398_p12 = pnand %p8022_p9, %p4627_p11 }
  0x1d   : > { %p5125_p0 = pneg %p5398_p12 }
  0x1f   : > { %p5126_p1 = pnand %p5125_p0, %p5124_p13 }
  0x21   : > { %p5127_p2 = pneg %p5126_p1 }
  0x23   : > { %p5132_p4 = pnand %p5130_p3, %p5127_p2 }
  0x25   : > { %5135 = shalt.err (!%p5132_p4)
}
  0x26   : > { %s5136_s24 = scalar_lea.vmem %s420_s20, 16  ;;  %s5143_s23 = scalar_lea.vmem %s420_s20, 32 }
  0x27   : > { %p5137_p7 = scmp.ne.s32.totalorder %s420_s20, %s5136_s24  ;;  %p5144_p9 = scmp.lt.s32.totalorder %s420_s20, %s420_s20 }
  0x28   : > { %p5145_p6 = scmp.lt.s32.totalorder %s5143_s23, %s5136_s24 }
  0x29   : > { %p5139_p8 = pnand %p5137_p7, %p5125_p0 }
  0x2a   : > { %p5146_p5 = por %p5145_p6, %p5144_p9 }
  0x2b   : > { %p5140_p11 = pneg %p5139_p8 }
  0x2d   : > { %p5147_p10 = pnand %p5146_p5, %p5140_p11 }
  0x2f   : > { %5150 = shalt.err (!%p5147_p10)
}
  0x30   : > { %4630 = dma.hbm_to_vmem [thread:$0]  (!%p5398_p12), %s8001_s2, 16, %s420_s20, [#allocation3]  }
  0x31   : > { %s5151_s19 = scalar_lea.hbm %s8003_s4, 16 }
  0x32   : > { %p5152_p13 = scmp.ne.s32.totalorder %s8003_s4, %s5151_s19  ;;  %p5158_p9 = scmp.lt.u32.totalorder %s5151_s19, %s8003_s4 }
  0x34   : > { %p5154_p6 = pnand %p5152_p13, %p5125_p0 }
  0x36   : > { %p5155_p5 = pneg %p5154_p6 }
  0x38   : > { %p5160_p10 = pnand %p5158_p9, %p5155_p5 }
  0x3a   : > { %5163 = shalt.err (!%p5160_p10)
}
  0x3b   : > { %s5164_s20 = scalar_lea.vmem %s5402_s28, 16  ;;  %s5171_s16 = scalar_lea.vmem %s5402_s28, 32 }
  0x3c   : > { %p5165_p1 = scmp.ne.s32.totalorder %s5402_s28, %s5164_s20  ;;  %p5172_p4 = scmp.lt.s32.totalorder %s5402_s28, %s5402_s28 }
  0x3d   : > { %p5173_p7 = scmp.lt.s32.totalorder %s5171_s16, %s5164_s20 }
  0x3e   : > { %p5167_p2 = pnand %p5165_p1, %p5125_p0 }
  0x3f   : > { %p5174_p8 = por %p5173_p7, %p5172_p4 }
  0x40   : > { %p5168_p3 = pneg %p5167_p2 }
  0x42   : > { %p5175_p11 = pnand %p5174_p8, %p5168_p3 }
  0x44   : > { %5178 = shalt.err (!%p5175_p11)
}
  0x45   : > { %4633 = dma.hbm_to_vmem [thread:$0]  (!%p5398_p12), %s8003_s4, 16, %s5402_s28, [#allocation6]  }
  0x46   : > { %p8162_p13 = scmp.ne.s32.totalorder %s8160_s18, 0 }
  0x48   : > { %487 = sbr.rel (%p8162_p13) target bundleno = 1525 (0x5f5), region = 84 }
  0x4f   : > { %p8163_p0 = scmp.eq.s32.totalorder %s5362_s25, 0 }
  0x51   : > { %5224 = dma.done.wait (%p8163_p0), [#allocation3], 16   ;;  %p8164_p6 = pmov %p8163_p0 }
  0x52   : > { %p8165_p5 = pmov %p8163_p0 }
  0x53   : > { %5226 = vsyncadd (%p8164_p6), [#allocation3], 4294967280 }
  0x54   : > { %5228 = dma.done.wait (%p8165_p5), [#allocation6], 16   ;;  %p8166_p9 = pmov %p8163_p0 }
  0x55   : > { %p541_p10 = scmp.lt.s32.totalorder %s5362_s25, 1  ;;  %vm716_vm0 = vcmask 1041408   ;;  %s8167_s17 = sld [smem:[#allocation105_spill]]  ;;  %vm667_vm1 = vcmask 31744   ;;  %v579_v0 = vld [vmem:[%s8000_s1] sm:$0x3] }
  0x56   : > { %5230 = vsyncadd (%p8166_p9), [#allocation6], 4294967280  ;;  %4616 = vmatprep.subr.msk.bf16.mxu0 %vm716_vm0, %v579_v0  ;;  %v718_v1 = vsel %vm716_vm0, %v579_v0, 0  ;;  %v4695_v9 = vld [vmem:[%s8002_s3] sm:$0xff]   ;;  %v4696_v10 = vld [vmem:[%s8002_s3 + $0x8] sm:$0xff]   ;;  %s538_s24 = sand.u32 1, %s5241_s22  }
  0x57   : > { %s542_s29 = scalar_select %p541_p10, %s5362_s25, 1  ;;  %4327 = vmatpush3.bf16.msra.mxu0 %v718_v1  ;;  %4360 = vmatprep.subr.bf16.mxu1 %v4695_v9  ;;  %v4697_v11 = vld [vmem:[%s8002_s3 + $0x10] sm:$0xff]   ;;  %v4698_v13 = vld [vmem:[%s8002_s3 + $0x18] sm:$0xff]   ;;  %v4699_v15 = vld [vmem:[%s8002_s3 + $0x20] sm:$0xff]  }
  0x58   : > { %4361 = vmatpush3.bf16.msra.mxu1 %v4695_v9  ;;  %v4700_v17 = vld [vmem:[%s8002_s3 + $0x28] sm:$0xff]   ;;  %v4701_v24 = vld [vmem:[%s8002_s3 + $0x30] sm:$0xff]   ;;  %v4702_v25 = vld [vmem:[%s8002_s3 + $0x38] sm:$0xff]   ;;  %s4002_s23 = sshll.u32 %s538_s24, 8  ;;  %s4188_s21 = sshll.u32 %s5362_s25, 12 }
  0x59   : > { %s4187_s28 = sshll.u32 %s542_s29, 7  ;;  %4362 = vmatprep.subr.bf16.mxu1 %v4696_v10  ;;  %v4703_v26 = vld [vmem:[%s8006_s7] sm:$0xff]   ;;  %s7799_s30 = scalar_lea.vmem [#allocation7], %s4002_s23 }
  0x5a   : > { %4408 = vmatprep.subr.bf16.mxu0 %v4703_v26  ;;  %v5531_v28 = vld [vmem:[#allocation2] ss:$0 sm:$0xff]  ;;  %s3910_s29 = sshll.u32 %s7799_s30, 4  ;;  %s8499_s18 = sld [smem:[#allocation106_spill]]  ;;  %s7950_s29 = int_to_ptr.vmem [resolvable:$true] %s3910_s29 }
  0x5b   : > { %s5467_s19 = scalar_lea.vmem %s8167_s17, %s4187_s28  ;;  %s7958_s25 = scalar_lea.sflag [#allocation4], %s538_s24 }
  0x5c   : > { %v4679_v2 = vld [vmem:[%s5467_s19] sm:$0xff]   ;;  %v4680_v3 = vld [vmem:[%s5467_s19 + $0x8] sm:$0xff]   ;;  %v4681_v4 = vld [vmem:[%s5467_s19 + $0x10] sm:$0xff]   ;;  %4363 = vmatpush3.bf16.msra.mxu1 %v4696_v10  ;;  %s5179_s17 = scalar_lea.vmem %s7950_s29, 4096  ;;  %p8500_p1 = scmp.ne.s32.totalorder %s8157_s0, 0 }
  0x5d   : > { %4328 = vmatprep.mubr.msk.bf16.mxu0 %vm667_vm1, %v4679_v2  ;;  %v4682_v5 = vld [vmem:[%s5467_s19 + $0x18] sm:$0xff]   ;;  %v4683_v6 = vld [vmem:[%s5467_s19 + $0x20] sm:$0xff]   ;;  %v4684_v7 = vld [vmem:[%s5467_s19 + $0x28] sm:$0xff]   ;;  %4364 = vmatprep.subr.bf16.mxu1 %v4697_v11  ;;  %p5180_p12 = scmp.ne.s32.totalorder %s7950_s29, %s5179_s17  ;;  %s5253_s26 = smov [#allocation7]  }
  0x5e   : > { %4329 = vmatmul.mubr.msk.bf16.vlgmr.msra.gmra.mrb[0].mxu0 %vm667_vm1, %v4680_v3  ;;  %v4685_v8 = vld [vmem:[%s5467_s19 + $0x30] sm:$0xff]   ;;  %v4686_v12 = vld [vmem:[%s5467_s19 + $0x38] sm:$0xff]   ;;  %v4687_v14 = vld [vmem:[%s5467_s19 + $0x40] sm:$0xff]   ;;  %s5183_s23 = sshll.u32 %s5253_s26, 4  ;;  %s5184_s23 = int_to_ptr.vmem [resolvable:$false] %s5183_s23 }
  0x5f   : > { %4332 = vmatprep.mubr.msk.bf16.mxu0 %vm667_vm1, %v4681_v4  ;;  %v4688_v16 = vld [vmem:[%s5467_s19 + $0x48] sm:$0xff]   ;;  %v4689_v18 = vld [vmem:[%s5467_s19 + $0x50] sm:$0xff]   ;;  %v4690_v19 = vld [vmem:[%s5467_s19 + $0x58] sm:$0xff]   ;;  %4409 = vmatpush3.bf16.msra.mxu0 %v4703_v26  ;;  %p5181_p2 = pnand %p5180_p12, %p8500_p1  ;;  %s5185_s20 = scalar_lea.vmem %s5184_s23, 8192 }
  0x60   : > { %4365 = vmatpush3.bf16.msra.mxu1 %v4697_v11  ;;  %v4691_v20 = vld [vmem:[%s5467_s19 + $0x60] sm:$0xff]   ;;  %v4692_v21 = vld [vmem:[%s5467_s19 + $0x68] sm:$0xff]   ;;  %v4693_v22 = vld [vmem:[%s5467_s19 + $0x70] sm:$0xff]   ;;  %s7948_s27 = scalar_lea.hbm %s8499_s18, %s4188_s21  ;;  %p5186_p4 = scmp.lt.s32.totalorder %s7950_s29, %s5184_s23 }
  0x61   : > { %4366 = vmatprep.subr.bf16.mxu1 %v4698_v13  ;;  %v4694_v23 = vld [vmem:[%s5467_s19 + $0x78] sm:$0xff]   ;;  %p5182_p3 = pneg %p5181_p2  ;;  %p5187_p7 = scmp.lt.s32.totalorder %s5185_s20, %s5179_s17 }
  0x63   : > { %p5188_p8 = por %p5187_p7, %p5186_p4 }
  0x64   : > { %4367 = vmatpush3.bf16.msra.mxu1 %v4698_v13 }
  0x65   : > { %4368 = vmatprep.subr.bf16.mxu1 %v4699_v15  ;;  %p5189_p11 = pnand %p5188_p8, %p5182_p3 }
  0x66   : > { %4333 = vmatmul.mubr.msk.bf16.gmra.mrb[4].mxu0 %vm667_vm1, %v4682_v5 }
  0x67   : > { %4336 = vmatprep.mubr.msk.bf16.mxu0 %vm667_vm1, %v4683_v6 }
  0x68   : > { %4369 = vmatpush3.bf16.msra.mxu1 %v4699_v15 }
  0x69   : > { %4370 = vmatprep.subr.bf16.mxu1 %v4700_v17 }
  0x6c   : > { %4371 = vmatpush3.bf16.msra.mxu1 %v4700_v17 }
  0x6d   : > { %4372 = vmatprep.subr.bf16.mxu1 %v4701_v24 }
  0x6e   : > { %4337 = vmatmul.mubr.msk.bf16.gmra.mrb[8].mxu0 %vm667_vm1, %v4684_v7 }
  0x6f   : > { %4340 = vmatprep.mubr.msk.bf16.mxu0 %vm667_vm1, %v4685_v8 }
  0x70   : > { %4373 = vmatpush3.bf16.msra.mxu1 %v4701_v24 }
  0x71   : > { %4374 = vmatprep.subr.bf16.mxu1 %v4702_v25 }
  0x74   : > { %4375 = vmatpush3.bf16.msra.mxu1 %v4702_v25 }
  0x76   : > { %4341 = vmatmul.mubr.msk.bf16.gmra.mrb[12].mxu0 %vm667_vm1, %v4686_v12 }
  0x77   : > { %4344 = vmatprep.mubr.msk.bf16.mxu0 %vm667_vm1, %v4687_v14 }
  0x7e   : > { %4345 = vmatmul.mubr.msk.bf16.gmra.mrb[16].mxu0 %vm667_vm1, %v4688_v16 }
  0x7f   : > { %4348 = vmatprep.mubr.msk.bf16.mxu0 %vm667_vm1, %v4689_v18 }
  0x86   : > { %4349 = vmatmul.mubr.msk.bf16.gmra.mrb[20].mxu0 %vm667_vm1, %v4690_v19 }
  0x87   : > { %4352 = vmatprep.mubr.msk.bf16.mxu0 %vm667_vm1, %v4691_v20 }
  0x8e   : > { %4353 = vmatmul.mubr.msk.bf16.gmra.mrb[24].mxu0 %vm667_vm1, %v4692_v21 }
  0x8f   : > { %4356 = vmatprep.mubr.msk.bf16.mxu0 %vm667_vm1, %v4693_v22 }
  0x96   : > { %4357 = vmatmul.mubr.msk.bf16.gmra.mrb[28].mxu0 %vm667_vm1, %v4694_v23 }
 0x131   : > { %v4330_v27 = vpop.f32.mrb[0].mxu0 }
 0x132   : > { %v754_v29 = vpop.f32.mrb[1].mxu0  ;;  %v5543_v35 = vadd.f32 %v4330_v27, %v5531_v28 }
 0x133   : > { %v4331_v30 = vpop.f32.mrb[2].mxu0  ;;  %v5537_v33 = vadd.f32 %v5531_v28, %v754_v29 }
 0x134   : > { %v5534_v31 = vadd.f32 %v4331_v30, %v5531_v28  ;;  %v757_v32 = vpop.f32.mrb[3].mxu0  ;;  %8171 = vst [vmem:[#allocation20_spill] sm:$0xff] %v5543_v35 }
 0x135   : > { %8169 = vst [vmem:[#allocation18_spill] sm:$0xff] %v5537_v33  ;;  %v5540_v34 = vadd.f32 %v5531_v28, %v757_v32 }
 0x136   : > { %8168 = vst [vmem:[#allocation17_spill] sm:$0xff] %v5534_v31  ;;  %v882_v37 = vpack.c.bf16 %v5534_v31, %v5543_v35 }
 0x137   : > { %8170 = vst [vmem:[#allocation19_spill] sm:$0xff] %v5540_v34  ;;  %v881_v36 = vpack.c.bf16 %v5540_v34, %v5537_v33 }
 0x139   : > { %v4334_v38 = vpop.f32.mrb[4].mxu0  ;;  %4376 = vmatprep.mubr.bf16.mxu1 %v881_v36 }
 0x13a   : > { %v770_v39 = vpop.f32.mrb[5].mxu0  ;;  %4377 = vmatmul.mubr.bf16.vlgmr.msra.gmra.mrb[0].mxu1 %v882_v37  ;;  %v5559_v45 = vadd.f32 %v4334_v38, %v5531_v28 }
 0x13b   : > { %v4335_v40 = vpop.f32.mrb[6].mxu0  ;;  %v5553_v43 = vadd.f32 %v5531_v28, %v770_v39 }
 0x13c   : > { %v5550_v41 = vadd.f32 %v4335_v40, %v5531_v28  ;;  %v773_v42 = vpop.f32.mrb[7].mxu0  ;;  %8175 = vst [vmem:[#allocation24_spill] sm:$0xff] %v5559_v45 }
 0x13d   : > { %8173 = vst [vmem:[#allocation22_spill] sm:$0xff] %v5553_v43  ;;  %v5556_v44 = vadd.f32 %v5531_v28, %v773_v42 }
 0x13e   : > { %8172 = vst [vmem:[#allocation21_spill] sm:$0xff] %v5550_v41  ;;  %v884_v47 = vpack.c.bf16 %v5550_v41, %v5559_v45 }
 0x13f   : > { %8174 = vst [vmem:[#allocation23_spill] sm:$0xff] %v5556_v44  ;;  %v883_v46 = vpack.c.bf16 %v5556_v44, %v5553_v43 }
 0x141   : > { %v4338_v48 = vpop.f32.mrb[8].mxu0  ;;  %4380 = vmatprep.mubr.bf16.mxu1 %v883_v46 }
 0x142   : > { %v786_v49 = vpop.f32.mrb[9].mxu0  ;;  %4381 = vmatmul.mubr.bf16.gmra.mrb[4].mxu1 %v884_v47  ;;  %v5575_v55 = vadd.f32 %v4338_v48, %v5531_v28 }
 0x143   : > { %v4339_v50 = vpop.f32.mrb[10].mxu0  ;;  %v5569_v53 = vadd.f32 %v5531_v28, %v786_v49 }
 0x144   : > { %v5566_v51 = vadd.f32 %v4339_v50, %v5531_v28  ;;  %v789_v52 = vpop.f32.mrb[11].mxu0  ;;  %8179 = vst [vmem:[#allocation28_spill] sm:$0xff] %v5575_v55 }
 0x145   : > { %8177 = vst [vmem:[#allocation26_spill] sm:$0xff] %v5569_v53  ;;  %v5572_v54 = vadd.f32 %v5531_v28, %v789_v52 }
 0x146   : > { %8176 = vst [vmem:[#allocation25_spill] sm:$0xff] %v5566_v51  ;;  %v886_v57 = vpack.c.bf16 %v5566_v51, %v5575_v55 }
 0x147   : > { %8178 = vst [vmem:[#allocation27_spill] sm:$0xff] %v5572_v54  ;;  %v885_v56 = vpack.c.bf16 %v5572_v54, %v5569_v53 }
 0x149   : > { %v4342_v58 = vpop.f32.mrb[12].mxu0  ;;  %4384 = vmatprep.mubr.bf16.mxu1 %v885_v56 }
 0x14a   : > { %v802_v59 = vpop.f32.mrb[13].mxu0  ;;  %4385 = vmatmul.mubr.bf16.gmra.mrb[8].mxu1 %v886_v57  ;;  %v5591_v1 = vadd.f32 %v4342_v58, %v5531_v28  ;;  %v4704_v57 = vld [vmem:[%s8006_s7 + $0x8] sm:$0xff]   ;;  %v4705_v58 = vld [vmem:[%s8006_s7 + $0x10] sm:$0xff]  }
 0x14b   : > { %v4343_v60 = vpop.f32.mrb[14].mxu0  ;;  %v5585_v63 = vadd.f32 %v5531_v28, %v802_v59  ;;  %4410 = vmatprep.subr.bf16.mxu0 %v4704_v57  ;;  %v4707_v59 = vld [vmem:[%s8006_s7 + $0x20] sm:$0xff]  }
 0x14c   : > { %v5582_v61 = vadd.f32 %v4343_v60, %v5531_v28  ;;  %v805_v62 = vpop.f32.mrb[15].mxu0  ;;  %8183 = vst [vmem:[#allocation32_spill] sm:$0xff] %v5591_v1  ;;  %4411 = vmatpush3.bf16.msra.mxu0 %v4704_v57  ;;  %v4708_v60 = vld [vmem:[%s8006_s7 + $0x28] sm:$0xff]  }
 0x14d   : > { %8181 = vst [vmem:[#allocation30_spill] sm:$0xff] %v5585_v63  ;;  %v5588_v0 = vadd.f32 %v5531_v28, %v805_v62  ;;  %4412 = vmatprep.subr.bf16.mxu0 %v4705_v58  ;;  %v4709_v62 = vld [vmem:[%s8006_s7 + $0x30] sm:$0xff]  }
 0x14e   : > { %8180 = vst [vmem:[#allocation29_spill] sm:$0xff] %v5582_v61  ;;  %v888_v3 = vpack.c.bf16 %v5582_v61, %v5591_v1 }
 0x14f   : > { %8182 = vst [vmem:[#allocation31_spill] sm:$0xff] %v5588_v0  ;;  %v887_v2 = vpack.c.bf16 %v5588_v0, %v5585_v63 }
 0x150   : > { %4413 = vmatpush3.bf16.msra.mxu0 %v4705_v58 }
 0x151   : > { %v4346_v4 = vpop.f32.mrb[16].mxu0  ;;  %4388 = vmatprep.mubr.bf16.mxu1 %v887_v2  ;;  %v4710_v2 = vld [vmem:[%s8006_s7 + $0x38] sm:$0xff]  }
 0x152   : > { %v818_v5 = vpop.f32.mrb[17].mxu0  ;;  %4389 = vmatmul.mubr.bf16.gmra.mrb[12].mxu1 %v888_v3  ;;  %v5607_v11 = vadd.f32 %v4346_v4, %v5531_v28  ;;  %v5682_v3 = vld [vmem:[#allocation5] ss:$0 sm:$0xff]  ;;  %v1387_v4 = vlaneseq }
 0x153   : > { %v4347_v6 = vpop.f32.mrb[18].mxu0  ;;  %v5601_v9 = vadd.f32 %v5531_v28, %v818_v5 }
 0x154   : > { %v5598_v7 = vadd.f32 %v4347_v6, %v5531_v28  ;;  %v821_v8 = vpop.f32.mrb[19].mxu0  ;;  %8187 = vst [vmem:[#allocation36_spill] sm:$0xff] %v5607_v11 }
 0x155   : > { %8185 = vst [vmem:[#allocation34_spill] sm:$0xff] %v5601_v9  ;;  %v5604_v10 = vadd.f32 %v5531_v28, %v821_v8 }
 0x156   : > { %8184 = vst [vmem:[#allocation33_spill] sm:$0xff] %v5598_v7  ;;  %v890_v13 = vpack.c.bf16 %v5598_v7, %v5607_v11 }
 0x157   : > { %8186 = vst [vmem:[#allocation35_spill] sm:$0xff] %v5604_v10  ;;  %v889_v12 = vpack.c.bf16 %v5604_v10, %v5601_v9 }
 0x159   : > { %v4350_v14 = vpop.f32.mrb[20].mxu0  ;;  %4392 = vmatprep.mubr.bf16.mxu1 %v889_v12  ;;  %v5687_v12 = vshrl.u32 %v1387_v4, 7 }
 0x15a   : > { %v834_v15 = vpop.f32.mrb[21].mxu0  ;;  %4393 = vmatmul.mubr.bf16.gmra.mrb[16].mxu1 %v890_v13  ;;  %v5623_v21 = vadd.f32 %v4350_v14, %v5531_v28 }
 0x15b   : > { %v4351_v16 = vpop.f32.mrb[22].mxu0  ;;  %v5617_v19 = vadd.f32 %v5531_v28, %v834_v15  ;;  %vm1392_vm2 = vcmp.gt.s32.totalorder %v5687_v12, 0  ;;  %vm1431_vm4 = vcmp.lt.s32.totalorder %v5687_v12, 1  ;;  %vm1659_vm5 = vcmp.lt.s32.totalorder %v5687_v12, 7 }
 0x15c   : > { %v5614_v17 = vadd.f32 %v4351_v16, %v5531_v28  ;;  %v837_v18 = vpop.f32.mrb[23].mxu0  ;;  %8191 = vst [vmem:[#allocation40_spill] sm:$0xff] %v5623_v21 }
 0x15d   : > { %8189 = vst [vmem:[#allocation38_spill] sm:$0xff] %v5617_v19  ;;  %v5620_v20 = vadd.f32 %v5531_v28, %v837_v18 }
 0x15e   : > { %8188 = vst [vmem:[#allocation37_spill] sm:$0xff] %v5614_v17  ;;  %v892_v23 = vpack.c.bf16 %v5614_v17, %v5623_v21 }
 0x15f   : > { %8190 = vst [vmem:[#allocation39_spill] sm:$0xff] %v5620_v20  ;;  %v891_v22 = vpack.c.bf16 %v5620_v20, %v5617_v19 }
 0x161   : > { %v4354_v24 = vpop.f32.mrb[24].mxu0  ;;  %4396 = vmatprep.mubr.bf16.mxu1 %v891_v22 }
 0x162   : > { %v850_v25 = vpop.f32.mrb[25].mxu0  ;;  %4397 = vmatmul.mubr.bf16.gmra.mrb[20].mxu1 %v892_v23  ;;  %v5639_v36 = vadd.f32 %v4354_v24, %v5531_v28 }
 0x163   : > { %v4355_v26 = vpop.f32.mrb[26].mxu0  ;;  %v5633_v30 = vadd.f32 %v5531_v28, %v850_v25 }
 0x164   : > { %v5630_v27 = vadd.f32 %v4355_v26, %v5531_v28  ;;  %v853_v29 = vpop.f32.mrb[27].mxu0  ;;  %8195 = vst [vmem:[#allocation44_spill] sm:$0xff] %v5639_v36 }
 0x165   : > { %8193 = vst [vmem:[#allocation42_spill] sm:$0xff] %v5633_v30  ;;  %v5636_v32 = vadd.f32 %v5531_v28, %v853_v29 }
 0x166   : > { %8192 = vst [vmem:[#allocation41_spill] sm:$0xff] %v5630_v27  ;;  %v894_v38 = vpack.c.bf16 %v5630_v27, %v5639_v36 }
 0x167   : > { %8194 = vst [vmem:[#allocation43_spill] sm:$0xff] %v5636_v32  ;;  %v893_v37 = vpack.c.bf16 %v5636_v32, %v5633_v30 }
 0x169   : > { %v4358_v39 = vpop.f32.mrb[28].mxu0  ;;  %4400 = vmatprep.mubr.bf16.mxu1 %v893_v37  ;;  %v1496_v37 = vsub.s32 0, %v5687_v12 }
 0x16a   : > { %v866_v40 = vpop.f32.mrb[29].mxu0  ;;  %4401 = vmatmul.mubr.bf16.gmra.mrb[24].mxu1 %v894_v38  ;;  %v5655_v50 = vadd.f32 %v4358_v39, %v5531_v28  ;;  %v5706_v38 = vld [vmem:[%s8004_s5] sm:$0xff] }
 0x16b   : > { %v4359_v42 = vpop.f32.mrb[30].mxu0  ;;  %v5649_v48 = vadd.f32 %v5531_v28, %v866_v40 }
 0x16c   : > { %v5646_v46 = vadd.f32 %v4359_v42, %v5531_v28  ;;  %v869_v47 = vpop.f32.mrb[31].mxu0  ;;  %8199 = vst [vmem:[#allocation48_spill] sm:$0xff] %v5655_v50 }
 0x16d   : > { %8197 = vst [vmem:[#allocation46_spill] sm:$0xff] %v5649_v48  ;;  %v5652_v49 = vadd.f32 %v5531_v28, %v869_v47  ;;  %v4706_v28 = vld [vmem:[%s8006_s7 + $0x18] sm:$0xff]  }
 0x16e   : > { %8196 = vst [vmem:[#allocation45_spill] sm:$0xff] %v5646_v46  ;;  %v896_v56 = vpack.c.bf16 %v5646_v46, %v5655_v50  ;;  %4414 = vmatprep.subr.bf16.mxu0 %v4706_v28 }
 0x16f   : > { %8198 = vst [vmem:[#allocation47_spill] sm:$0xff] %v5652_v49  ;;  %v895_v52 = vpack.c.bf16 %v5652_v49, %v5649_v48  ;;  %4415 = vmatpush3.bf16.msra.mxu0 %v4706_v28 }
 0x170   : > { %4416 = vmatprep.subr.bf16.mxu0 %v4707_v59 }
 0x171   : > { %4404 = vmatprep.mubr.bf16.mxu1 %v895_v52 }
 0x172   : > { %4405 = vmatmul.mubr.bf16.gmra.mrb[28].mxu1 %v896_v56  ;;  %v5712_v56 = vrot.slane %v5706_v38, %v1496_v37 }
 0x173   : > { %4417 = vmatpush3.bf16.msra.mxu0 %v4707_v59 }
 0x174   : > { %4418 = vmatprep.subr.bf16.mxu0 %v4708_v60 }
 0x177   : > { %4419 = vmatpush3.bf16.msra.mxu0 %v4708_v60 }
 0x178   : > { %4420 = vmatprep.subr.bf16.mxu0 %v4709_v62 }
 0x17b   : > { %4421 = vmatpush3.bf16.msra.mxu0 %v4709_v62  ;;  %v1564_v62 = vsub.s32 1, %v5687_v12 }
 0x17c   : > { %4422 = vmatprep.subr.bf16.mxu0 %v4710_v2 }
 0x17f   : > { %4423 = vmatpush3.bf16.msra.mxu0 %v4710_v2 }
 0x20d   : > { %v4378_v5 = vpop.f32.mrb[0].mxu1 }
 0x20e   : > { %v5685_v6 = vadd.f32 %v4378_v5, %v5682_v3  ;;  %v1002_v8 = vpop.f32.mrb[1].mxu1  ;;  %v1866_v5 = vsub.s32 4, %v5687_v12 }
 0x20f   : > { %v5690_v13 = vadd.f32 %v5682_v3, %v1002_v8  ;;  %v4379_v14 = vpop.f32.mrb[2].mxu1 }
 0x210   : > { %v4049_v15 = vmul.f32 -4.0, %v5685_v6  ;;  %v5694_v16 = vadd.f32 %v4379_v14, %v5682_v3  ;;  %v1005_v18 = vpop.f32.mrb[3].mxu1 }
 0x211   : > { %v4047_v22 = vmul.f32 -4.0, %v5690_v13  ;;  %v5698_v23 = vadd.f32 %v5682_v3, %v1005_v18 }
 0x212   : > { %v1197_v24 = vmul.f32 1.442695, %v4049_v15  ;;  %v4050_v25 = vmul.f32 -4.0, %v5694_v16  ;;  %v1498_v15 = vmul.f32 0.0, %v5712_v56 }
 0x213   : > { %v1193_v26 = vmul.f32 1.442695, %v4047_v22  ;;  %v4048_v29 = vmul.f32 -4.0, %v5698_v23 }
 0x214   : > { %4735 = vpow2.f32 %v1197_v24  ;;  %v1199_v39 = vmul.f32 1.442695, %v4050_v25  ;;  %v5733_v24 = vld [vmem:[%s8005_s6] ss:$0 sm:$0xff] }
 0x215   : > { %4737 = vpow2.f32 %v1193_v26  ;;  %v1195_v40 = vmul.f32 1.442695, %v4048_v29  ;;  %v4382_v42 = vpop.f32.mrb[4].mxu1  ;;  %v5736_v26 = vrot.slane %v5706_v38, %v1564_v62  ;;  %v2076_v29 = vsub.s32 7, %v5687_v12 }
 0x216   : > { %4739 = vpow2.f32 %v1199_v39  ;;  %v5709_v47 = vadd.f32 %v4382_v42, %v5682_v3  ;;  %v1018_v52 = vpop.f32.mrb[5].mxu1  ;;  %v5740_v42 = vrot.slane %v5706_v38, %v1866_v5  ;;  %v1530_v62 = vadd.f32 %v5733_v24, %v1498_v15 }
 0x217   : > { %4741 = vpow2.f32 %v1195_v40  ;;  %v5715_v57 = vadd.f32 %v5682_v3, %v1018_v52  ;;  %v4383_v58 = vpop.f32.mrb[6].mxu1  ;;  %v1724_v52 = vsub.s32 2, %v5687_v12  ;;  %v1566_v5 = vmul.f32 0.0, %v5736_v26 }
 0x218   : > { %v4053_v28 = vmul.f32 -4.0, %v5709_v47  ;;  %v5719_v59 = vadd.f32 %v4383_v58, %v5682_v3  ;;  %v1021_v60 = vpop.f32.mrb[7].mxu1 }
 0x219   : > { %v4051_v2 = vmul.f32 -4.0, %v5715_v57  ;;  %v5724_v4 = vadd.f32 %v5682_v3, %v1021_v60  ;;  %v5761_v46 = vrot.slane %v5706_v38, %v1724_v52  ;;  %v1597_v32 = vadd.f32 %v1566_v5, %v1530_v62 }
 0x21a   : > { %v1205_v8 = vmul.f32 1.442695, %v4053_v28  ;;  %v4054_v14 = vmul.f32 -4.0, %v5719_v59 }
 0x21b   : > { %v1201_v18 = vmul.f32 1.442695, %v4051_v2  ;;  %v4052_v22 = vmul.f32 -4.0, %v5724_v4 }
 0x21c   : > { %4743 = vpow2.f32 %v1205_v8  ;;  %v1207_v25 = vmul.f32 1.442695, %v4054_v14 }
 0x21d   : > { %4745 = vpow2.f32 %v1201_v18  ;;  %v1203_v37 = vmul.f32 1.442695, %v4052_v22  ;;  %v4386_v39 = vpop.f32.mrb[8].mxu1 }
 0x21e   : > { %v4736_v40 = vpop.eup %4735  ;;  %4747 = vpow2.f32 %v1207_v25  ;;  %v5744_v58 = vadd.f32 %v4386_v39, %v5682_v3  ;;  %v1034_v28 = vpop.f32.mrb[9].mxu1 }
 0x21f   : > { %v4738_v60 = vpop.eup %4737  ;;  %v1259_v2 = vadd.f32 1.0, %v4736_v40  ;;  %4749 = vpow2.f32 %v1203_v37  ;;  %v5748_v8 = vadd.f32 %v5682_v3, %v1034_v28  ;;  %v4387_v14 = vpop.f32.mrb[10].mxu1 }
 0x220   : > { %v4740_v18 = vpop.eup %4739  ;;  %v1257_v22 = vadd.f32 1.0, %v4738_v60  ;;  %v4057_v50 = vmul.f32 -4.0, %v5744_v58  ;;  %v5753_v25 = vadd.f32 %v4387_v14, %v5682_v3  ;;  %v1037_v39 = vpop.f32.mrb[11].mxu1 }
 0x221   : > { %v4742_v49 = vpop.eup %4741  ;;  %4751 = vrcp.f32 %v1259_v2  ;;  %v1260_v40 = vadd.f32 1.0, %v4740_v18  ;;  %v4055_v15 = vmul.f32 -4.0, %v5748_v8  ;;  %v5757_v37 = vadd.f32 %v5682_v3, %v1037_v39 }
 0x222   : > { %4753 = vrcp.f32 %v1257_v22  ;;  %v1258_v28 = vadd.f32 1.0, %v4742_v49  ;;  %v1213_v48 = vmul.f32 1.442695, %v4057_v50  ;;  %v4058_v60 = vmul.f32 -4.0, %v5753_v25 }
 0x223   : > { %4755 = vrcp.f32 %v1260_v40  ;;  %v1209_v14 = vmul.f32 1.442695, %v4055_v15  ;;  %v4056_v36 = vmul.f32 -4.0, %v5757_v37  ;;  %v5765_v2 = vadd.s32 8, %v5687_v12 }
 0x224   : > { %4757 = vrcp.f32 %v1258_v28  ;;  %v5768_v18 = vrot.slane %v5706_v38, %v2076_v29  ;;  %v1215_v39 = vmul.f32 1.442695, %v4058_v60  ;;  %v1798_v49 = vsub.s32 3, %v5687_v12 }
 0x225   : > { %v1940_v50 = vsub.s32 5, %v5687_v12  ;;  %4759 = vpow2.f32 %v1213_v48  ;;  %v1211_v22 = vmul.f32 1.442695, %v4056_v36  ;;  %v4390_v40 = vpop.f32.mrb[12].mxu1  ;;  %v2008_v15 = vsub.s32 6, %v5687_v12 }
 0x226   : > { %v4744_v52 = vpop.eup %4743  ;;  %4761 = vpow2.f32 %v1209_v14  ;;  %v5774_v28 = vadd.f32 %v4390_v40, %v5682_v3  ;;  %v1050_v30 = vpop.f32.mrb[13].mxu1  ;;  %v1726_v29 = vmul.f32 0.0, %v5761_v46  ;;  %vm1391_vm3 = vcmp.lt.s32.totalorder %v5765_v2, 15 }
 0x227   : > { %v4746_v27 = vpop.eup %4745  ;;  %v1263_v60 = vadd.f32 1.0, %v4744_v52  ;;  %4763 = vpow2.f32 %v1215_v39  ;;  %v5778_v21 = vadd.f32 %v5682_v3, %v1050_v30  ;;  %v4391_v48 = vpop.f32.mrb[14].mxu1 }
 0x228   : > { %v4748_v36 = vpop.eup %4747  ;;  %v1261_v20 = vadd.f32 1.0, %v4746_v27  ;;  %4765 = vpow2.f32 %v1211_v22  ;;  %v4061_v62 = vmul.f32 -4.0, %v5774_v28  ;;  %v5782_v5 = vadd.f32 %v4391_v48, %v5682_v3  ;;  %v1053_v14 = vpop.f32.mrb[15].mxu1 }
 0x229   : > { %v4750_v40 = vpop.eup %4749  ;;  %4767 = vrcp.f32 %v1263_v60  ;;  %v1264_v19 = vadd.f32 1.0, %v4748_v36  ;;  %v4059_v17 = vmul.f32 -4.0, %v5778_v21  ;;  %v5786_v39 = vadd.f32 %v5682_v3, %v1053_v14 }
 0x22a   : > { %4769 = vrcp.f32 %v1261_v20  ;;  %v1262_v30 = vadd.f32 1.0, %v4750_v40  ;;  %v1221_v27 = vmul.f32 1.442695, %v4061_v62  ;;  %v4062_v22 = vmul.f32 -4.0, %v5782_v5 }
 0x22b   : > { %v4752_v52 = vpop.eup %4751  ;;  %4771 = vrcp.f32 %v1264_v19  ;;  %v4060_v60 = vmul.f32 -4.0, %v5786_v39  ;;  %v5798_v20 = vrot.slane %v5706_v38, %v1798_v49  ;;  %v5804_v40 = vrot.slane %v5706_v38, %v1940_v50 }
 0x22c   : > { %v4754_v48 = vpop.eup %4753  ;;  %v5794_v36 = vmul.f32 %v4752_v52, %v5685_v6  ;;  %4773 = vrcp.f32 %v1262_v30  ;;  %v1217_v19 = vmul.f32 1.442695, %v4059_v17  ;;  %v5809_v52 = vadd.f32 %v1726_v29, %v1597_v32 }
 0x22d   : > { %v4756_v62 = vpop.eup %4755  ;;  %v5801_v14 = vmul.f32 %v4754_v48, %v5690_v13  ;;  %8200 = vst [vmem:[#allocation49_spill] sm:$0xff] %v5804_v40  ;;  %4775 = vpow2.f32 %v1221_v27  ;;  %v4394_v11 = vpop.f32.mrb[16].mxu1  ;;  %v5812_v49 = vrot.slane %v5706_v38, %v2008_v15  ;;  %v5814_v30 = vmul.f32 1.442695, %v4062_v22 }
 0x22e   : > { %v4758_v10 = vpop.eup %4757  ;;  %v5807_v6 = vmul.f32 %v4756_v62, %v5694_v16  ;;  %v5816_v9 = vpop.f32.mrb[17].mxu1  ;;  %v5821_v17 = vmul.f32 %v5736_v26, %v5794_v36  ;;  %v5825_v16 = vmul.f32 %v5740_v42, %v5794_v36  ;;  %v5827_v32 = vmul.f32 1.442695, %v4060_v60 }
 0x22f   : > { %8201 = vst [vmem:[#allocation50_spill] sm:$0xff] %v5812_v49  ;;  %v4760_v13 = vpop.eup %4759  ;;  %v5829_v29 = vpop.f32.mrb[18].mxu1  ;;  %v1401_v15 = vrot.slane %v5801_v14, 7  ;;  %v5834_v27 = vmul.f32 %v5736_v26, %v5801_v14  ;;  %v5838_v48 = vmul.f32 %v4758_v10, %v5698_v23  ;;  %v5844_v60 = vmul.f32 %v5740_v42, %v5801_v14 }
 0x230   : > { %v4762_v38 = vpop.eup %4761  ;;  %v5840_v62 = vpop.f32.mrb[19].mxu1  ;;  %v1267_v1 = vadd.f32 1.0, %v4760_v13  ;;  %4777 = vpow2.f32 %v1217_v19  ;;  %v5849_v63 = vmul.f32 %v5736_v26, %v5807_v6  ;;  %v5853_v10 = vmul.f32 %v5740_v42, %v5807_v6 }
 0x231   : > { %v4764_v50 = vpop.eup %4763  ;;  %v1416_v23 = vrot.slane %v5838_v48, 7  ;;  %v8084_v22 = vrot.slane %v5838_v48, 1  ;;  %v1568_v55 = vmul.f32 %v5736_v26, %v5838_v48  ;;  %v1265_v13 = vadd.f32 1.0, %v4762_v38 }
 0x232   : > { %v4766_v0 = vpop.eup %4765  ;;  %8202 = vst [vmem:[#allocation51_spill] sm:$0xff] %v5853_v10  ;;  %4779 = vrcp.f32 %v1267_v1  ;;  %v5860_v19 = vadd.f32 %v4394_v11, %v5682_v3  ;;  %v8203_v51 = vrot.slane %v5801_v14, 1 }
 0x233   : > { %v4768_v61 = vpop.eup %4767  ;;  %v1432_v54 = vsel %vm1431_vm4, %v1401_v15, %v1416_v23  ;;  %v1447_v53 = vsel %vm1431_vm4, %v1416_v23, %v1401_v15  ;;  %4781 = vrcp.f32 %v1265_v13 }
 0x234   : > { %v4770_v7 = vpop.eup %4769  ;;  %v1675_v45 = vsel %vm1659_vm5, %v8084_v22, %v8203_v51  ;;  %v5873_v1 = vmul.f32 %v4768_v61, %v5709_v47  ;;  %v1464_v11 = vsel %vm1392_vm2, %v1447_v53, 0.0  ;;  %v1501_v44 = vmul.f32 %v5712_v56, %v1432_v54 }
 0x235   : > { %v4772_v38 = vpop.eup %4771  ;;  %v5880_v43 = vsel %vm1391_vm3, %v1675_v45, 0.0  ;;  %v1801_v15 = vmul.f32 %v5798_v20, %v1432_v54  ;;  %v4398_v23 = vpop.f32.mrb[20].mxu1  ;;  %v1500_v35 = vmul.f32 %v5712_v56, %v1464_v11  ;;  %v1869_v51 = vmul.f32 %v5740_v42, %v5838_v48 }
 0x236   : > { %8204 = vst [vmem:[#allocation52_spill] sm:$0xff] %v5873_v1  ;;  %8205 = vst [vmem:[#allocation53_spill] sm:$0xff] %v5880_v43  ;;  %v4774_v41 = vpop.eup %4773  ;;  %v1268_v61 = vadd.f32 1.0, %v4764_v50  ;;  %v1266_v47 = vadd.f32 1.0, %v4766_v0  ;;  %v1082_v22 = vpop.f32.mrb[21].mxu1  ;;  %v1533_v53 = vadd.f32 %v5733_v24, %v1501_v44  ;;  %v1729_v33 = vmul.f32 %v5761_v46, %v5880_v43 }
 0x237   : > { %v4776_v34 = vpop.eup %4775  ;;  %v1833_v45 = vadd.f32 %v1801_v15, %v5809_v52  ;;  %v4065_v54 = vmul.f32 -4.0, %v5860_v19  ;;  %v5891_v31 = vpop.f32.mrb[22].mxu1  ;;  %v5894_v49 = vmul.f32 %v5798_v20, %v1464_v11  ;;  %v5897_v10 = vmul.f32 %v4770_v7, %v5715_v57 }
 0x238   : > { %v5900_v0 = vmul.f32 %v4772_v38, %v5719_v59  ;;  %v5903_v44 = vmul.f32 %v4774_v41, %v5724_v4  ;;  %v5905_v50 = vpop.f32.mrb[23].mxu1  ;;  %v1600_v43 = vadd.f32 %v1568_v55, %v1533_v53  ;;  %v5911_v11 = vadd.f32 %v5733_v24, %v1500_v35 }
 0x239   : > { %8206 = vst [vmem:[#allocation54_spill] sm:$0xff] %v5897_v10  ;;  %v5907_v15 = vadd.f32 %v1869_v51, %v1833_v45  ;;  %v5915_v7 = vmul.f32 %v5736_v26, %v5873_v1  ;;  %v5919_v57 = vmul.f32 %v5740_v42, %v5873_v1  ;;  %v1271_v41 = vadd.f32 1.0, %v4776_v34 }
 0x23a   : > { %8207 = vst [vmem:[#allocation55_spill] sm:$0xff] %v5900_v0  ;;  %8208 = vst [vmem:[#allocation56_spill] sm:$0xff] %v5903_v44  ;;  %v4778_v59 = vpop.eup %4777  ;;  %v5921_v4 = vadd.f32 %v1729_v33, %v1600_v43  ;;  %v1403_v55 = vrot.slane %v5897_v10, 7  ;;  %v5926_v13 = vmul.f32 %v5736_v26, %v5897_v10  ;;  %v5931_v38 = vmul.f32 %v5740_v42, %v5897_v10 }
 0x23b   : > { %8209 = vst [vmem:[#allocation57_spill] sm:$0xff] %v5915_v7  ;;  %8210 = vst [vmem:[#allocation58_spill] sm:$0xff] %v5919_v57  ;;  %v5935_v51 = vmul.f32 %v5768_v18, %v5897_v10  ;;  %v1418_v33 = vrot.slane %v5903_v44, 7  ;;  %v5941_v53 = vmul.f32 %v5736_v26, %v5900_v0  ;;  %v5945_v45 = vmul.f32 %v5740_v42, %v5900_v0 }
 0x23c   : > { %8211 = vst [vmem:[#allocation59_spill] sm:$0xff] %v5926_v13  ;;  %8212 = vst [vmem:[#allocation60_spill] sm:$0xff] %v5931_v38  ;;  %v4780_v43 = vpop.eup %4779  ;;  %4783 = vrcp.f32 %v1268_v61  ;;  %v1269_v40 = vadd.f32 1.0, %v4778_v59  ;;  %v1572_v13 = vmul.f32 %v5736_v26, %v5903_v44  ;;  %v5964_v59 = vmul.f32 %v5740_v42, %v5903_v44 }
 0x23d   : > { %8213 = vst [vmem:[#allocation61_spill] sm:$0xff] %v5935_v51  ;;  %8214 = vst [vmem:[#allocation62_spill] sm:$0xff] %v5941_v53  ;;  %v5947_v35 = vpop.f32.mrb[24].mxu1  ;;  %v5951_v57 = vsel %vm1431_vm4, %v1403_v55, %v1418_v33  ;;  %v1449_v34 = vsel %vm1431_vm4, %v1418_v33, %v1403_v55  ;;  %4785 = vrcp.f32 %v1266_v47  ;;  %v5974_v47 = vmul.f32 %v5768_v18, %v5903_v44 }
 0x23e   : > { %8215 = vst [vmem:[#allocation63_spill] sm:$0xff] %v5945_v45  ;;  %v5957_v38 = vpop.f32.mrb[25].mxu1  ;;  %v1505_v45 = vmul.f32 %v5712_v56, %v5951_v57  ;;  %8216 = vst [vmem:[#allocation64_spill] sm:$0xff] %v5964_v59  ;;  %4787 = vrcp.f32 %v1271_v41  ;;  %v5970_v55 = vsel %vm1392_vm2, %v1449_v34, 0.0  ;;  %v5977_v33 = vmul.f32 %v4780_v43, %v5744_v58 }
 0x23f   : > { %v5966_v7 = vpop.f32.mrb[26].mxu1  ;;  %8217 = vst [vmem:[#allocation65_spill] sm:$0xff] %v5974_v47  ;;  %v1229_v53 = vmul.f32 1.442695, %v4065_v54  ;;  %4789 = vrcp.f32 %v1269_v40  ;;  %v5984_v41 = vadd.f32 %v5682_v3, %v5816_v9  ;;  %v5988_v34 = vadd.f32 %v5829_v29, %v5682_v3  ;;  %v4782_v40 = vpop.eup %4781 }
 0x240   : > { %8218 = vst [vmem:[#allocation66_spill] sm:$0xff] %v5977_v33  ;;  %v5979_v61 = vpop.f32.mrb[27].mxu1  ;;  %v1537_v1 = vadd.f32 %v5733_v24, %v1505_v45  ;;  %4791 = vpow2.f32 %v5814_v30  ;;  %v5993_v58 = vadd.f32 %v5682_v3, %v5840_v62  ;;  %v5996_v54 = vadd.f32 %v4398_v23, %v5682_v3 }
 0x241   : > { %v5999_v43 = vadd.f32 %v5682_v3, %v1082_v22  ;;  %4793 = vpow2.f32 %v5827_v32  ;;  %v4063_v9 = vmul.f32 -4.0, %v5984_v41  ;;  %v4066_v29 = vmul.f32 -4.0, %v5988_v34 }
 0x242   : > { %v6001_v45 = vadd.f32 %v1572_v13, %v1537_v1  ;;  %v6007_v30 = vmul.f32 %v4782_v40, %v5748_v8  ;;  %4795 = vpow2.f32 %v1229_v53  ;;  %v4064_v62 = vmul.f32 -4.0, %v5993_v58 }
 0x243   : > { %v4069_v23 = vmul.f32 -4.0, %v5996_v54  ;;  %v1225_v59 = vmul.f32 1.442695, %v4063_v9  ;;  %v1231_v22 = vmul.f32 1.442695, %v4066_v29  ;;  %v4067_v0 = vmul.f32 -4.0, %v5999_v43 }
 0x244   : > { %8219 = vst [vmem:[#allocation67_spill] sm:$0xff] %v6001_v45  ;;  %8220 = vst [vmem:[#allocation68_spill] sm:$0xff] %v6007_v30  ;;  %v6014_v1 = vadd.f32 %v5891_v31, %v5682_v3  ;;  %v6018_v13 = vmul.f32 %v5712_v56, %v5970_v55  ;;  %v6023_v53 = vmul.f32 %v5736_v26, %v5977_v33  ;;  %v1227_v40 = vmul.f32 1.442695, %v4064_v62 }
 0x245   : > { %v4406_v32 = vpop.f32.mrb[28].mxu1  ;;  %v6029_v45 = vmul.f32 %v5740_v42, %v5977_v33  ;;  %4797 = vpow2.f32 %v1225_v59  ;;  %v1237_v31 = vmul.f32 1.442695, %v4069_v23  ;;  %v1233_v23 = vmul.f32 1.442695, %v4067_v0 }
 0x246   : > { %8221 = vst [vmem:[#allocation69_spill] sm:$0xff] %v6018_v13  ;;  %8222 = vst [vmem:[#allocation70_spill] sm:$0xff] %v6023_v53  ;;  %v6025_v9 = vpop.f32.mrb[29].mxu1  ;;  %v4784_v29 = vpop.eup %4783  ;;  %v4070_v47 = vmul.f32 -4.0, %v6014_v1  ;;  %v6037_v53 = vmul.f32 %v5736_v26, %v6007_v30  ;;  %4799 = vpow2.f32 %v1231_v22  ;;  %v6049_v33 = vadd.f32 %v5682_v3, %v5905_v50 }
 0x247   : > { %8223 = vst [vmem:[#allocation71_spill] sm:$0xff] %v6029_v45  ;;  %v6032_v51 = vpop.f32.mrb[30].mxu1  ;;  %v4786_v13 = vpop.eup %4785  ;;  %v6040_v62 = vmul.f32 %v4784_v29, %v5753_v25  ;;  %4801 = vpow2.f32 %v1227_v40  ;;  %v6053_v8 = vmul.f32 %v5740_v42, %v6007_v30  ;;  %v6060_v29 = vadd.f32 %v5947_v35, %v5682_v3 }
 0x248   : > { %8224 = vst [vmem:[#allocation72_spill] sm:$0xff] %v6037_v53  ;;  %v6042_v10 = vpop.f32.mrb[31].mxu1  ;;  %v4788_v45 = vpop.eup %4787  ;;  %v6045_v59 = vmul.f32 %v4786_v13, %v5757_v37  ;;  %v1239_v22 = vmul.f32 1.442695, %v4070_v47  ;;  %4803 = vpow2.f32 %v1237_v31  ;;  %v6069_v50 = vadd.f32 %v5682_v3, %v5957_v38 }
 0x249   : > { %8225 = vst [vmem:[#allocation73_spill] sm:$0xff] %v6040_v62  ;;  %8226 = vst [vmem:[#allocation74_spill] sm:$0xff] %v6042_v10  ;;  %v6056_v25 = vmul.f32 %v4788_v45, %v5774_v28  ;;  %v4790_v37 = vpop.eup %4789  ;;  %v6065_v0 = vmul.f32 %v5736_v26, %v6040_v62  ;;  %v6073_v28 = vmul.f32 %v5740_v42, %v6040_v62  ;;  %4805 = vpow2.f32 %v1233_v23 }
 0x24a   : > { %8227 = vst [vmem:[#allocation75_spill] sm:$0xff] %v6045_v59  ;;  %8228 = vst [vmem:[#allocation76_spill] sm:$0xff] %v6053_v8  ;;  %v4792_v40 = vpop.eup %4791  ;;  %v6078_v47 = vmul.f32 %v5736_v26, %v6045_v59  ;;  %v6082_v45 = vmul.f32 %v5740_v42, %v6045_v59  ;;  %v4068_v8 = vmul.f32 -4.0, %v6049_v33  ;;  %v6095_v62 = vmul.f32 %v4790_v37, %v5778_v21 }
 0x24b   : > { %8229 = vst [vmem:[#allocation77_spill] sm:$0xff] %v6056_v25  ;;  %8230 = vst [vmem:[#allocation78_spill] sm:$0xff] %v6065_v0  ;;  %v4794_v31 = vpop.eup %4793  ;;  %v1272_v38 = vadd.f32 1.0, %v4792_v40  ;;  %v6092_v35 = vmul.f32 %v5740_v42, %v6056_v25  ;;  %v4073_v23 = vmul.f32 -4.0, %v6060_v29  ;;  %v4071_v40 = vmul.f32 -4.0, %v6069_v50 }
 0x24c   : > { %8231 = vst [vmem:[#allocation79_spill] sm:$0xff] %v6073_v28  ;;  %8232 = vst [vmem:[#allocation80_spill] sm:$0xff] %v6078_v47  ;;  %v4796_v0 = vpop.eup %4795  ;;  %v6088_v28 = vmul.f32 %v5736_v26, %v6056_v25  ;;  %v1235_v13 = vmul.f32 1.442695, %v4068_v8  ;;  %v6101_v47 = vadd.f32 %v5966_v7, %v5682_v3  ;;  %v6108_v21 = vadd.f32 %v4406_v32, %v5682_v3 }
 0x24d   : > { %8233 = vst [vmem:[#allocation81_spill] sm:$0xff] %v6082_v45  ;;  %8235 = vst [vmem:[#allocation83_spill] sm:$0xff] %v6092_v35  ;;  %v1270_v45 = vadd.f32 1.0, %v4794_v31  ;;  %4807 = vrcp.f32 %v1272_v38  ;;  %v1275_v53 = vadd.f32 1.0, %v4796_v0  ;;  %v8236_v8 = vrot.slane %v5807_v6, 7 }
 0x24e   : > { %8234 = vst [vmem:[#allocation82_spill] sm:$0xff] %v6088_v28  ;;  %v6105_v28 = vadd.f32 %v5682_v3, %v5979_v61  ;;  %v8237_v37 = vrot.slane %v5794_v36, 7  ;;  %v4074_v38 = vmul.f32 -4.0, %v6101_v47  ;;  %v1245_v59 = vmul.f32 1.442695, %v4073_v23 }
 0x24f   : > { %4809 = vrcp.f32 %v1270_v45  ;;  %v4798_v35 = vpop.eup %4797  ;;  %v8239_v45 = vmov %v8236_v8 }
 0x250   : > { %4811 = vrcp.f32 %v1275_v53  ;;  %v6116_v0 = vsel %vm1431_vm4, %v8237_v37, %v8236_v8  ;;  %v8238_v7 = vmov %v8237_v37  ;;  %v4800_v31 = vpop.eup %4799  ;;  %v1273_v32 = vadd.f32 1.0, %v4798_v35 }
 0x251   : > { %v1448_v61 = vsel %vm1431_vm4, %v8239_v45, %v8238_v7  ;;  %4813 = vpow2.f32 %v1239_v22  ;;  %v4802_v25 = vpop.eup %4801  ;;  %v1276_v30 = vadd.f32 1.0, %v4800_v31  ;;  %v1241_v8 = vmul.f32 1.442695, %v4071_v40 }
 0x252   : > { %4815 = vpow2.f32 %v1235_v13  ;;  %v1274_v37 = vadd.f32 1.0, %v4802_v25  ;;  %v4072_v44 = vmul.f32 -4.0, %v6105_v28  ;;  %v6129_v10 = vsel %vm1392_vm2, %v1448_v61, 0.0  ;;  %v4804_v7 = vpop.eup %4803 }
 0x253   : > { %4817 = vrcp.f32 %v1273_v32  ;;  %v1247_v45 = vmul.f32 1.442695, %v4074_v38  ;;  %v4077_v22 = vmul.f32 -4.0, %v6108_v21  ;;  %v1502_v35 = vmul.f32 %v5712_v56, %v6129_v10  ;;  %v4806_v40 = vpop.eup %4805 }
 0x254   : > { %4819 = vrcp.f32 %v1276_v30  ;;  %v1279_v13 = vadd.f32 1.0, %v4804_v7  ;;  %v1503_v23 = vmul.f32 %v5712_v56, %v6116_v0  ;;  %v1599_v25 = vadd.f32 %v5834_v27, %v5911_v11 }
 0x255   : > { %4821 = vrcp.f32 %v1274_v37  ;;  %v1534_v61 = vadd.f32 %v5733_v24, %v1502_v35  ;;  %v1630_v30 = vrot.slane %v5794_v36, 1  ;;  %v1645_v31 = vrot.slane %v5807_v6, 1 }
 0x256   : > { %4823 = vpow2.f32 %v1245_v59  ;;  %v1277_v32 = vadd.f32 1.0, %v4806_v40  ;;  %v1535_v38 = vadd.f32 %v5733_v24, %v1503_v23  ;;  %v8240_v37 = vrot.slane %v5838_v48, 1 }
 0x257   : > { %4825 = vrcp.f32 %v1279_v13  ;;  %v8241_v7 = vrot.slane %v5801_v14, 1  ;;  %v4808_v27 = vpop.eup %4807  ;;  %v1601_v11 = vadd.f32 %v5821_v17, %v1534_v61  ;;  %v6153_v59 = vsel %vm1659_vm5, %v1630_v30, %v1645_v31 }
 0x258   : > { %4827 = vpow2.f32 %v1241_v8  ;;  %v1676_v35 = vsel %vm1659_vm5, %v1645_v31, %v1630_v30  ;;  %v6159_v48 = vmul.f32 %v5736_v26, %v6095_v62  ;;  %v6162_v14 = vmul.f32 %v4808_v27, %v5782_v5 }
 0x259   : > { %v6148_v53 = vsel %vm1659_vm5, %v8241_v7, %v8240_v37  ;;  %v4810_v13 = vpop.eup %4809  ;;  %4829 = vrcp.f32 %v1277_v32  ;;  %v1602_v8 = vadd.f32 %v5849_v63, %v1535_v38  ;;  %v6167_v17 = vmul.f32 %v5740_v42, %v6095_v62 }
 0x25a   : > { %8242 = vst [vmem:[#allocation84_spill] sm:$0xff] %v6162_v14  ;;  %v4812_v23 = vpop.eup %4811  ;;  %v6170_v40 = vmul.f32 %v4810_v13, %v5786_v39  ;;  %4831 = vpow2.f32 %v1247_v45  ;;  %v1243_v61 = vmul.f32 1.442695, %v4072_v44  ;;  %v1253_v37 = vmul.f32 1.442695, %v4077_v22 }
 0x25b   : > { %8243 = vst [vmem:[#allocation85_spill] sm:$0xff] %v6167_v17  ;;  %v4814_v30 = vpop.eup %4813  ;;  %v6173_v31 = vmul.f32 %v4812_v23, %v5860_v19  ;;  %v6177_v5 = vsel %vm1391_vm3, %v1676_v35, 0.0  ;;  %v1728_v63 = vmul.f32 %v5761_v46, %v6148_v53  ;;  %v6184_v39 = vmul.f32 %v5736_v26, %v6162_v14 }
 0x25c   : > { %v4816_v32 = vpop.eup %4815  ;;  %v1280_v44 = vadd.f32 1.0, %v4814_v30  ;;  %v1730_v19 = vmul.f32 %v5761_v46, %v6153_v59  ;;  %v6190_v22 = vmul.f32 %v5740_v42, %v6162_v14  ;;  %v6195_v27 = vmul.f32 %v5736_v26, %v6170_v40 }
 0x25d   : > { %8244 = vst [vmem:[#allocation86_spill] sm:$0xff] %v6173_v31  ;;  %8245 = vst [vmem:[#allocation87_spill] sm:$0xff] %v6184_v39  ;;  %v4818_v45 = vpop.eup %4817  ;;  %v1278_v35 = vadd.f32 1.0, %v4816_v32  ;;  %v6199_v23 = vmul.f32 %v5740_v42, %v6170_v40  ;;  %v1760_v38 = vadd.f32 %v1728_v63, %v1599_v25  ;;  %v6212_v14 = vmul.f32 %v5736_v26, %v6173_v31 }
 0x25e   : > { %8246 = vst [vmem:[#allocation88_spill] sm:$0xff] %v6190_v22  ;;  %v4820_v13 = vpop.eup %4819  ;;  %v6202_v30 = vmul.f32 %v4818_v45, %v5984_v41  ;;  %4833 = vrcp.f32 %v1280_v44  ;;  %v6208_v39 = vadd.f32 %v1730_v19, %v1601_v11  ;;  %v6216_v41 = vmul.f32 %v5740_v42, %v6173_v31 }
 0x25f   : > { %v4822_v17 = vpop.eup %4821  ;;  %v6206_v7 = vmul.f32 %v4820_v13, %v5988_v34  ;;  %4835 = vrcp.f32 %v1278_v35  ;;  %8247 = vst [vmem:[#allocation89_spill] sm:$0xff] %v6212_v14  ;;  %v1731_v63 = vmul.f32 %v5761_v46, %v6177_v5  ;;  %v1802_v45 = vmul.f32 %v5798_v20, %v6129_v10 }
 0x260   : > { %v4824_v32 = vpop.eup %4823  ;;  %8248 = vst [vmem:[#allocation90_spill] sm:$0xff] %v6216_v41  ;;  %v6219_v25 = vmul.f32 %v4822_v17, %v5993_v58  ;;  %v6226_v11 = vmul.f32 %v5736_v26, %v6202_v30  ;;  %v6232_v13 = vmul.f32 %v5740_v42, %v6202_v30 }
 0x261   : > { %v4826_v34 = vpop.eup %4825  ;;  %v1283_v19 = vadd.f32 1.0, %v4824_v32  ;;  %v6237_v17 = vmul.f32 %v5736_v26, %v6206_v7  ;;  %v6244_v32 = vmul.f32 %v5740_v42, %v6206_v7  ;;  %v6246_v14 = vadd.f32 %v1731_v63, %v1602_v8 }
 0x262   : > { %v4828_v35 = vpop.eup %4827  ;;  %8249 = vst [vmem:[#allocation91_spill] sm:$0xff] %v6232_v13  ;;  %v6240_v22 = vmul.f32 %v4826_v34, %v5996_v54  ;;  %v6251_v58 = vmul.f32 %v5736_v26, %v6219_v25  ;;  %v6255_v54 = vmul.f32 %v5740_v42, %v6219_v25  ;;  %v1803_v34 = vmul.f32 %v5798_v20, %v6116_v0 }
 0x263   : > { %8250 = vst [vmem:[#allocation92_spill] sm:$0xff] %v6237_v17  ;;  %v4830_v44 = vpop.eup %4829  ;;  %8252 = vst [vmem:[#allocation94_spill] sm:$0xff] %v6244_v32  ;;  %4837 = vrcp.f32 %v1283_v19  ;;  %v1281_v41 = vadd.f32 1.0, %v4828_v35  ;;  %v1832_v8 = vadd.f32 %v5894_v49, %v5809_v52  ;;  %v1834_v63 = vadd.f32 %v1802_v45, %v1760_v38  ;;  %v8255_v52 = vld [vmem:[#allocation49_spill] sm:$0xff] }
 0x264   : > { %8251 = vst [vmem:[#allocation93_spill] sm:$0xff] %v6240_v22  ;;  %v4832_v31 = vpop.eup %4831  ;;  %8253 = vst [vmem:[#allocation95_spill] sm:$0xff] %v6255_v54  ;;  %v6264_v35 = vmul.f32 %v5736_v26, %v6240_v22  ;;  %v6267_v13 = vmul.f32 %v4830_v44, %v5999_v43  ;;  %v1835_v54 = vadd.f32 %v1803_v34, %v5921_v4  ;;  %v8256_v38 = vld [vmem:[#allocation53_spill] sm:$0xff] }
 0x265   : > { %4839 = vrcp.f32 %v1281_v41  ;;  %v1284_v32 = vadd.f32 1.0, %v4832_v31  ;;  %v1900_v41 = vadd.f32 %v5844_v60, %v1832_v8  ;;  %v1902_v31 = vadd.f32 %v5825_v16, %v1834_v63  ;;  %v8259_v16 = vld [vmem:[#allocation51_spill] sm:$0xff] }
 0x266   : > { %8254 = vst [vmem:[#allocation96_spill] sm:$0xff] %v6264_v35  ;;  %4841 = vpow2.f32 %v1243_v61  ;;  %v1942_v49 = vmul.f32 %v8255_v52, %v6148_v53  ;;  %v1943_v45 = vmul.f32 %v8255_v52, %v8256_v38  ;;  %v1944_v43 = vmul.f32 %v8255_v52, %v6153_v59 }
 0x267   : > { %4843 = vrcp.f32 %v1284_v32  ;;  %v6280_v61 = vmul.f32 %v5740_v42, %v6240_v22  ;;  %v1903_v4 = vadd.f32 %v8259_v16, %v1835_v54  ;;  %v6292_v63 = vmul.f32 %v5736_v26, %v6267_v13 }
 0x268   : > { %v4834_v17 = vpop.eup %4833  ;;  %4845 = vpow2.f32 %v1253_v37  ;;  %v1945_v37 = vmul.f32 %v8255_v52, %v6177_v5  ;;  %v1974_v32 = vadd.f32 %v1942_v49, %v1900_v41  ;;  %v1975_v34 = vadd.f32 %v1943_v45, %v5907_v15 }
 0x269   : > { %v4836_v44 = vpop.eup %4835  ;;  %8257 = vst [vmem:[#allocation49_spill] sm:$0xff] %v6280_v61  ;;  %v6283_v60 = vmul.f32 %v4834_v17, %v6014_v1  ;;  %v1976_v8 = vadd.f32 %v1944_v43, %v1902_v31  ;;  %v6296_v38 = vmul.f32 %v5740_v42, %v6267_v13  ;;  %v8261_v17 = vld [vmem:[#allocation50_spill] sm:$0xff]  ;;  %v6311_v31 = vld [vmem:[%s8004_s5 + $0x8] ss:$0 sm:$0xff] }
 0x26a   : > { %v1977_v1 = vadd.f32 %v1945_v37, %v1903_v4  ;;  %v2010_v54 = vmul.f32 %v8261_v17, %v6129_v10  ;;  %v6306_v15 = vmul.f32 %v4836_v44, %v6049_v33  ;;  %v2011_v49 = vmul.f32 %v8261_v17, %v6116_v0 }
 0x26b   : > { %8258 = vst [vmem:[#allocation53_spill] sm:$0xff] %v6283_v60  ;;  %8260 = vst [vmem:[#allocation51_spill] sm:$0xff] %v6296_v38  ;;  %v6303_v41 = vmul.f32 %v5736_v26, %v6283_v60  ;;  %v2012_v10 = vmul.f32 %v8261_v17, %v5970_v55  ;;  %v2013_v43 = vmul.f32 %v8261_v17, %v5951_v57 }
 0x26c   : > { %v2042_v4 = vadd.f32 %v2010_v54, %v1974_v32  ;;  %v2078_v33 = vmul.f32 %v5768_v18, %v5794_v36  ;;  %v6323_v44 = vmul.f32 %v5740_v42, %v6283_v60  ;;  %v2043_v19 = vadd.f32 %v2011_v49, %v1975_v34 }
 0x26d   : > { %8262 = vst [vmem:[#allocation50_spill] sm:$0xff] %v6303_v41  ;;  %v4838_v45 = vpop.eup %4837  ;;  %v2079_v0 = vmul.f32 %v5768_v18, %v5807_v6  ;;  %v2044_v53 = vadd.f32 %v2012_v10, %v1976_v8  ;;  %v2045_v61 = vadd.f32 %v2013_v43, %v1977_v1  ;;  %v2145_v32 = vmul.f32 %v6311_v31, %v6153_v59 }
 0x26e   : > { %8263 = vst [vmem:[#allocation97_spill] sm:$0xff] %v6323_v44  ;;  %v6326_v37 = vmul.f32 %v4838_v45, %v6060_v29  ;;  %v2109_v38 = vadd.f32 %v2078_v33, %v2042_v4  ;;  %v6335_v44 = vmul.f32 %v5736_v26, %v6306_v15  ;;  %v2146_v6 = vmul.f32 %v6311_v31, %v6177_v5 }
 0x26f   : > { %v4840_v16 = vpop.eup %4839  ;;  %v2110_v1 = vadd.f32 %v2079_v0, %v2043_v19  ;;  %v6344_v59 = vadd.f32 %v5682_v3, %v6025_v9  ;;  %v6348_v10 = vmul.f32 %v5740_v42, %v6306_v15  ;;  %v6370_v0 = vadd.f32 %v6032_v51, %v5682_v3 }
 0x270   : > { %8264 = vst [vmem:[#allocation98_spill] sm:$0xff] %v6326_v37  ;;  %v4842_v54 = vpop.eup %4841  ;;  %v6338_v29 = vmul.f32 %v4840_v16, %v6069_v50  ;;  %v2177_v49 = vadd.f32 %v2145_v32, %v2109_v38  ;;  %v6353_v50 = vmul.f32 %v5736_v26, %v6326_v37  ;;  %v6357_v5 = vmul.f32 %v5740_v42, %v6326_v37  ;;  %v8274_v16 = vld [vmem:[#allocation54_spill] sm:$0xff] }
 0x271   : > { %v4844_v34 = vpop.eup %4843  ;;  %v1282_v8 = vadd.f32 1.0, %v4842_v54  ;;  %8266 = vst [vmem:[#allocation100_spill] sm:$0xff] %v6348_v10  ;;  %v2178_v38 = vadd.f32 %v2146_v6, %v2110_v1  ;;  %v4075_v9 = vmul.f32 -4.0, %v6344_v59  ;;  %v4078_v1 = vmul.f32 -4.0, %v6370_v0 }
 0x272   : > { %8265 = vst [vmem:[#allocation99_spill] sm:$0xff] %v6338_v29  ;;  %v4846_v45 = vpop.eup %4845  ;;  %8267 = vst [vmem:[#allocation101_spill] sm:$0xff] %v6353_v50  ;;  %v6363_v4 = vmul.f32 %v5736_v26, %v6338_v29  ;;  %v6366_v33 = vmul.f32 %v4844_v34, %v6101_v47  ;;  %v8275_v36 = vrot.slane %v8274_v16, 1 }
 0x273   : > { %8268 = vst [vmem:[#allocation102_spill] sm:$0xff] %v6357_v5  ;;  %4847 = vrcp.f32 %v1282_v8  ;;  %v1287_v19 = vadd.f32 1.0, %v4846_v45  ;;  %v2209_v32 = vpack.c.bf16 %v2178_v38, %v2177_v49  ;;  %v1249_v54 = vmul.f32 1.442695, %v4075_v9  ;;  %v8271_v8 = vld [vmem:[#allocation74_spill] sm:$0xff]  ;;  %v8272_v45 = vld [vmem:[#allocation56_spill] sm:$0xff] }
 0x274   : > { %8269 = vst [vmem:[#allocation103_spill] sm:$0xff] %v6363_v4  ;;  %8270 = vst [vmem:[#allocation104_spill] sm:$0xff] %v6366_v33  ;;  %v6374_v6 = vadd.f32 %v5682_v3, %v8271_v8  ;;  %v8273_v43 = vrot.slane %v8272_v45, 1  ;;  %v8276_v51 = vmov %v8275_v36  ;;  %v8279_v8 = vld [vmem:[#allocation65_spill] sm:$0xff] }
 0x275   : > { %4849 = vrcp.f32 %v1287_v19  ;;  %v8278_v19 = vld [vmem:[#allocation61_spill] sm:$0xff]  ;;  %4424 = vmatprep.mubr.bf16.mxu0 %v2209_v32 }
 0x276   : > { %v6383_v47 = vsel %vm1659_vm5, %v8275_v36, %v8273_v43  ;;  %v8277_v34 = vmov %v8273_v43  ;;  %v2111_v3 = vadd.f32 %v8278_v19, %v2044_v53  ;;  %4851 = vpow2.f32 %v1249_v54  ;;  %v8282_v53 = vld [vmem:[#allocation52_spill] sm:$0xff] }
 0x277   : > { %v1677_v49 = vsel %vm1659_vm5, %v8277_v34, %v8276_v51  ;;  %v4076_v38 = vmul.f32 -4.0, %v6374_v6  ;;  %v2112_v36 = vadd.f32 %v8279_v8, %v2045_v61  ;;  %v1255_v43 = vmul.f32 1.442695, %v4078_v1  ;;  %v8280_v51 = vld [vmem:[#allocation55_spill] sm:$0xff] }
 0x278   : > { %v6395_v9 = vsel %vm1391_vm3, %v1677_v49, 0.0  ;;  %v2147_v16 = vmul.f32 %v6311_v31, %v6383_v47  ;;  %v8281_v34 = vrot.slane %v8280_v51, 7  ;;  %v8283_v32 = vrot.slane %v8282_v53, 7 }
 0x279   : > { %v2148_v45 = vmul.f32 %v6311_v31, %v6395_v9  ;;  %v1251_v19 = vmul.f32 1.442695, %v4076_v38  ;;  %v1632_v8 = vrot.slane %v8282_v53, 1  ;;  %4853 = vpow2.f32 %v1255_v43 }
 0x27a   : > { %v1435_v54 = vsel %vm1431_vm4, %v8283_v32, %v8281_v34  ;;  %v8284_v49 = vmov %v8283_v32  ;;  %v8285_v5 = vmov %v8281_v34  ;;  %v2179_v50 = vadd.f32 %v2147_v16, %v2111_v3 }
 0x27b   : > { %v1450_v61 = vsel %vm1431_vm4, %v8285_v5, %v8284_v49  ;;  %v1507_v1 = vmul.f32 %v5712_v56, %v1435_v54  ;;  %v2180_v37 = vadd.f32 %v2148_v45, %v2112_v36  ;;  %4855 = vpow2.f32 %v1251_v19  ;;  %v8287_v45 = vld [vmem:[#allocation62_spill] sm:$0xff] }
 0x27c   : > { %v1470_v4 = vsel %vm1392_vm2, %v1450_v61, 0.0  ;;  %v1647_v32 = vrot.slane %v8280_v51, 1  ;;  %v6423_v5 = vmul.f32 %v5740_v42, %v6338_v29  ;;  %v1804_v43 = vmul.f32 %v5798_v20, %v5970_v55 }
 0x27d   : > { %v1506_v38 = vmul.f32 %v5712_v56, %v1470_v4  ;;  %v1539_v34 = vadd.f32 %v5733_v24, %v1507_v1  ;;  %v2210_v49 = vpack.c.bf16 %v2180_v37, %v2179_v50  ;;  %v1805_v3 = vmul.f32 %v5798_v20, %v5951_v57  ;;  %v4848_v36 = vpop.eup %4847 }
 0x27e   : > { %8286 = vst [vmem:[#allocation74_spill] sm:$0xff] %v6423_v5  ;;  %v6433_v61 = vsel %vm1659_vm5, %v1632_v8, %v1647_v32  ;;  %v1678_v1 = vsel %vm1659_vm5, %v1647_v32, %v1632_v8  ;;  %v6439_v50 = vmul.f32 %v4848_v36, %v6105_v28  ;;  %v1836_v8 = vadd.f32 %v1804_v43, %v6208_v39 }
 0x27f   : > { %v1538_v16 = vadd.f32 %v5733_v24, %v1506_v38  ;;  %v1606_v19 = vadd.f32 %v8287_v45, %v1539_v34  ;;  %4425 = vmatmul.mubr.bf16.vlgmr.msra.gmra.mrb[32].mxu0 %v2210_v49  ;;  %v6443_v57 = vsel %vm1391_vm3, %v1678_v1, 0.0  ;;  %v1734_v24 = vmul.f32 %v5761_v46, %v6433_v61  ;;  %v4850_v55 = vpop.eup %4849  ;;  %v8289_v38 = vld [vmem:[#allocation57_spill] sm:$0xff] }
 0x280   : > { %8288 = vst [vmem:[#allocation56_spill] sm:$0xff] %v6439_v50  ;;  %v1735_v45 = vmul.f32 %v5761_v46, %v6443_v57  ;;  %v1837_v32 = vadd.f32 %v1805_v3, %v6246_v14  ;;  %v6454_v28 = vmul.f32 %v5736_v26, %v6366_v33  ;;  %v6458_v49 = vmul.f32 %v5740_v42, %v6366_v33  ;;  %v4852_v1 = vpop.eup %4851  ;;  %v8293_v14 = vld [vmem:[#allocation60_spill] sm:$0xff] }
 0x281   : > { %v1605_v34 = vadd.f32 %v8289_v38, %v1538_v16  ;;  %v6461_v36 = vmul.f32 %v4850_v55, %v6108_v21  ;;  %v6464_v16 = vmul.f32 %v5798_v20, %v1470_v4  ;;  %v1904_v43 = vadd.f32 %v8293_v14, %v1836_v8  ;;  %v8294_v3 = vld [vmem:[#allocation64_spill] sm:$0xff] }
 0x282   : > { %8290 = vst [vmem:[#allocation54_spill] sm:$0xff] %v6454_v28  ;;  %8291 = vst [vmem:[#allocation61_spill] sm:$0xff] %v6458_v49  ;;  %v6468_v39 = vadd.f32 %v1735_v45, %v1606_v19  ;;  %v1905_v37 = vadd.f32 %v8294_v3, %v1837_v32  ;;  %v6475_v49 = vmul.f32 %v5736_v26, %v6439_v50  ;;  %v1285_v21 = vadd.f32 1.0, %v4852_v1 }
 0x283   : > { %8292 = vst [vmem:[#allocation65_spill] sm:$0xff] %v6461_v36  ;;  %v6466_v38 = vadd.f32 %v1734_v24, %v1605_v34  ;;  %v1807_v55 = vmul.f32 %v5798_v20, %v1435_v54  ;;  %v6480_v28 = vmul.f32 %v5740_v42, %v6439_v50  ;;  %v1946_v24 = vmul.f32 %v8255_v52, %v6383_v47  ;;  %v4854_v45 = vpop.eup %4853 }
 0x284   : > { %8295 = vst [vmem:[#allocation55_spill] sm:$0xff] %v6475_v49  ;;  %v1947_v34 = vmul.f32 %v8255_v52, %v6395_v9  ;;  %4857 = vrcp.f32 %v1285_v21  ;;  %v2014_v8 = vmul.f32 %v8261_v17, %v1470_v4  ;;  %v2015_v32 = vmul.f32 %v8261_v17, %v1435_v54  ;;  %v8297_v4 = vld [vmem:[#allocation75_spill] sm:$0xff]  ;;  %v8299_v54 = vld [vmem:[#allocation68_spill] sm:$0xff] }
 0x285   : > { %8296 = vst [vmem:[#allocation52_spill] sm:$0xff] %v6480_v28  ;;  %v2082_v1 = vmul.f32 %v5768_v18, %v8282_v53  ;;  %v4856_v14 = vpop.eup %4855  ;;  %v1288_v3 = vadd.f32 1.0, %v4854_v45  ;;  %v1978_v5 = vadd.f32 %v1946_v24, %v1904_v43  ;;  %v2083_v19 = vmul.f32 %v5768_v18, %v8280_v51 }
 0x286   : > { %v1979_v28 = vadd.f32 %v1947_v34, %v1905_v37  ;;  %v1286_v33 = vadd.f32 1.0, %v4856_v14  ;;  %v2149_v49 = vmul.f32 %v6311_v31, %v6433_v61  ;;  %v2150_v21 = vmul.f32 %v6311_v31, %v6443_v57 }
 0x287   : > { %v8298_v29 = vrot.slane %v8297_v4, 7  ;;  %v8300_v50 = vrot.slane %v8299_v54, 7  ;;  %4859 = vrcp.f32 %v1288_v3  ;;  %v2046_v43 = vadd.f32 %v2014_v8, %v1978_v5  ;;  %v8303_v5 = vld [vmem:[#allocation69_spill] sm:$0xff] }
 0x288   : > { %v2047_v37 = vadd.f32 %v2015_v32, %v1979_v28  ;;  %4861 = vrcp.f32 %v1286_v33  ;;  %v1633_v3 = vrot.slane %v8299_v54, 1  ;;  %v1732_v10 = vmul.f32 %v5761_v46, %v6383_v47 }
 0x289   : > { %v1436_v53 = vsel %vm1431_vm4, %v8300_v50, %v8298_v29  ;;  %v8301_v24 = vmov %v8300_v50  ;;  %v8302_v51 = vmov %v8298_v29  ;;  %v6515_v29 = vld [vmem:[%s8005_s6] ss:$0 sm:$0xff]  ;;  %v2113_v28 = vadd.f32 %v2082_v1, %v2046_v43 }
 0x28a   : > { %v1451_v34 = vsel %vm1431_vm4, %v8302_v51, %v8301_v24  ;;  %v1509_v14 = vmul.f32 %v5712_v56, %v1436_v53  ;;  %v1536_v50 = vadd.f32 %v6515_v29, %v8303_v5  ;;  %v2114_v8 = vadd.f32 %v2083_v19, %v2047_v37  ;;  %v8304_v24 = vld [vmem:[#allocation59_spill] sm:$0xff]  ;;  %v8305_v1 = vld [vmem:[#allocation80_spill] sm:$0xff] }
 0x28b   : > { %v1472_v45 = vsel %vm1392_vm2, %v1451_v34, 0.0  ;;  %v1648_v34 = vrot.slane %v8297_v4, 1  ;;  %v2181_v35 = vadd.f32 %v2149_v49, %v2113_v28  ;;  %v1733_v19 = vmul.f32 %v5761_v46, %v6395_v9  ;;  %v8315_v28 = vld [vmem:[#allocation66_spill] sm:$0xff] }
 0x28c   : > { %v1508_v32 = vmul.f32 %v5712_v56, %v1472_v45  ;;  %v1541_v33 = vadd.f32 %v6515_v29, %v1509_v14  ;;  %v1603_v51 = vadd.f32 %v8304_v24, %v1536_v50  ;;  %v2182_v41 = vadd.f32 %v2150_v21, %v2114_v8  ;;  %v8306_v24 = vld [vmem:[#allocation72_spill] sm:$0xff] }
 0x28d   : > { %v1664_v37 = vsel %vm1659_vm5, %v1633_v3, %v1648_v34  ;;  %v1679_v14 = vsel %vm1659_vm5, %v1648_v34, %v1633_v3  ;;  %v6540_v9 = vmul.f32 %v5740_v42, %v6461_v36  ;;  %v1808_v34 = vmul.f32 %v5798_v20, %v1472_v45 }
 0x28e   : > { %v1540_v22 = vadd.f32 %v6515_v29, %v1508_v32  ;;  %v1608_v43 = vadd.f32 %v8305_v1, %v1541_v33  ;;  %v1764_v5 = vadd.f32 %v1732_v10, %v1603_v51  ;;  %v2211_v50 = vpack.c.bf16 %v2182_v41, %v2181_v35  ;;  %v4858_v21 = vpop.eup %4857  ;;  %v8308_v32 = vld [vmem:[#allocation67_spill] sm:$0xff] }
 0x28f   : > { %v1701_v47 = vsel %vm1391_vm3, %v1679_v14, 0.0  ;;  %v1736_v49 = vmul.f32 %v5761_v46, %v1664_v37  ;;  %8307 = vst [vmem:[#allocation62_spill] sm:$0xff] %v6540_v9  ;;  %v1765_v3 = vadd.f32 %v1733_v19, %v8308_v32  ;;  %v6546_v35 = vmul.f32 %v4858_v21, %v6344_v59  ;;  %v8309_v14 = vld [vmem:[#allocation58_spill] sm:$0xff]  ;;  %v4712_v21 = vld [vmem:[%s8010_s11] sm:$0xff]  }
 0x290   : > { %v1607_v60 = vadd.f32 %v8306_v24, %v1540_v22  ;;  %v1737_v8 = vmul.f32 %v5761_v46, %v1701_v47  ;;  %v1948_v22 = vmul.f32 %v8255_v52, %v6433_v61  ;;  %4428 = vmatprep.mubr.bf16.mxu0 %v2211_v50  ;;  %v1838_v10 = vadd.f32 %v6464_v16, %v1764_v5 }
 0x291   : > { %v1949_v33 = vmul.f32 %v8255_v52, %v6443_v57  ;;  %v1839_v1 = vadd.f32 %v1807_v55, %v1765_v3  ;;  %v4860_v19 = vpop.eup %4859  ;;  %v1809_v59 = vmul.f32 %v5798_v20, %v1436_v53  ;;  %v6561_v61 = vmul.f32 %v8255_v52, %v1664_v37  ;;  %v8310_v55 = vld [vmem:[#allocation63_spill] sm:$0xff]  ;;  %4504 = vmatprep.subr.bf16.mxu0 %v4712_v21 }
 0x292   : > { %v6550_v41 = vadd.f32 %v1736_v49, %v1607_v60  ;;  %v6555_v51 = vadd.f32 %v1737_v8, %v1608_v43  ;;  %v1906_v24 = vadd.f32 %v8309_v14, %v1838_v10  ;;  %v6564_v60 = vmul.f32 %v8255_v52, %v1701_v47  ;;  %v4862_v16 = vpop.eup %4861  ;;  %v4711_v49 = vld [vmem:[%s8008_s9] sm:$0xff]   ;;  %v4713_v8 = vld [vmem:[%s8008_s9 + $0x8] sm:$0xff]   ;;  %4505 = vmatpush3.bf16.msra.mxu0 %v4712_v21 }
 0x293   : > { %v6568_v57 = vmul.f32 %v5736_v26, %v6546_v35  ;;  %v6571_v43 = vmul.f32 %v4860_v19, %v6370_v0  ;;  %v1907_v5 = vadd.f32 %v8310_v55, %v1839_v1  ;;  %v2016_v50 = vmul.f32 %v8261_v17, %v1472_v45  ;;  %v4714_v10 = vld [vmem:[%s8010_s11 + $0x8] sm:$0xff]   ;;  %4456 = vmatprep.subr.bf16.mxu1 %v4711_v49 }
 0x294   : > { %v6586_v0 = vmul.f32 %v5740_v42, %v6546_v35  ;;  %v1980_v32 = vadd.f32 %v1948_v22, %v1906_v24  ;;  %v2017_v3 = vmul.f32 %v8261_v17, %v1436_v53  ;;  %v2084_v45 = vmul.f32 %v5768_v18, %v8299_v54  ;;  %4457 = vmatpush3.bf16.msra.mxu1 %v4711_v49 }
 0x295   : > { %v6596_v19 = vmul.f32 %v4862_v16, %v6374_v6  ;;  %v1981_v14 = vadd.f32 %v1949_v33, %v1907_v5  ;;  %v2085_v55 = vmul.f32 %v5768_v18, %v8297_v4  ;;  %v6603_v54 = vmul.f32 %v5740_v42, %v6571_v43  ;;  %v8313_v33 = vld [vmem:[#allocation73_spill] sm:$0xff]  ;;  %4458 = vmatprep.subr.bf16.mxu1 %v4713_v8 }
 0x296   : > { %8311 = vst [vmem:[#allocation57_spill] sm:$0xff] %v6586_v0  ;;  %v2048_v22 = vadd.f32 %v2016_v50, %v1980_v32  ;;  %v2151_v24 = vmul.f32 %v6311_v31, %v1664_v37  ;;  %v8314_v5 = vrot.slane %v8313_v33, 7  ;;  %v8316_v4 = vrot.slane %v8315_v28, 7  ;;  %4506 = vmatprep.subr.bf16.mxu0 %v4714_v10  ;;  %v8319_v0 = vld [vmem:[#allocation78_spill] sm:$0xff] }
 0x297   : > { %8312 = vst [vmem:[#allocation60_spill] sm:$0xff] %v6603_v54  ;;  %v2049_v16 = vadd.f32 %v2017_v3, %v1981_v14  ;;  %v2152_v49 = vmul.f32 %v6311_v31, %v1701_v47  ;;  %v4715_v3 = vld [vmem:[%s8008_s9 + $0x10] sm:$0xff]   ;;  %v1649_v47 = vrot.slane %v8313_v33, 1  ;;  %4507 = vmatpush3.bf16.msra.mxu0 %v4714_v10 }
 0x298   : > { %v1437_v1 = vsel %vm1431_vm4, %v8316_v4, %v8314_v5  ;;  %v8317_v53 = vmov %v8316_v4  ;;  %v8318_v9 = vmov %v8314_v5  ;;  %v2115_v37 = vadd.f32 %v2084_v45, %v2048_v22  ;;  %v4716_v14 = vld [vmem:[%s8010_s11 + $0x10] sm:$0xff]   ;;  %4459 = vmatpush3.bf16.msra.mxu1 %v4713_v8 }
 0x299   : > { %v1452_v50 = vsel %vm1431_vm4, %v8318_v9, %v8317_v53  ;;  %v1511_v32 = vmul.f32 %v5712_v56, %v1437_v1  ;;  %v2116_v5 = vadd.f32 %v2085_v55, %v2049_v16  ;;  %v1634_v45 = vrot.slane %v8315_v28, 1  ;;  %4460 = vmatprep.subr.bf16.mxu1 %v4715_v3  ;;  %4508 = vmatprep.subr.bf16.mxu0 %v4716_v14  ;;  %v8320_v8 = vld [vmem:[#allocation70_spill] sm:$0xff] }
 0x29a   : > { %v1474_v21 = vsel %vm1392_vm2, %v1452_v50, 0.0  ;;  %v1430_v53 = vrot.slane %v6596_v19, 7  ;;  %v2183_v22 = vadd.f32 %v2151_v24, %v2115_v37  ;;  %v1840_v50 = vadd.f32 %v1808_v34, %v6466_v38 }
 0x29b   : > { %v1510_v9 = vmul.f32 %v5712_v56, %v1474_v21  ;;  %v1543_v4 = vadd.f32 %v6515_v29, %v1511_v32  ;;  %v2184_v6 = vadd.f32 %v2152_v49, %v2116_v5  ;;  %v1665_v55 = vsel %vm1659_vm5, %v1634_v45, %v1649_v47  ;;  %v8321_v5 = vld [vmem:[#allocation76_spill] sm:$0xff]  ;;  %4509 = vmatpush3.bf16.msra.mxu0 %v4716_v14 }
 0x29c   : > { %v1680_v16 = vsel %vm1659_vm5, %v1649_v47, %v1634_v45  ;;  %v1738_v37 = vmul.f32 %v5761_v46, %v1665_v55  ;;  %v1841_v38 = vadd.f32 %v1809_v59, %v6468_v39  ;;  %v1908_v10 = vadd.f32 %v8321_v5, %v1840_v50  ;;  %4461 = vmatpush3.bf16.msra.mxu1 %v4715_v3  ;;  %v4719_v50 = vld [vmem:[%s8008_s9 + $0x20] sm:$0xff]  }
 0x29d   : > { %v1542_v54 = vadd.f32 %v6515_v29, %v1510_v9  ;;  %v1610_v36 = vadd.f32 %v8319_v0, %v1543_v4  ;;  %v6643_v24 = vsel %vm1391_vm3, %v1680_v16, 0.0  ;;  %v2212_v34 = vpack.c.bf16 %v2184_v6, %v2183_v22  ;;  %v4717_v0 = vld [vmem:[%s8008_s9 + $0x18] sm:$0xff]   ;;  %v8322_v6 = vld [vmem:[#allocation81_spill] sm:$0xff] }
 0x29e   : > { %v1739_v32 = vmul.f32 %v5761_v46, %v6643_v24  ;;  %v6656_v9 = vmul.f32 %v5736_v26, %v6596_v19  ;;  %v1810_v39 = vmul.f32 %v5798_v20, %v1474_v21  ;;  %v1811_v59 = vmul.f32 %v5798_v20, %v1437_v1  ;;  %4462 = vmatprep.subr.bf16.mxu1 %v4717_v0 }
 0x29f   : > { %v1609_v49 = vadd.f32 %v8320_v8, %v1542_v54  ;;  %v1909_v45 = vadd.f32 %v8322_v6, %v1841_v38  ;;  %v4718_v54 = vld [vmem:[%s8010_s11 + $0x18] sm:$0xff]   ;;  %4429 = vmatmul.mubr.bf16.gmra.mrb[36].mxu0 %v2212_v34  ;;  %v1982_v4 = vadd.f32 %v6561_v61, %v1908_v10  ;;  %v2018_v26 = vmul.f32 %v8261_v17, %v1474_v21 }
 0x2a0   : > { %v6666_v22 = vadd.f32 %v1739_v32, %v1610_v36  ;;  %v1952_v16 = vmul.f32 %v8255_v52, %v1665_v55  ;;  %v2019_v38 = vmul.f32 %v8261_v17, %v1437_v1  ;;  %v2087_v61 = vmul.f32 %v5768_v18, %v8313_v33  ;;  %4510 = vmatprep.subr.bf16.mxu0 %v4718_v54 }
 0x2a1   : > { %v6664_v47 = vadd.f32 %v1738_v37, %v1609_v49  ;;  %v1983_v3 = vadd.f32 %v6564_v60, %v1909_v45  ;;  %v2086_v37 = vmul.f32 %v5768_v18, %v8315_v28  ;;  %v2050_v36 = vadd.f32 %v2018_v26, %v1982_v4  ;;  %v4720_v28 = vld [vmem:[%s8010_s11 + $0x20] sm:$0xff]   ;;  %4463 = vmatpush3.bf16.msra.mxu1 %v4717_v0  ;;  %v4721_v26 = vld [vmem:[%s8008_s9 + $0x28] sm:$0xff]  }
 0x2a2   : > { %v8323_v21 = vrot.slane %v6170_v40, 7  ;;  %v8324_v34 = vrot.slane %v6095_v62, 7  ;;  %v2153_v14 = vmul.f32 %v6311_v31, %v1665_v55  ;;  %v1635_v45 = vrot.slane %v6095_v62, 1  ;;  %4464 = vmatprep.subr.bf16.mxu1 %v4719_v50  ;;  %4511 = vmatpush3.bf16.msra.mxu0 %v4718_v54 }
 0x2a3   : > { %v2051_v33 = vadd.f32 %v2019_v38, %v1983_v3  ;;  %v2117_v10 = vadd.f32 %v2086_v37, %v2050_v36  ;;  %v1650_v4 = vrot.slane %v6170_v40, 1  ;;  %v2154_v3 = vmul.f32 %v6311_v31, %v6643_v24  ;;  %4512 = vmatprep.subr.bf16.mxu0 %v4720_v28 }
 0x2a4   : > { %v1438_v8 = vsel %vm1431_vm4, %v8324_v34, %v8323_v21  ;;  %v8325_v49 = vmov %v8324_v34  ;;  %v8326_v60 = vmov %v8323_v21  ;;  %v1842_v0 = vadd.f32 %v1810_v39, %v6550_v41 }
 0x2a5   : > { %v1453_v1 = vsel %vm1431_vm4, %v8326_v60, %v8325_v49  ;;  %v1513_v5 = vmul.f32 %v5712_v56, %v1438_v8  ;;  %v2118_v55 = vadd.f32 %v2087_v61, %v2051_v33  ;;  %v2185_v37 = vadd.f32 %v2153_v14, %v2117_v10  ;;  %v4722_v61 = vld [vmem:[%s8010_s11 + $0x28] sm:$0xff]   ;;  %4465 = vmatpush3.bf16.msra.mxu1 %v4719_v50  ;;  %v8327_v14 = vld [vmem:[#allocation71_spill] sm:$0xff] }
 0x2a6   : > { %v1476_v32 = vsel %vm1392_vm2, %v1453_v1, 0.0  ;;  %v1666_v21 = vsel %vm1659_vm5, %v1635_v45, %v1650_v4  ;;  %v1681_v34 = vsel %vm1659_vm5, %v1650_v4, %v1635_v45  ;;  %v1843_v33 = vadd.f32 %v1811_v59, %v6555_v51  ;;  %4466 = vmatprep.subr.bf16.mxu1 %v4721_v26  ;;  %4513 = vmatpush3.bf16.msra.mxu0 %v4720_v28  ;;  %v8328_v51 = vld [vmem:[#allocation79_spill] sm:$0xff] }
 0x2a7   : > { %v1512_v6 = vmul.f32 %v5712_v56, %v1476_v32  ;;  %v1545_v38 = vadd.f32 %v6515_v29, %v1513_v5  ;;  %v2186_v49 = vadd.f32 %v2154_v3, %v2118_v55  ;;  %v1705_v41 = vsel %vm1391_vm3, %v1681_v34, 0.0  ;;  %4514 = vmatprep.subr.bf16.mxu0 %v4722_v61 }
 0x2a8   : > { %v1740_v39 = vmul.f32 %v5761_v46, %v1666_v21  ;;  %v1741_v1 = vmul.f32 %v5761_v46, %v1705_v41  ;;  %v1910_v5 = vadd.f32 %v8327_v14, %v1842_v0  ;;  %v1953_v10 = vmul.f32 %v8255_v52, %v6643_v24  ;;  %v4724_v24 = vld [vmem:[%s8010_s11 + $0x30] sm:$0xff]  }
 0x2a9   : > { %v1544_v36 = vadd.f32 %v6515_v29, %v1512_v6  ;;  %v1612_v60 = vadd.f32 %v6195_v27, %v1545_v38  ;;  %v2213_v6 = vpack.c.bf16 %v2186_v49, %v2185_v37  ;;  %v1812_v27 = vmul.f32 %v5798_v20, %v1476_v32  ;;  %v8331_v49 = vld [vmem:[#allocation77_spill] sm:$0xff]  ;;  %4467 = vmatpush3.bf16.msra.mxu1 %v4721_v26 }
 0x2aa   : > { %v2020_v45 = vmul.f32 %v8261_v17, %v1476_v32  ;;  %v1911_v59 = vadd.f32 %v8328_v51, %v1843_v33  ;;  %v1984_v55 = vadd.f32 %v1952_v16, %v1910_v5  ;;  %v1813_v32 = vmul.f32 %v5798_v20, %v1438_v8  ;;  %4515 = vmatpush3.bf16.msra.mxu0 %v4722_v61 }
 0x2ab   : > { %v1611_v54 = vadd.f32 %v6159_v48, %v1544_v36  ;;  %v4723_v48 = vld [vmem:[%s8008_s9 + $0x30] sm:$0xff]   ;;  %v6734_v4 = vadd.f32 %v1741_v1, %v1612_v60  ;;  %4432 = vmatprep.mubr.bf16.mxu0 %v2213_v6  ;;  %v1954_v28 = vmul.f32 %v8255_v52, %v1666_v21  ;;  %v2021_v3 = vmul.f32 %v8261_v17, %v1438_v8  ;;  %v8329_v36 = vld [vmem:[#allocation84_spill] sm:$0xff] }
 0x2ac   : > { %v2088_v38 = vmul.f32 %v5768_v18, %v6095_v62  ;;  %v1985_v0 = vadd.f32 %v1953_v10, %v1911_v59  ;;  %v2052_v37 = vadd.f32 %v2020_v45, %v1984_v55  ;;  %v2089_v16 = vmul.f32 %v5768_v18, %v6170_v40  ;;  %4468 = vmatprep.subr.bf16.mxu1 %v4723_v48 }
 0x2ad   : > { %v6732_v50 = vadd.f32 %v1740_v39, %v1611_v54  ;;  %v8330_v34 = vrot.slane %v8329_v36, 7  ;;  %v8332_v60 = vrot.slane %v8331_v49, 7  ;;  %v1636_v33 = vrot.slane %v8331_v49, 1  ;;  %4516 = vmatprep.subr.bf16.mxu0 %v4724_v24  ;;  %4469 = vmatpush3.bf16.msra.mxu1 %v4723_v48 }
 0x2ae   : > { %v1651_v40 = vrot.slane %v8329_v36, 1  ;;  %v2053_v14 = vadd.f32 %v2021_v3, %v1985_v0  ;;  %v2119_v5 = vadd.f32 %v2088_v38, %v2052_v37  ;;  %v2155_v10 = vmul.f32 %v6311_v31, %v1666_v21  ;;  %v8335_v37 = vld [vmem:[#allocation87_spill] sm:$0xff]  ;;  %4517 = vmatpush3.bf16.msra.mxu0 %v4724_v24 }
 0x2af   : > { %v1439_v39 = vsel %vm1431_vm4, %v8332_v60, %v8330_v34  ;;  %v8333_v54 = vmov %v8332_v60  ;;  %v8334_v8 = vmov %v8330_v34  ;;  %v2156_v55 = vmul.f32 %v6311_v31, %v1705_v41 }
 0x2b0   : > { %v1454_v62 = vsel %vm1431_vm4, %v8334_v8, %v8333_v54  ;;  %v1515_v1 = vmul.f32 %v5712_v56, %v1439_v39  ;;  %v1667_v51 = vsel %vm1659_vm5, %v1636_v33, %v1651_v40  ;;  %v1682_v59 = vsel %vm1659_vm5, %v1651_v40, %v1636_v33 }
 0x2b1   : > { %v1478_v26 = vsel %vm1392_vm2, %v1454_v62, 0.0  ;;  %v2120_v61 = vadd.f32 %v2089_v16, %v2053_v14  ;;  %v2187_v3 = vadd.f32 %v2155_v10, %v2119_v5  ;;  %v1707_v21 = vsel %vm1391_vm3, %v1682_v59, 0.0  ;;  %v8337_v5 = vld [vmem:[#allocation85_spill] sm:$0xff] }
 0x2b2   : > { %v1514_v6 = vmul.f32 %v5712_v56, %v1478_v26  ;;  %v1547_v45 = vadd.f32 %v6515_v29, %v1515_v1  ;;  %v1955_v38 = vmul.f32 %v8255_v52, %v1705_v41  ;;  %v1743_v60 = vmul.f32 %v5761_v46, %v1707_v21  ;;  %v8336_v1 = vld [vmem:[#allocation82_spill] sm:$0xff] }
 0x2b3   : > { %v2188_v54 = vadd.f32 %v2156_v55, %v2120_v61  ;;  %v1815_v8 = vmul.f32 %v5798_v20, %v1439_v39  ;;  %v1844_v16 = vadd.f32 %v1812_v27, %v6664_v47  ;;  %v1845_v62 = vadd.f32 %v1813_v32, %v6666_v22 }
 0x2b4   : > { %v1546_v0 = vadd.f32 %v6515_v29, %v1514_v6  ;;  %v1614_v34 = vadd.f32 %v8335_v37, %v1547_v45  ;;  %v1742_v48 = vmul.f32 %v5761_v46, %v1667_v51  ;;  %v1814_v41 = vmul.f32 %v5798_v20, %v1478_v26 }
 0x2b5   : > { %v2214_v14 = vpack.c.bf16 %v2188_v54, %v2187_v3  ;;  %v1912_v10 = vadd.f32 %v8337_v5, %v1844_v16  ;;  %v1913_v24 = vadd.f32 %v6199_v23, %v1845_v62  ;;  %v1956_v6 = vmul.f32 %v8255_v52, %v1667_v51 }
 0x2b6   : > { %v1613_v33 = vadd.f32 %v8336_v1, %v1546_v0  ;;  %v6783_v40 = vadd.f32 %v1743_v60, %v1614_v34  ;;  %v2022_v47 = vmul.f32 %v8261_v17, %v1478_v26  ;;  %v2023_v22 = vmul.f32 %v8261_v17, %v1439_v39 }
 0x2b7   : > { %v2090_v27 = vmul.f32 %v5768_v18, %v8331_v49  ;;  %4433 = vmatmul.mubr.bf16.gmra.mrb[40].mxu0 %v2214_v14  ;;  %v1986_v32 = vadd.f32 %v1954_v28, %v1912_v10  ;;  %v1987_v59 = vadd.f32 %v1955_v38, %v1913_v24  ;;  %v2091_v61 = vmul.f32 %v5768_v18, %v8329_v36 }
 0x2b8   : > { %v6789_v45 = vadd.f32 %v1742_v48, %v1613_v33  ;;  %v8338_v55 = vrot.slane %v6219_v25, 7  ;;  %v8339_v23 = vrot.slane %v6202_v30, 7  ;;  %v1637_v38 = vrot.slane %v6202_v30, 1 }
 0x2b9   : > { %v1652_v36 = vrot.slane %v6219_v25, 1  ;;  %v2054_v0 = vadd.f32 %v2022_v47, %v1986_v32  ;;  %v2055_v37 = vadd.f32 %v2023_v22, %v1987_v59  ;;  %v2157_v34 = vmul.f32 %v6311_v31, %v1667_v51 }
 0x2ba   : > { %v1440_v3 = vsel %vm1431_vm4, %v8339_v23, %v8338_v55  ;;  %v8340_v26 = vmov %v8339_v23  ;;  %v8341_v39 = vmov %v8338_v55  ;;  %v2158_v14 = vmul.f32 %v6311_v31, %v1707_v21 }
 0x2bb   : > { %v1455_v49 = vsel %vm1431_vm4, %v8341_v39, %v8340_v26  ;;  %v1517_v28 = vmul.f32 %v5712_v56, %v1440_v3  ;;  %v1668_v62 = vsel %vm1659_vm5, %v1637_v38, %v1652_v36  ;;  %v1683_v1 = vsel %vm1659_vm5, %v1652_v36, %v1637_v38 }
 0x2bc   : > { %v1480_v60 = vsel %vm1392_vm2, %v1455_v49, 0.0  ;;  %v2121_v33 = vadd.f32 %v2090_v27, %v2054_v0  ;;  %v2122_v48 = vadd.f32 %v2091_v61, %v2055_v37  ;;  %v1709_v51 = vsel %vm1391_vm3, %v1683_v1, 0.0 }
 0x2bd   : > { %v1516_v54 = vmul.f32 %v5712_v56, %v1480_v60  ;;  %v1549_v16 = vadd.f32 %v6515_v29, %v1517_v28  ;;  %v1957_v5 = vmul.f32 %v8255_v52, %v1707_v21  ;;  %v1745_v47 = vmul.f32 %v5761_v46, %v1709_v51  ;;  %v8343_v28 = vld [vmem:[#allocation88_spill] sm:$0xff] }
 0x2be   : > { %v2189_v22 = vadd.f32 %v2157_v34, %v2121_v33  ;;  %v2190_v32 = vadd.f32 %v2158_v14, %v2122_v48  ;;  %v1846_v59 = vadd.f32 %v1814_v41, %v6732_v50  ;;  %v1847_v27 = vadd.f32 %v1815_v8, %v6734_v4 }
 0x2bf   : > { %v1548_v10 = vadd.f32 %v6515_v29, %v1516_v54  ;;  %v1616_v24 = vadd.f32 %v6251_v58, %v1549_v16  ;;  %v1744_v55 = vmul.f32 %v5761_v46, %v1668_v62  ;;  %v1817_v21 = vmul.f32 %v5798_v20, %v1440_v3  ;;  %v8342_v58 = vld [vmem:[#allocation83_spill] sm:$0xff]  ;;  %v8345_v54 = vld [vmem:[#allocation86_spill] sm:$0xff] }
 0x2c0   : > { %v2215_v26 = vpack.c.bf16 %v2190_v32, %v2189_v22  ;;  %v1816_v39 = vmul.f32 %v5798_v20, %v1480_v60  ;;  %v1914_v49 = vadd.f32 %v8342_v58, %v1846_v59  ;;  %v1915_v38 = vadd.f32 %v8343_v28, %v1847_v27 }
 0x2c1   : > { %v1615_v61 = vadd.f32 %v6226_v11, %v1548_v10  ;;  %v6832_v23 = vadd.f32 %v1745_v47, %v1616_v24  ;;  %v2024_v50 = vmul.f32 %v8261_v17, %v1480_v60  ;;  %v2025_v4 = vmul.f32 %v8261_v17, %v1440_v3 }
 0x2c2   : > { %v2092_v11 = vmul.f32 %v5768_v18, %v6202_v30  ;;  %4436 = vmatprep.mubr.bf16.mxu0 %v2215_v26  ;;  %v1988_v8 = vadd.f32 %v1956_v6, %v1914_v49  ;;  %v1989_v41 = vadd.f32 %v1957_v5, %v1915_v38  ;;  %v2093_v0 = vmul.f32 %v5768_v18, %v6219_v25 }
 0x2c3   : > { %v6838_v36 = vadd.f32 %v1744_v55, %v1615_v61  ;;  %v2159_v37 = vmul.f32 %v6311_v31, %v1668_v62  ;;  %v8344_v34 = vrot.slane %v6206_v7, 7  ;;  %v8346_v16 = vrot.slane %v8345_v54, 7 }
 0x2c4   : > { %v1638_v6 = vrot.slane %v8345_v54, 1  ;;  %v1653_v25 = vrot.slane %v6206_v7, 1  ;;  %v2056_v33 = vadd.f32 %v2024_v50, %v1988_v8  ;;  %v2057_v48 = vadd.f32 %v2025_v4, %v1989_v41  ;;  %v8349_v50 = vld [vmem:[#allocation92_spill] sm:$0xff]  ;;  %v8350_v41 = vld [vmem:[#allocation89_spill] sm:$0xff] }
 0x2c5   : > { %v1441_v60 = vsel %vm1431_vm4, %v8346_v16, %v8344_v34  ;;  %v8347_v3 = vmov %v8346_v16  ;;  %v8348_v1 = vmov %v8344_v34  ;;  %v2160_v10 = vmul.f32 %v6311_v31, %v1709_v51 }
 0x2c6   : > { %v1456_v30 = vsel %vm1431_vm4, %v8348_v1, %v8347_v3  ;;  %v1519_v5 = vmul.f32 %v5712_v56, %v1441_v60  ;;  %v1669_v47 = vsel %vm1659_vm5, %v1638_v6, %v1653_v25  ;;  %v1684_v22 = vsel %vm1659_vm5, %v1653_v25, %v1638_v6  ;;  %v8351_v1 = vld [vmem:[#allocation91_spill] sm:$0xff] }
 0x2c7   : > { %v1482_v14 = vsel %vm1392_vm2, %v1456_v30, 0.0  ;;  %v2123_v32 = vadd.f32 %v2092_v11, %v2056_v33  ;;  %v2124_v59 = vadd.f32 %v2093_v0, %v2057_v48  ;;  %v1711_v61 = vsel %vm1391_vm3, %v1684_v22, 0.0 }
 0x2c8   : > { %v1518_v24 = vmul.f32 %v5712_v56, %v1482_v14  ;;  %v1551_v27 = vadd.f32 %v6515_v29, %v1519_v5  ;;  %v6875_v55 = vmul.f32 %v5740_v42, %v6596_v19  ;;  %v1958_v26 = vmul.f32 %v8255_v52, %v1668_v62 }
 0x2c9   : > { %v1747_v49 = vmul.f32 %v5761_v46, %v1711_v61  ;;  %v2191_v28 = vadd.f32 %v2159_v37, %v2123_v32  ;;  %v2192_v38 = vadd.f32 %v2160_v10, %v2124_v59  ;;  %v1848_v11 = vadd.f32 %v1816_v39, %v6789_v45  ;;  %v8352_v45 = vld [vmem:[#allocation95_spill] sm:$0xff] }
 0x2ca   : > { %v1550_v58 = vadd.f32 %v6515_v29, %v1518_v24  ;;  %v1618_v4 = vadd.f32 %v8349_v50, %v1551_v27  ;;  %v1959_v8 = vmul.f32 %v8255_v52, %v1709_v51  ;;  %v1746_v34 = vmul.f32 %v5761_v46, %v1669_v47 }
 0x2cb   : > { %v1849_v42 = vadd.f32 %v1817_v21, %v6783_v40  ;;  %v2216_v16 = vpack.c.bf16 %v2192_v38, %v2191_v28  ;;  %v1818_v3 = vmul.f32 %v5798_v20, %v1482_v14  ;;  %v1916_v37 = vadd.f32 %v8351_v1, %v1848_v11 }
 0x2cc   : > { %v1617_v0 = vadd.f32 %v8350_v41, %v1550_v58  ;;  %v6886_v62 = vadd.f32 %v1747_v49, %v1618_v4  ;;  %v1819_v6 = vmul.f32 %v5798_v20, %v1441_v60  ;;  %v1960_v51 = vmul.f32 %v8255_v52, %v1669_v47 }
 0x2cd   : > { %v1917_v39 = vadd.f32 %v8352_v45, %v1849_v42  ;;  %4437 = vmatmul.mubr.bf16.gmra.mrb[44].mxu0 %v2216_v16  ;;  %v1990_v25 = vadd.f32 %v1958_v26, %v1916_v37  ;;  %v2026_v33 = vmul.f32 %v8261_v17, %v1482_v14  ;;  %v2027_v40 = vmul.f32 %v8261_v17, %v1441_v60 }
 0x2ce   : > { %v6890_v30 = vadd.f32 %v1746_v34, %v1617_v0  ;;  %v2094_v21 = vmul.f32 %v5768_v18, %v8345_v54  ;;  %v8353_v5 = vrot.slane %v6306_v15, 7  ;;  %v8354_v10 = vrot.slane %v6267_v13, 7 }
 0x2cf   : > { %v1991_v48 = vadd.f32 %v1959_v8, %v1917_v39  ;;  %v1639_v60 = vrot.slane %v6267_v13, 1  ;;  %v2058_v59 = vadd.f32 %v2026_v33, %v1990_v25  ;;  %v1654_v26 = vrot.slane %v6306_v15, 1 }
 0x2d0   : > { %v1442_v24 = vsel %vm1431_vm4, %v8354_v10, %v8353_v5  ;;  %v8355_v22 = vmov %v8354_v10  ;;  %v8356_v32 = vmov %v8353_v5  ;;  %v2095_v49 = vmul.f32 %v5768_v18, %v6206_v7 }
 0x2d1   : > { %v1457_v14 = vsel %vm1431_vm4, %v8356_v32, %v8355_v22  ;;  %v1521_v27 = vmul.f32 %v5712_v56, %v1442_v24  ;;  %v2059_v58 = vadd.f32 %v2027_v40, %v1991_v48  ;;  %v2161_v28 = vmul.f32 %v6311_v31, %v1669_v47  ;;  %v8357_v48 = vld [vmem:[#allocation90_spill] sm:$0xff] }
 0x2d2   : > { %v1484_v54 = vsel %vm1392_vm2, %v1457_v14, 0.0  ;;  %v2125_v50 = vadd.f32 %v2094_v21, %v2058_v59  ;;  %v1670_v11 = vsel %vm1659_vm5, %v1639_v60, %v1654_v26  ;;  %v1685_v8 = vsel %vm1659_vm5, %v1654_v26, %v1639_v60  ;;  %v8359_v60 = vld [vmem:[#allocation53_spill] sm:$0xff] }
 0x2d3   : > { %v1520_v38 = vmul.f32 %v5712_v56, %v1484_v54  ;;  %v1553_v4 = vadd.f32 %v6515_v29, %v1521_v27  ;;  %v2126_v41 = vadd.f32 %v2095_v49, %v2059_v58  ;;  %v2162_v0 = vmul.f32 %v6311_v31, %v1711_v61  ;;  %v8361_v27 = vld [vmem:[#allocation93_spill] sm:$0xff] }
 0x2d4   : > { %v1713_v7 = vsel %vm1391_vm3, %v1685_v8, 0.0  ;;  %v2193_v47 = vadd.f32 %v2161_v28, %v2125_v50  ;;  %v1850_v1 = vadd.f32 %v1818_v3, %v6838_v36  ;;  %v1748_v39 = vmul.f32 %v5761_v46, %v1670_v11  ;;  %v8358_v3 = vld [vmem:[#allocation94_spill] sm:$0xff] }
 0x2d5   : > { %v1552_v34 = vadd.f32 %v6515_v29, %v1520_v38  ;;  %v1620_v42 = vadd.f32 %v6335_v44, %v1553_v4  ;;  %v1749_v16 = vmul.f32 %v5761_v46, %v1713_v7  ;;  %v2194_v37 = vadd.f32 %v2162_v0, %v2126_v41 }
 0x2d6   : > { %v1851_v25 = vadd.f32 %v1819_v6, %v6832_v23  ;;  %v1961_v33 = vmul.f32 %v8255_v52, %v1711_v61  ;;  %v1820_v21 = vmul.f32 %v5798_v20, %v1484_v54  ;;  %v1918_v5 = vadd.f32 %v8357_v48, %v1850_v1 }
 0x2d7   : > { %v1619_v45 = vadd.f32 %v6292_v63, %v1552_v34  ;;  %v6936_v40 = vadd.f32 %v1749_v16, %v1620_v42  ;;  %v2217_v44 = vpack.c.bf16 %v2194_v37, %v2193_v47  ;;  %v1821_v36 = vmul.f32 %v5798_v20, %v1442_v24 }
 0x2d8   : > { %v1919_v22 = vadd.f32 %v8358_v3, %v1851_v25  ;;  %v1992_v63 = vadd.f32 %v1960_v51, %v1918_v5  ;;  %v2028_v32 = vmul.f32 %v8261_v17, %v1484_v54  ;;  %v2029_v23 = vmul.f32 %v8261_v17, %v1442_v24  ;;  %v8366_v5 = vld [vmem:[#allocation96_spill] sm:$0xff] }
 0x2d9   : > { %v6940_v10 = vadd.f32 %v1748_v39, %v1619_v45  ;;  %v2096_v61 = vmul.f32 %v5768_v18, %v6267_v13  ;;  %4440 = vmatprep.mubr.bf16.mxu0 %v2217_v44  ;;  %v2097_v14 = vmul.f32 %v5768_v18, %v6306_v15  ;;  %v8360_v59 = vrot.slane %v8359_v60, 7  ;;  %v8365_v39 = vld [vmem:[#allocation50_spill] sm:$0xff] }
 0x2da   : > { %v1993_v6 = vadd.f32 %v1961_v33, %v1919_v22  ;;  %v8362_v26 = vrot.slane %v8361_v27, 7  ;;  %v2060_v13 = vadd.f32 %v2028_v32, %v1992_v63  ;;  %v2163_v49 = vmul.f32 %v6311_v31, %v1670_v11 }
 0x2db   : > { %v8364_v54 = vmov %v8360_v59  ;;  %v1640_v4 = vrot.slane %v8361_v27, 1  ;;  %v1655_v8 = vrot.slane %v8359_v60, 1  ;;  %v2164_v0 = vmul.f32 %v6311_v31, %v1713_v7 }
 0x2dc   : > { %v1443_v58 = vsel %vm1431_vm4, %v8362_v26, %v8360_v59  ;;  %v8363_v51 = vmov %v8362_v26  ;;  %v2061_v38 = vadd.f32 %v2029_v23, %v1993_v6  ;;  %v2127_v41 = vadd.f32 %v2096_v61, %v2060_v13  ;;  %v8367_v61 = vld [vmem:[#allocation51_spill] sm:$0xff] }
 0x2dd   : > { %v1458_v24 = vsel %vm1431_vm4, %v8364_v54, %v8363_v51  ;;  %v1523_v28 = vmul.f32 %v5712_v56, %v1443_v58  ;;  %v1852_v47 = vadd.f32 %v1820_v21, %v6890_v30  ;;  %v1671_v1 = vsel %vm1659_vm5, %v1640_v4, %v1655_v8  ;;  %v4725_v30 = vld [vmem:[%s8008_s9 + $0x38] sm:$0xff]  }
 0x2de   : > { %v1486_v15 = vsel %vm1392_vm2, %v1458_v24, 0.0  ;;  %v2128_v42 = vadd.f32 %v2097_v14, %v2061_v38  ;;  %v1686_v37 = vsel %vm1659_vm5, %v1655_v8, %v1640_v4  ;;  %v2195_v45 = vadd.f32 %v2163_v49, %v2127_v41  ;;  %v4726_v21 = vld [vmem:[%s8010_s11 + $0x38] sm:$0xff]   ;;  %4470 = vmatprep.subr.bf16.mxu1 %v4725_v30 }
 0x2df   : > { %v1522_v50 = vmul.f32 %v5712_v56, %v1486_v15  ;;  %v1555_v34 = vadd.f32 %v6515_v29, %v1523_v28  ;;  %v1715_v33 = vsel %vm1391_vm3, %v1686_v37, 0.0  ;;  %v1750_v31 = vmul.f32 %v5761_v46, %v1671_v1  ;;  %v8368_v51 = vld [vmem:[#allocation100_spill] sm:$0xff]  ;;  %4518 = vmatprep.subr.bf16.mxu0 %v4726_v21  ;;  %4471 = vmatpush3.bf16.msra.mxu1 %v4725_v30 }
 0x2e0   : > { %v2196_v48 = vadd.f32 %v2164_v0, %v2128_v42  ;;  %v1751_v3 = vmul.f32 %v5761_v46, %v1715_v33  ;;  %v1853_v22 = vadd.f32 %v1821_v36, %v6886_v62  ;;  %v1962_v63 = vmul.f32 %v8255_v52, %v1670_v11  ;;  %v8369_v28 = vld [vmem:[#allocation56_spill] sm:$0xff]  ;;  %4519 = vmatpush3.bf16.msra.mxu0 %v4726_v21 }
 0x2e1   : > { %v1554_v16 = vadd.f32 %v6515_v29, %v1522_v50  ;;  %v1622_v25 = vadd.f32 %v8365_v39, %v1555_v34  ;;  %v1963_v32 = vmul.f32 %v8255_v52, %v1713_v7  ;;  %v1822_v23 = vmul.f32 %v5798_v20, %v1486_v15  ;;  %v8371_v50 = vld [vmem:[#allocation99_spill] sm:$0xff] }
 0x2e2   : > { %v1920_v6 = vadd.f32 %v8367_v61, %v1852_v47  ;;  %v2218_v14 = vpack.c.bf16 %v2196_v48, %v2195_v45  ;;  %v1921_v54 = vadd.f32 %v8368_v51, %v1853_v22  ;;  %v1823_v24 = vmul.f32 %v5798_v20, %v1443_v58  ;;  %v8375_v22 = vld [vmem:[#allocation55_spill] sm:$0xff] }
 0x2e3   : > { %v1621_v44 = vadd.f32 %v8366_v5, %v1554_v16  ;;  %v6996_v26 = vadd.f32 %v1751_v3, %v1622_v25  ;;  %v2030_v11 = vmul.f32 %v8261_v17, %v1486_v15  ;;  %v2031_v7 = vmul.f32 %v8261_v17, %v1443_v58  ;;  %v7015_v58 = vld [vmem:[%s8004_s5 + $0x8] ss:$0 sm:$0xff] }
 0x2e4   : > { %v1994_v62 = vadd.f32 %v1962_v63, %v1920_v6  ;;  %4441 = vmatmul.mubr.bf16.gmra.mrb[48].mxu0 %v2218_v14  ;;  %v1995_v36 = vadd.f32 %v1963_v32, %v1921_v54  ;;  %v2098_v13 = vmul.f32 %v5768_v18, %v8361_v27  ;;  %v2099_v49 = vmul.f32 %v5768_v18, %v8359_v60 }
 0x2e5   : > { %v6994_v59 = vadd.f32 %v1750_v31, %v1621_v44  ;;  %v8370_v38 = vrot.slane %v8369_v28, 7  ;;  %v8372_v4 = vrot.slane %v8371_v50, 7  ;;  %v2165_v15 = vmul.f32 %v7015_v58, %v1671_v1 }
 0x2e6   : > { %v2062_v41 = vadd.f32 %v2030_v11, %v1994_v62  ;;  %v2063_v47 = vadd.f32 %v2031_v7, %v1995_v36  ;;  %v1641_v16 = vrot.slane %v8371_v50, 1  ;;  %v1656_v37 = vrot.slane %v8369_v28, 1  ;;  %v8376_v62 = vld [vmem:[#allocation103_spill] sm:$0xff] }
 0x2e7   : > { %v1444_v8 = vsel %vm1431_vm4, %v8372_v4, %v8370_v38  ;;  %v8373_v27 = vmov %v8372_v4  ;;  %v8374_v0 = vmov %v8370_v38  ;;  %v2166_v39 = vmul.f32 %v7015_v58, %v1715_v33  ;;  %v8378_v38 = vld [vmem:[#allocation97_spill] sm:$0xff] }
 0x2e8   : > { %v1459_v60 = vsel %vm1431_vm4, %v8374_v0, %v8373_v27  ;;  %v1525_v34 = vmul.f32 %v5712_v56, %v1444_v8  ;;  %v2129_v45 = vadd.f32 %v2098_v13, %v2062_v41  ;;  %v2130_v30 = vadd.f32 %v2099_v49, %v2063_v47 }
 0x2e9   : > { %v1488_v42 = vsel %vm1392_vm2, %v1459_v60, 0.0  ;;  %v1672_v48 = vsel %vm1659_vm5, %v1641_v16, %v1656_v37  ;;  %v1687_v21 = vsel %vm1659_vm5, %v1656_v37, %v1641_v16  ;;  %v1854_v5 = vadd.f32 %v1822_v23, %v6940_v10  ;;  %v8377_v23 = vld [vmem:[#allocation49_spill] sm:$0xff]  ;;  %v8381_v16 = vld [vmem:[#allocation98_spill] sm:$0xff] }
 0x2ea   : > { %v1524_v25 = vmul.f32 %v5712_v56, %v1488_v42  ;;  %v1557_v31 = vadd.f32 %v6515_v29, %v1525_v34  ;;  %v2197_v44 = vadd.f32 %v2165_v15, %v2129_v45  ;;  %v1717_v32 = vsel %vm1391_vm3, %v1687_v21, 0.0  ;;  %v8379_v34 = vld [vmem:[#allocation104_spill] sm:$0xff] }
 0x2eb   : > { %v1964_v61 = vmul.f32 %v8255_v52, %v1671_v1  ;;  %v2198_v6 = vadd.f32 %v2166_v39, %v2130_v30  ;;  %v1753_v14 = vmul.f32 %v5761_v46, %v1717_v32  ;;  %v1855_v51 = vadd.f32 %v1823_v24, %v6936_v40 }
 0x2ec   : > { %v1556_v3 = vadd.f32 %v6515_v29, %v1524_v25  ;;  %v1624_v63 = vadd.f32 %v8375_v22, %v1557_v31  ;;  %v1965_v54 = vmul.f32 %v8255_v52, %v1715_v33  ;;  %v1752_v10 = vmul.f32 %v5761_v46, %v1672_v48 }
 0x2ed   : > { %v1922_v7 = vadd.f32 %v8377_v23, %v1854_v5  ;;  %v2219_v36 = vpack.c.bf16 %v2198_v6, %v2197_v44  ;;  %v1825_v49 = vmul.f32 %v5798_v20, %v1444_v8  ;;  %v1923_v1 = vadd.f32 %v8378_v38, %v1855_v51 }
 0x2ee   : > { %v1623_v11 = vadd.f32 %v8376_v62, %v1556_v3  ;;  %v7048_v13 = vadd.f32 %v1753_v14, %v1624_v63  ;;  %v1824_v41 = vmul.f32 %v5798_v20, %v1488_v42  ;;  %v2032_v33 = vmul.f32 %v8261_v17, %v1488_v42 }
 0x2ef   : > { %v1996_v40 = vadd.f32 %v1964_v61, %v1922_v7  ;;  %4444 = vmatprep.mubr.bf16.mxu0 %v2219_v36  ;;  %v1997_v24 = vadd.f32 %v1965_v54, %v1923_v1  ;;  %v2033_v15 = vmul.f32 %v8261_v17, %v1444_v8  ;;  %v2100_v27 = vmul.f32 %v5768_v18, %v8371_v50  ;;  %v8386_v1 = vld [vmem:[#allocation101_spill] sm:$0xff] }
 0x2f0   : > { %v7052_v4 = vadd.f32 %v1752_v10, %v1623_v11  ;;  %v2101_v0 = vmul.f32 %v5768_v18, %v8369_v28  ;;  %v8380_v47 = vrot.slane %v8379_v34, 7  ;;  %v8382_v37 = vrot.slane %v8381_v16, 7  ;;  %v8385_v10 = vld [vmem:[#allocation54_spill] sm:$0xff] }
 0x2f1   : > { %v2064_v60 = vadd.f32 %v2032_v33, %v1996_v40  ;;  %v1642_v50 = vrot.slane %v8381_v16, 1  ;;  %v2065_v25 = vadd.f32 %v2033_v15, %v1997_v24  ;;  %v1657_v30 = vrot.slane %v8379_v34, 1 }
 0x2f2   : > { %v1445_v45 = vsel %vm1431_vm4, %v8382_v37, %v8380_v47  ;;  %v8383_v42 = vmov %v8382_v37  ;;  %v8384_v39 = vmov %v8380_v47  ;;  %v2167_v5 = vmul.f32 %v7015_v58, %v1672_v48 }
 0x2f3   : > { %v1460_v8 = vsel %vm1431_vm4, %v8384_v39, %v8383_v42  ;;  %v1527_v31 = vmul.f32 %v5712_v56, %v1445_v45  ;;  %v2131_v21 = vadd.f32 %v2100_v27, %v2064_v60  ;;  %v2168_v44 = vmul.f32 %v7015_v58, %v1717_v32  ;;  %v8388_v42 = vld [vmem:[#allocation52_spill] sm:$0xff] }
 0x2f4   : > { %v1490_v28 = vsel %vm1392_vm2, %v1460_v8, 0.0  ;;  %v2132_v22 = vadd.f32 %v2101_v0, %v2065_v25  ;;  %v1673_v61 = vsel %vm1659_vm5, %v1642_v50, %v1657_v30  ;;  %v1688_v6 = vsel %vm1659_vm5, %v1657_v30, %v1642_v50  ;;  %v8387_v0 = vld [vmem:[#allocation74_spill] sm:$0xff] }
 0x2f5   : > { %v1526_v3 = vmul.f32 %v5712_v56, %v1490_v28  ;;  %v1559_v63 = vadd.f32 %v6515_v29, %v1527_v31  ;;  %v1966_v14 = vmul.f32 %v8255_v52, %v1672_v48  ;;  %v2199_v51 = vadd.f32 %v2167_v5, %v2131_v21 }
 0x2f6   : > { %v1719_v62 = vsel %vm1391_vm3, %v1688_v6, 0.0  ;;  %v2200_v11 = vadd.f32 %v2168_v44, %v2132_v22  ;;  %v1856_v36 = vadd.f32 %v1824_v41, %v6994_v59  ;;  %v1967_v38 = vmul.f32 %v8255_v52, %v1717_v32 }
 0x2f7   : > { %v1558_v54 = vadd.f32 %v6515_v29, %v1526_v3  ;;  %v1626_v23 = vadd.f32 %v8385_v10, %v1559_v63  ;;  %v1755_v7 = vmul.f32 %v5761_v46, %v1719_v62  ;;  %v1754_v33 = vmul.f32 %v5761_v46, %v1673_v61 }
 0x2f8   : > { %v1857_v48 = vadd.f32 %v1825_v49, %v6996_v26  ;;  %v2220_v24 = vpack.c.bf16 %v2200_v11, %v2199_v51  ;;  %v1826_v27 = vmul.f32 %v5798_v20, %v1490_v28  ;;  %v1924_v60 = vadd.f32 %v8387_v0, %v1856_v36 }
 0x2f9   : > { %v1625_v40 = vadd.f32 %v8386_v1, %v1558_v54  ;;  %v7097_v15 = vadd.f32 %v1755_v7, %v1626_v23  ;;  %v1827_v37 = vmul.f32 %v5798_v20, %v1445_v45  ;;  %v1968_v32 = vmul.f32 %v8255_v52, %v1673_v61 }
 0x2fa   : > { %v1925_v59 = vadd.f32 %v8388_v42, %v1857_v48  ;;  %4445 = vmatmul.mubr.bf16.gmra.mrb[52].mxu0 %v2220_v24  ;;  %v1998_v41 = vadd.f32 %v1966_v14, %v1924_v60  ;;  %v2034_v39 = vmul.f32 %v8261_v17, %v1490_v28  ;;  %v2035_v26 = vmul.f32 %v8261_v17, %v1445_v45  ;;  %v8391_v24 = vld [vmem:[#allocation102_spill] sm:$0xff] }
 0x2fb   : > { %v1786_v47 = vadd.f32 %v1754_v33, %v1625_v40  ;;  %v2102_v49 = vmul.f32 %v5768_v18, %v8381_v16  ;;  %v8389_v50 = vrot.slane %v6546_v35, 7  ;;  %v1643_v45 = vrot.slane %v6546_v35, 1 }
 0x2fc   : > { %v1999_v8 = vadd.f32 %v1967_v38, %v1925_v59  ;;  %v2066_v30 = vadd.f32 %v2034_v39, %v1998_v41  ;;  %v1658_v5 = vrot.slane %v6596_v19, 1  ;;  %v2103_v3 = vmul.f32 %v5768_v18, %v8379_v34  ;;  %v8392_v59 = vld [vmem:[#allocation61_spill] sm:$0xff] }
 0x2fd   : > { %v1446_v25 = vsel %vm1431_vm4, %v8389_v50, %v1430_v53  ;;  %v8390_v31 = vmov %v8389_v50  ;;  %v2169_v22 = vmul.f32 %v7015_v58, %v1673_v61  ;;  %v2170_v11 = vmul.f32 %v7015_v58, %v1719_v62  ;;  %v8394_v39 = vld [vmem:[#allocation65_spill] sm:$0xff] }
 0x2fe   : > { %v1461_v28 = vsel %vm1431_vm4, %v1430_v53, %v8390_v31  ;;  %v1529_v21 = vmul.f32 %v5712_v56, %v1446_v25  ;;  %v2067_v44 = vadd.f32 %v2035_v26, %v1999_v8  ;;  %v2133_v6 = vadd.f32 %v2102_v49, %v2066_v30 }
 0x2ff   : > { %v1492_v16 = vsel %vm1392_vm2, %v1461_v28, 0.0  ;;  %v1674_v14 = vsel %vm1659_vm5, %v1643_v45, %v1658_v5  ;;  %v1689_v51 = vsel %vm1659_vm5, %v1658_v5, %v1643_v45  ;;  %v1858_v7 = vadd.f32 %v1826_v27, %v7052_v4 }
 0x300   : > { %v1528_v63 = vmul.f32 %v5712_v56, %v1492_v16  ;;  %v1561_v53 = vadd.f32 %v6515_v29, %v1529_v21  ;;  %v2134_v54 = vadd.f32 %v2103_v3, %v2067_v44  ;;  %v1721_v34 = vsel %vm1391_vm3, %v1689_v51, 0.0 }
 0x301   : > { %v2201_v61 = vadd.f32 %v2169_v22, %v2133_v6  ;;  %v1757_v23 = vmul.f32 %v5761_v46, %v1721_v34  ;;  %v1756_v1 = vmul.f32 %v5761_v46, %v1674_v14  ;;  %v1859_v40 = vadd.f32 %v1827_v37, %v7048_v13 }
 0x302   : > { %v1560_v10 = vadd.f32 %v6515_v29, %v1528_v63  ;;  %v1628_v56 = vadd.f32 %v6656_v9, %v1561_v53  ;;  %v2202_v36 = vadd.f32 %v2170_v11, %v2134_v54  ;;  %v1969_v33 = vmul.f32 %v8255_v52, %v1719_v62  ;;  %v8400_v63 = vld [vmem:[#allocation57_spill] sm:$0xff] }
 0x303   : > { %v1828_v48 = vmul.f32 %v5798_v20, %v1492_v16  ;;  %v1926_v0 = vadd.f32 %v8391_v24, %v1858_v7  ;;  %v1829_v42 = vmul.f32 %v5798_v20, %v1446_v25  ;;  %v1927_v4 = vadd.f32 %v8392_v59, %v1859_v40 }
 0x304   : > { %v1627_v38 = vadd.f32 %v6568_v57, %v1560_v10  ;;  %v1789_v29 = vadd.f32 %v1757_v23, %v1628_v56  ;;  %v2221_v60 = vpack.c.bf16 %v2202_v36, %v2201_v61  ;;  %v1970_v27 = vmul.f32 %v8255_v52, %v1674_v14 }
 0x305   : > { %v1971_v57 = vmul.f32 %v8255_v52, %v1721_v34  ;;  %v2000_v46 = vadd.f32 %v1968_v32, %v1926_v0  ;;  %v2036_v13 = vmul.f32 %v8261_v17, %v1492_v16  ;;  %v2001_v62 = vadd.f32 %v1969_v33, %v1927_v4 }
 0x306   : > { %v1788_v9 = vadd.f32 %v1756_v1, %v1627_v38  ;;  %4448 = vmatprep.mubr.bf16.mxu0 %v2221_v60  ;;  %v2037_v37 = vmul.f32 %v8261_v17, %v1446_v25  ;;  %v8393_v41 = vrot.slane %v6571_v43, 7  ;;  %v8395_v26 = vrot.slane %v8394_v39, 7  ;;  %v8403_v60 = vld [vmem:[#allocation62_spill] sm:$0xff] }
 0x307   : > { %v2068_v31 = vadd.f32 %v2036_v13, %v2000_v46  ;;  %v2104_v28 = vmul.f32 %v5768_v18, %v6546_v35  ;;  %v2105_v25 = vmul.f32 %v5768_v18, %v6596_v19  ;;  %v1860_v45 = vadd.f32 %v1828_v48, %v1786_v47 }
 0x308   : > { %v1792_v49 = vsel %vm1431_vm4, %v8395_v26, %v8393_v41  ;;  %v8396_v8 = vmov %v8395_v26  ;;  %v8397_v50 = vmov %v8393_v41  ;;  %v2069_v30 = vadd.f32 %v2037_v37, %v2001_v62 }
 0x309   : > { %v1793_v32 = vsel %vm1431_vm4, %v8397_v50, %v8396_v8  ;;  %v1861_v21 = vadd.f32 %v1829_v42, %v7097_v15  ;;  %v8398_v5 = vrot.slane %v6571_v43, 1  ;;  %v8399_v44 = vrot.slane %v8394_v39, 1 }
 0x30a   : > { %v1794_v16 = vsel %vm1392_vm2, %v1793_v32, 0.0  ;;  %v2135_v22 = vadd.f32 %v2104_v28, %v2068_v31  ;;  %v2171_v35 = vmul.f32 %v7015_v58, %v1674_v14  ;;  %v1928_v6 = vadd.f32 %v8400_v63, %v1860_v45  ;;  %v7210_v32 = vld [vmem:[%s8007_s8] ss:$0 sm:$0xff] }
 0x30b   : > { %v1934_v3 = vsel %vm1659_vm5, %v8399_v44, %v8398_v5  ;;  %v8401_v19 = vmov %v8399_v44  ;;  %v8402_v47 = vmov %v8398_v5  ;;  %v2136_v15 = vadd.f32 %v2105_v25, %v2069_v30  ;;  %v8406_v44 = vld [vmem:[#allocation18_spill] sm:$0xff]  ;;  %v8408_v63 = vld [vmem:[#allocation20_spill] sm:$0xff] }
 0x30c   : > { %v1935_v53 = vsel %vm1659_vm5, %v8402_v47, %v8401_v19  ;;  %v2172_v51 = vmul.f32 %v7015_v58, %v1721_v34  ;;  %v1831_v54 = vmul.f32 %v5798_v20, %v1792_v49  ;;  %v1929_v11 = vadd.f32 %v6875_v55, %v1861_v21  ;;  %v8405_v21 = vld [vmem:[#allocation17_spill] sm:$0xff] }
 0x30d   : > { %v2203_v10 = vadd.f32 %v2171_v35, %v2135_v22  ;;  %v1830_v61 = vmul.f32 %v5798_v20, %v1794_v16  ;;  %v2002_v14 = vadd.f32 %v1970_v27, %v1928_v6  ;;  %v2038_v56 = vmul.f32 %v8261_v17, %v1794_v16  ;;  %v8407_v22 = vld [vmem:[#allocation19_spill] sm:$0xff] }
 0x30e   : > { %v2204_v23 = vadd.f32 %v2172_v51, %v2136_v15  ;;  %v1972_v7 = vmul.f32 %v8255_v52, %v1934_v3  ;;  %v2003_v36 = vadd.f32 %v1971_v57, %v1929_v11  ;;  %v2039_v12 = vmul.f32 %v8261_v17, %v1792_v49  ;;  %v4728_v15 = vld [vmem:[%s8012_s13 + $0x8] sm:$0xff]  }
 0x30f   : > { %v1937_v38 = vsel %vm1391_vm3, %v1935_v53, 0.0  ;;  %v2070_v34 = vadd.f32 %v2038_v56, %v2002_v14  ;;  %v2106_v1 = vmul.f32 %v5768_v18, %v8394_v39  ;;  %v1862_v55 = vadd.f32 %v1830_v61, %v1788_v9  ;;  %v8404_v9 = vld [vmem:[#allocation60_spill] sm:$0xff] }
 0x310   : > { %v2222_v40 = vpack.c.bf16 %v2204_v23, %v2203_v10  ;;  %v2071_v33 = vadd.f32 %v2039_v12, %v2003_v36  ;;  %v2107_v20 = vmul.f32 %v5768_v18, %v6571_v43  ;;  %v1863_v48 = vadd.f32 %v1831_v54, %v1789_v29  ;;  %v4727_v53 = vld [vmem:[%s8012_s13] sm:$0xff]   ;;  %v8410_v12 = vld [vmem:[#allocation22_spill] sm:$0xff] }
 0x311   : > { %v2137_v24 = vadd.f32 %v2106_v1, %v2070_v34  ;;  %v2173_v0 = vmul.f32 %v7015_v58, %v1934_v3  ;;  %v1930_v42 = vadd.f32 %v8403_v60, %v1862_v55  ;;  %v2040_v59 = vmul.f32 0.0, %v8261_v17  ;;  %4600 = vmatprep.subr.bf16.mxu1 %v4727_v53  ;;  %4552 = vmatprep.subr.bf16.mxu0 %v4727_v53  ;;  %v8411_v34 = vld [vmem:[#allocation23_spill] sm:$0xff]  ;;  %v8412_v55 = vld [vmem:[#allocation24_spill] sm:$0xff] }
 0x312   : > { %4449 = vmatmul.mubr.bf16.gmra.mrb[56].mxu0 %v2222_v40  ;;  %v1973_v2 = vmul.f32 %v8255_v52, %v1937_v38  ;;  %v2138_v4 = vadd.f32 %v2107_v20, %v2071_v33  ;;  %v2174_v27 = vmul.f32 %v7015_v58, %v1937_v38  ;;  %v1931_v57 = vadd.f32 %v8404_v9, %v1863_v48 }
 0x313   : > { %v2205_v46 = vadd.f32 %v2173_v0, %v2137_v24  ;;  %v2004_v13 = vadd.f32 %v1972_v7, %v1930_v42  ;;  %v2108_v43 = vmul.f32 0.0, %v5768_v18  ;;  %v2175_v41 = vmul.f32 0.0, %v7015_v58  ;;  %v8409_v7 = vld [vmem:[#allocation21_spill] sm:$0xff] }
 0x314   : > { %v2206_v29 = vadd.f32 %v2174_v27, %v2138_v4  ;;  %v2005_v62 = vadd.f32 %v1973_v2, %v1931_v57  ;;  %v8413_v27 = vld [vmem:[#allocation25_spill] sm:$0xff]  ;;  %v8414_v57 = vld [vmem:[#allocation26_spill] sm:$0xff] }
 0x315   : > { %v2072_v37 = vadd.f32 %v2040_v59, %v2004_v13  ;;  %v8415_v13 = vld [vmem:[#allocation27_spill] sm:$0xff] }
 0x316   : > { %v2223_v39 = vpack.c.bf16 %v2206_v29, %v2205_v46  ;;  %v2073_v26 = vadd.f32 %v2040_v59, %v2005_v62  ;;  %v8416_v29 = vld [vmem:[#allocation28_spill] sm:$0xff] }
 0x317   : > { %v2139_v17 = vadd.f32 %v2108_v43, %v2072_v37 }
 0x318   : > { %4452 = vmatprep.mubr.bf16.mxu0 %v2223_v39  ;;  %v2140_v49 = vadd.f32 %v2108_v43, %v2073_v26 }
 0x319   : > { %v2207_v52 = vadd.f32 %v2175_v41, %v2139_v17 }
 0x31a   : > { %v2208_v8 = vadd.f32 %v2175_v41, %v2140_v49 }
 0x31c   : > { %v2224_v50 = vpack.c.bf16 %v2208_v8, %v2207_v52 }
 0x31e   : > { %4453 = vmatmul.mubr.bf16.gmra.mrb[60].mxu0 %v2224_v50 }
 0x352   : > { %v4426_v18 = vpop.f32.mrb[32].mxu0 }
 0x353   : > { %v2330_v31 = vpop.f32.mrb[33].mxu0  ;;  %v2339_v58 = vadd.f32 %v4426_v18, %v7210_v32 }
 0x354   : > { %v2331_v28 = vadd.f32 %v7210_v32, %v2330_v31  ;;  %v4427_v25 = vpop.f32.mrb[34].mxu0  ;;  %v8417_v31 = vld [vmem:[#allocation29_spill] sm:$0xff] }
 0x355   : > { %v2342_v45 = vadd.f32 %v4427_v25, %v7210_v32  ;;  %v2333_v30 = vpop.f32.mrb[35].mxu0  ;;  %v7226_v6 = vadd.f32 %v2339_v58, %v8408_v63  ;;  %v8419_v25 = vld [vmem:[#allocation30_spill] sm:$0xff] }
 0x356   : > { %v2334_v16 = vadd.f32 %v7210_v32, %v2333_v30  ;;  %v7220_v3 = vadd.f32 %v2331_v28, %v8406_v44 }
 0x357   : > { %v7217_v5 = vadd.f32 %v2342_v45, %v8405_v21  ;;  %v8421_v45 = vld [vmem:[#allocation31_spill] sm:$0xff] }
 0x358   : > { %v7223_v35 = vadd.f32 %v2334_v16, %v8407_v22  ;;  %v8423_v16 = vld [vmem:[#allocation32_spill] sm:$0xff] }
 0x359   : > { %v2490_v47 = vpack.c.bf16 %v7217_v5, %v7226_v6 }
 0x35a   : > { %v2489_v19 = vpack.c.bf16 %v7223_v35, %v7220_v3 }
 0x35c   : > { %4472 = vmatprep.mubr.bf16.mxu1 %v2489_v19  ;;  %4520 = vmatprep.mubr.bf16.mxu0 %v2489_v19 }
 0x35d   : > { %4473 = vmatmul.mubr.bf16.vlgmr.msra.gmra.mrb[32].mxu1 %v2490_v47  ;;  %4521 = vmatmul.mubr.bf16.vlgmr.msra.gmra.mrb[64].mxu0 %v2490_v47 }
 0x35e   : > { %4608 = vmatpush3.bf16.msra.mxu1 %v4727_v53  ;;  %4553 = vmatpush3.bf16.msra.mxu0 %v4727_v53 }
 0x35f   : > { %4601 = vmatprep.subr.bf16.mxu1 %v4728_v15  ;;  %4554 = vmatprep.subr.bf16.mxu0 %v4728_v15 }
 0x362   : > { %4609 = vmatpush3.bf16.msra.mxu1 %v4728_v15  ;;  %4555 = vmatpush3.bf16.msra.mxu0 %v4728_v15 }
 0x372   : > { %v4430_v51 = vpop.f32.mrb[36].mxu0 }
 0x373   : > { %v2346_v54 = vpop.f32.mrb[37].mxu0  ;;  %v2355_v61 = vadd.f32 %v4430_v51, %v7210_v32 }
 0x374   : > { %v2347_v11 = vadd.f32 %v7210_v32, %v2346_v54  ;;  %v4431_v10 = vpop.f32.mrb[38].mxu0 }
 0x375   : > { %v2358_v14 = vadd.f32 %v4431_v10, %v7210_v32  ;;  %v2349_v56 = vpop.f32.mrb[39].mxu0  ;;  %v7252_v40 = vadd.f32 %v2355_v61, %v8412_v55 }
 0x376   : > { %v2350_v23 = vadd.f32 %v7210_v32, %v2349_v56  ;;  %v7246_v38 = vadd.f32 %v2347_v11, %v8410_v12 }
 0x377   : > { %v7243_v36 = vadd.f32 %v2358_v14, %v8409_v7 }
 0x378   : > { %v7249_v1 = vadd.f32 %v2350_v23, %v8411_v34  ;;  %v8425_v23 = vld [vmem:[#allocation33_spill] sm:$0xff] }
 0x379   : > { %v2492_v20 = vpack.c.bf16 %v7243_v36, %v7252_v40 }
 0x37a   : > { %v2491_v33 = vpack.c.bf16 %v7249_v1, %v7246_v38 }
 0x37c   : > { %4476 = vmatprep.mubr.bf16.mxu1 %v2491_v33  ;;  %4524 = vmatprep.mubr.bf16.mxu0 %v2491_v33 }
 0x37d   : > { %4477 = vmatmul.mubr.bf16.gmra.mrb[36].mxu1 %v2492_v20  ;;  %4525 = vmatmul.mubr.bf16.gmra.mrb[68].mxu0 %v2492_v20  ;;  %v8427_v20 = vld [vmem:[#allocation34_spill] sm:$0xff] }
 0x38a   : > { %v4434_v48 = vpop.f32.mrb[40].mxu0 }
 0x38b   : > { %v2362_v24 = vpop.f32.mrb[41].mxu0  ;;  %v2371_v42 = vadd.f32 %v4434_v48, %v7210_v32 }
 0x38c   : > { %v2363_v0 = vadd.f32 %v7210_v32, %v2362_v24  ;;  %v4435_v60 = vpop.f32.mrb[42].mxu0  ;;  %v8429_v24 = vld [vmem:[#allocation35_spill] sm:$0xff] }
 0x38d   : > { %v2374_v59 = vadd.f32 %v4435_v60, %v7210_v32  ;;  %v2365_v2 = vpop.f32.mrb[43].mxu0  ;;  %v7272_v62 = vadd.f32 %v2371_v42, %v8416_v29  ;;  %v8431_v60 = vld [vmem:[#allocation36_spill] sm:$0xff] }
 0x38e   : > { %v2366_v4 = vadd.f32 %v7210_v32, %v2365_v2  ;;  %v7266_v46 = vadd.f32 %v2363_v0, %v8414_v57 }
 0x38f   : > { %v7263_v9 = vadd.f32 %v2374_v59, %v8413_v27 }
 0x390   : > { %v7269_v43 = vadd.f32 %v2366_v4, %v8415_v13 }
 0x391   : > { %v2494_v41 = vpack.c.bf16 %v7263_v9, %v7272_v62 }
 0x392   : > { %v2493_v37 = vpack.c.bf16 %v7269_v43, %v7266_v46 }
 0x394   : > { %4480 = vmatprep.mubr.bf16.mxu1 %v2493_v37  ;;  %4528 = vmatprep.mubr.bf16.mxu0 %v2493_v37 }
 0x395   : > { %4481 = vmatmul.mubr.bf16.gmra.mrb[40].mxu1 %v2494_v41  ;;  %4529 = vmatmul.mubr.bf16.gmra.mrb[72].mxu0 %v2494_v41 }
 0x3a0   : > { %v4438_v39 = vpop.f32.mrb[44].mxu0 }
 0x3a1   : > { %v2378_v26 = vpop.f32.mrb[45].mxu0  ;;  %v2387_v52 = vadd.f32 %v4438_v39, %v7210_v32 }
 0x3a2   : > { %v2379_v17 = vadd.f32 %v7210_v32, %v2378_v26  ;;  %v4439_v49 = vpop.f32.mrb[46].mxu0 }
 0x3a3   : > { %v2390_v8 = vadd.f32 %v4439_v49, %v7210_v32  ;;  %v2381_v50 = vpop.f32.mrb[47].mxu0  ;;  %v7292_v19 = vadd.f32 %v2387_v52, %v8423_v16 }
 0x3a4   : > { %v2382_v18 = vadd.f32 %v7210_v32, %v2381_v50  ;;  %v7286_v58 = vadd.f32 %v2379_v17, %v8419_v25 }
 0x3a5   : > { %v7283_v28 = vadd.f32 %v2390_v8, %v8417_v31  ;;  %8424 = vst [vmem:[#allocation69_spill] sm:$0xff] %v7292_v19  ;;  %v8433_v8 = vld [vmem:[#allocation37_spill] sm:$0xff] }
 0x3a6   : > { %8420 = vst [vmem:[#allocation75_spill] sm:$0xff] %v7286_v58  ;;  %v7289_v30 = vadd.f32 %v2382_v18, %v8421_v45  ;;  %v8435_v18 = vld [vmem:[#allocation38_spill] sm:$0xff] }
 0x3a7   : > { %8418 = vst [vmem:[#allocation64_spill] sm:$0xff] %v7283_v28  ;;  %v2496_v53 = vpack.c.bf16 %v7283_v28, %v7292_v19 }
 0x3a8   : > { %8422 = vst [vmem:[#allocation68_spill] sm:$0xff] %v7289_v30  ;;  %v2495_v47 = vpack.c.bf16 %v7289_v30, %v7286_v58 }
 0x3aa   : > { %4484 = vmatprep.mubr.bf16.mxu1 %v2495_v47  ;;  %4532 = vmatprep.mubr.bf16.mxu0 %v2495_v47 }
 0x3ab   : > { %4485 = vmatmul.mubr.bf16.gmra.mrb[44].mxu1 %v2496_v53  ;;  %4533 = vmatmul.mubr.bf16.gmra.mrb[76].mxu0 %v2496_v53  ;;  %v8437_v53 = vld [vmem:[#allocation39_spill] sm:$0xff] }
 0x3b7   : > { %v4442_v15 = vpop.f32.mrb[48].mxu0 }
 0x3b8   : > { %v2394_v51 = vpop.f32.mrb[49].mxu0  ;;  %v2403_v10 = vadd.f32 %v4442_v15, %v7210_v32 }
 0x3b9   : > { %v2395_v54 = vadd.f32 %v7210_v32, %v2394_v51  ;;  %v4443_v11 = vpop.f32.mrb[50].mxu0  ;;  %v8439_v51 = vld [vmem:[#allocation40_spill] sm:$0xff] }
 0x3ba   : > { %v2406_v61 = vadd.f32 %v4443_v11, %v7210_v32  ;;  %v2397_v14 = vpop.f32.mrb[51].mxu0  ;;  %v7312_v42 = vadd.f32 %v2403_v10, %v8431_v60 }
 0x3bb   : > { %v2398_v56 = vadd.f32 %v7210_v32, %v2397_v14  ;;  %v7306_v48 = vadd.f32 %v2395_v54, %v8427_v20 }
 0x3bc   : > { %v7303_v33 = vadd.f32 %v2406_v61, %v8425_v23  ;;  %8432 = vst [vmem:[#allocation67_spill] sm:$0xff] %v7312_v42  ;;  %v4729_v61 = vld [vmem:[%s8012_s13 + $0x10] sm:$0xff]  }
 0x3bd   : > { %8428 = vst [vmem:[#allocation80_spill] sm:$0xff] %v7306_v48  ;;  %v7309_v0 = vadd.f32 %v2398_v56, %v8429_v24  ;;  %4602 = vmatprep.subr.bf16.mxu1 %v4729_v61  ;;  %4556 = vmatprep.subr.bf16.mxu0 %v4729_v61 }
 0x3be   : > { %8426 = vst [vmem:[#allocation59_spill] sm:$0xff] %v7303_v33  ;;  %v2498_v2 = vpack.c.bf16 %v7303_v33, %v7312_v42  ;;  %4610 = vmatpush3.bf16.msra.mxu1 %v4729_v61  ;;  %4557 = vmatpush3.bf16.msra.mxu0 %v4729_v61  ;;  %v8447_v61 = vld [vmem:[#allocation44_spill] sm:$0xff] }
 0x3bf   : > { %8430 = vst [vmem:[#allocation72_spill] sm:$0xff] %v7309_v0  ;;  %v2497_v59 = vpack.c.bf16 %v7309_v0, %v7306_v48 }
 0x3c1   : > { %4488 = vmatprep.mubr.bf16.mxu1 %v2497_v59  ;;  %4536 = vmatprep.mubr.bf16.mxu0 %v2497_v59 }
 0x3c2   : > { %4489 = vmatmul.mubr.bf16.gmra.mrb[48].mxu1 %v2498_v2  ;;  %4537 = vmatmul.mubr.bf16.gmra.mrb[80].mxu0 %v2498_v2 }
 0x3cd   : > { %v4446_v4 = vpop.f32.mrb[52].mxu0 }
 0x3ce   : > { %v2410_v37 = vpop.f32.mrb[53].mxu0  ;;  %v2419_v26 = vadd.f32 %v4446_v4, %v7210_v32 }
 0x3cf   : > { %v2411_v41 = vadd.f32 %v7210_v32, %v2410_v37  ;;  %v4447_v39 = vpop.f32.mrb[54].mxu0 }
 0x3d0   : > { %v2422_v17 = vadd.f32 %v4447_v39, %v7210_v32  ;;  %v2413_v49 = vpop.f32.mrb[55].mxu0  ;;  %v7332_v54 = vadd.f32 %v2419_v26, %v8439_v51  ;;  %v8441_v26 = vld [vmem:[#allocation41_spill] sm:$0xff] }
 0x3d1   : > { %v2414_v52 = vadd.f32 %v7210_v32, %v2413_v49  ;;  %v7326_v47 = vadd.f32 %v2411_v41, %v8435_v18  ;;  %v8443_v49 = vld [vmem:[#allocation42_spill] sm:$0xff] }
 0x3d2   : > { %v7323_v50 = vadd.f32 %v2422_v17, %v8433_v8  ;;  %8440 = vst [vmem:[#allocation66_spill] sm:$0xff] %v7332_v54 }
 0x3d3   : > { %8436 = vst [vmem:[#allocation63_spill] sm:$0xff] %v7326_v47  ;;  %v7329_v15 = vadd.f32 %v2414_v52, %v8437_v53 }
 0x3d4   : > { %8434 = vst [vmem:[#allocation58_spill] sm:$0xff] %v7323_v50  ;;  %v2500_v10 = vpack.c.bf16 %v7323_v50, %v7332_v54 }
 0x3d5   : > { %8438 = vst [vmem:[#allocation73_spill] sm:$0xff] %v7329_v15  ;;  %v2499_v11 = vpack.c.bf16 %v7329_v15, %v7326_v47 }
 0x3d7   : > { %4492 = vmatprep.mubr.bf16.mxu1 %v2499_v11  ;;  %4540 = vmatprep.mubr.bf16.mxu0 %v2499_v11  ;;  %v8445_v11 = vld [vmem:[#allocation43_spill] sm:$0xff] }
 0x3d8   : > { %4493 = vmatmul.mubr.bf16.gmra.mrb[52].mxu1 %v2500_v10  ;;  %4541 = vmatmul.mubr.bf16.gmra.mrb[84].mxu0 %v2500_v10 }
 0x3e5   : > { %v4450_v14 = vpop.f32.mrb[56].mxu0 }
 0x3e6   : > { %v2426_v56 = vpop.f32.mrb[57].mxu0  ;;  %v2435_v4 = vadd.f32 %v4450_v14, %v7210_v32 }
 0x3e7   : > { %v2427_v59 = vadd.f32 %v7210_v32, %v2426_v56  ;;  %v4451_v2 = vpop.f32.mrb[58].mxu0 }
 0x3e8   : > { %v2438_v37 = vadd.f32 %v4451_v2, %v7210_v32  ;;  %v2429_v41 = vpop.f32.mrb[59].mxu0  ;;  %v7355_v53 = vadd.f32 %v2435_v4, %v8447_v61 }
 0x3e9   : > { %v2430_v39 = vadd.f32 %v7210_v32, %v2429_v41  ;;  %v7349_v52 = vadd.f32 %v2427_v59, %v8443_v49 }
 0x3ea   : > { %v7346_v17 = vadd.f32 %v2438_v37, %v8441_v26  ;;  %8448 = vst [vmem:[#allocation81_spill] sm:$0xff] %v7355_v53 }
 0x3eb   : > { %8444 = vst [vmem:[#allocation70_spill] sm:$0xff] %v7349_v52  ;;  %v7352_v10 = vadd.f32 %v2430_v39, %v8445_v11 }
 0x3ec   : > { %8442 = vst [vmem:[#allocation78_spill] sm:$0xff] %v7346_v17  ;;  %v2502_v56 = vpack.c.bf16 %v7346_v17, %v7355_v53  ;;  %v8451_v17 = vld [vmem:[#allocation46_spill] sm:$0xff] }
 0x3ed   : > { %8446 = vst [vmem:[#allocation76_spill] sm:$0xff] %v7352_v10  ;;  %v2501_v14 = vpack.c.bf16 %v7352_v10, %v7349_v52  ;;  %v8449_v10 = vld [vmem:[#allocation45_spill] sm:$0xff]  ;;  %v8455_v52 = vld [vmem:[#allocation48_spill] sm:$0xff] }
 0x3ef   : > { %4496 = vmatprep.mubr.bf16.mxu1 %v2501_v14  ;;  %4544 = vmatprep.mubr.bf16.mxu0 %v2501_v14  ;;  %v8453_v14 = vld [vmem:[#allocation47_spill] sm:$0xff] }
 0x3f0   : > { %4497 = vmatmul.mubr.bf16.gmra.mrb[56].mxu1 %v2502_v56  ;;  %4545 = vmatmul.mubr.bf16.gmra.mrb[88].mxu0 %v2502_v56 }
 0x3f1   : > { %v4454_v2 = vpop.f32.mrb[60].mxu0 }
 0x3f2   : > { %v2442_v37 = vpop.f32.mrb[61].mxu0  ;;  %v2451_v39 = vadd.f32 %v4454_v2, %v7210_v32 }
 0x3f3   : > { %v2443_v59 = vadd.f32 %v7210_v32, %v2442_v37  ;;  %v4455_v41 = vpop.f32.mrb[62].mxu0 }
 0x3f4   : > { %v2454_v4 = vadd.f32 %v4455_v41, %v7210_v32  ;;  %v2445_v11 = vpop.f32.mrb[63].mxu0  ;;  %v7375_v53 = vadd.f32 %v2451_v39, %v8455_v52  ;;  %v7398_v41 = vld [vmem:[%s8011_s12] ss:$0 sm:$0xff] }
 0x3f5   : > { %v2446_v26 = vadd.f32 %v7210_v32, %v2445_v11  ;;  %v7369_v61 = vadd.f32 %v2443_v59, %v8451_v17  ;;  %v4730_v32 = vld [vmem:[%s8012_s13 + $0x18] sm:$0xff]   ;;  %v4732_v11 = vld [vmem:[%s8012_s13 + $0x28] sm:$0xff]   ;;  %v7393_v59 = vld [vmem:[%s8009_s10] ss:$0 sm:$0xff] }
 0x3f6   : > { %v7366_v49 = vadd.f32 %v2454_v4, %v8449_v10  ;;  %8456 = vst [vmem:[#allocation77_spill] sm:$0xff] %v7375_v53  ;;  %4603 = vmatprep.subr.bf16.mxu1 %v4730_v32  ;;  %4558 = vmatprep.subr.bf16.mxu0 %v4730_v32  ;;  %v4733_v17 = vld [vmem:[%s8012_s13 + $0x30] sm:$0xff]  }
 0x3f7   : > { %8452 = vst [vmem:[#allocation79_spill] sm:$0xff] %v7369_v61  ;;  %v7372_v56 = vadd.f32 %v2446_v26, %v8453_v14  ;;  %4611 = vmatpush3.bf16.msra.mxu1 %v4730_v32  ;;  %4559 = vmatpush3.bf16.msra.mxu0 %v4730_v32  ;;  %v4731_v26 = vld [vmem:[%s8012_s13 + $0x20] sm:$0xff]  }
 0x3f8   : > { %8450 = vst [vmem:[#allocation71_spill] sm:$0xff] %v7366_v49  ;;  %v2504_v37 = vpack.c.bf16 %v7366_v49, %v7375_v53  ;;  %4604 = vmatprep.subr.bf16.mxu1 %v4731_v26  ;;  %4560 = vmatprep.subr.bf16.mxu0 %v4731_v26 }
 0x3f9   : > { %8454 = vst [vmem:[#allocation84_spill] sm:$0xff] %v7372_v56  ;;  %v2503_v2 = vpack.c.bf16 %v7372_v56, %v7369_v61 }
 0x3fb   : > { %4500 = vmatprep.mubr.bf16.mxu1 %v2503_v2  ;;  %4548 = vmatprep.mubr.bf16.mxu0 %v2503_v2 }
 0x3fc   : > { %4501 = vmatmul.mubr.bf16.gmra.mrb[60].mxu1 %v2504_v37  ;;  %4549 = vmatmul.mubr.bf16.gmra.mrb[92].mxu0 %v2504_v37 }
 0x3fd   : > { %4612 = vmatpush3.bf16.msra.mxu1 %v4731_v26  ;;  %4561 = vmatpush3.bf16.msra.mxu0 %v4731_v26 }
 0x3fe   : > { %4605 = vmatprep.subr.bf16.mxu1 %v4732_v11  ;;  %4562 = vmatprep.subr.bf16.mxu0 %v4732_v11 }
 0x401   : > { %4613 = vmatpush3.bf16.msra.mxu1 %v4732_v11  ;;  %4563 = vmatpush3.bf16.msra.mxu0 %v4732_v11 }
 0x402   : > { %4606 = vmatprep.subr.bf16.mxu1 %v4733_v17  ;;  %4564 = vmatprep.subr.bf16.mxu0 %v4733_v17 }
 0x405   : > { %4614 = vmatpush3.bf16.msra.mxu1 %v4733_v17  ;;  %4565 = vmatpush3.bf16.msra.mxu0 %v4733_v17 }
 0x430   : > { %v4474_v39 = vpop.f32.mrb[32].mxu1  ;;  %v4522_v4 = vpop.f32.mrb[64].mxu0 }
 0x431   : > { %v7401_v2 = vadd.f32 %v4474_v39, %v7393_v59  ;;  %v7404_v37 = vadd.f32 %v4522_v4, %v7398_v41  ;;  %v2610_v32 = vpop.f32.mrb[33].mxu1  ;;  %v3098_v26 = vpop.f32.mrb[65].mxu0 }
 0x432   : > { %v7407_v11 = vadd.f32 %v7393_v59, %v2610_v32  ;;  %v7410_v14 = vadd.f32 %v7398_v41, %v3098_v26  ;;  %v4475_v10 = vpop.f32.mrb[34].mxu1  ;;  %v4523_v56 = vpop.f32.mrb[66].mxu0 }
 0x433   : > { %v4101_v39 = vmul.f32 -4.0, %v7401_v2  ;;  %v4142_v49 = vmul.f32 -4.0, %v7404_v37  ;;  %v7418_v4 = vadd.f32 %v4475_v10, %v7393_v59  ;;  %v7421_v52 = vadd.f32 %v4523_v56, %v7398_v41  ;;  %v2613_v32 = vpop.f32.mrb[35].mxu1  ;;  %v3101_v61 = vpop.f32.mrb[67].mxu0 }
 0x434   : > { %v4099_v26 = vmul.f32 -4.0, %v7407_v11  ;;  %v4140_v53 = vmul.f32 -4.0, %v7410_v14  ;;  %v7426_v8 = vadd.f32 %v7393_v59, %v2613_v32  ;;  %v7429_v15 = vadd.f32 %v7398_v41, %v3101_v61 }
 0x435   : > { %v2805_v18 = vmul.f32 1.442695, %v4101_v39  ;;  %v3293_v10 = vmul.f32 1.442695, %v4142_v49  ;;  %v4102_v50 = vmul.f32 -4.0, %v7418_v4  ;;  %v4143_v56 = vmul.f32 -4.0, %v7421_v52 }
 0x436   : > { %v2801_v51 = vmul.f32 1.442695, %v4099_v26  ;;  %v3289_v47 = vmul.f32 1.442695, %v4140_v53  ;;  %v4100_v54 = vmul.f32 -4.0, %v7426_v8  ;;  %v4141_v32 = vmul.f32 -4.0, %v7429_v15 }
 0x437   : > { %4863 = vpow2.f32 %v2805_v18  ;;  %v2807_v24 = vmul.f32 1.442695, %v4102_v50  ;;  %v3295_v61 = vmul.f32 1.442695, %v4143_v56  ;;  %v4734_v49 = vld [vmem:[%s8012_s13 + $0x38] sm:$0xff]  }
 0x438   : > { %4865 = vpow2.f32 %v3293_v10  ;;  %v2803_v39 = vmul.f32 1.442695, %v4100_v54  ;;  %v3291_v23 = vmul.f32 1.442695, %v4141_v32  ;;  %4566 = vmatprep.subr.bf16.mxu0 %v4734_v49  ;;  %4607 = vmatprep.subr.bf16.mxu1 %v4734_v49 }
 0x439   : > { %4867 = vpow2.f32 %v2801_v51  ;;  %4567 = vmatpush3.bf16.msra.mxu0 %v4734_v49  ;;  %4615 = vmatpush3.bf16.msra.mxu1 %v4734_v49 }
 0x43a   : > { %4869 = vpow2.f32 %v3289_v47 }
 0x43b   : > { %4871 = vpow2.f32 %v2807_v24 }
 0x43c   : > { %4873 = vpow2.f32 %v3295_v61 }
 0x43d   : > { %4875 = vpow2.f32 %v2803_v39 }
 0x43e   : > { %4877 = vpow2.f32 %v3291_v23 }
 0x441   : > { %v4864_v18 = vpop.eup %4863 }
 0x442   : > { %v4866_v50 = vpop.eup %4865  ;;  %v2867_v53 = vadd.f32 1.0, %v4864_v18 }
 0x443   : > { %v4868_v17 = vpop.eup %4867  ;;  %v3355_v26 = vadd.f32 1.0, %v4866_v50 }
 0x444   : > { %v4870_v10 = vpop.eup %4869  ;;  %4879 = vrcp.f32 %v2867_v53  ;;  %v2865_v56 = vadd.f32 1.0, %v4868_v17 }
 0x445   : > { %v4872_v51 = vpop.eup %4871  ;;  %4881 = vrcp.f32 %v3355_v26  ;;  %v3353_v47 = vadd.f32 1.0, %v4870_v10 }
 0x446   : > { %v4874_v54 = vpop.eup %4873  ;;  %4883 = vrcp.f32 %v2865_v56  ;;  %v2868_v32 = vadd.f32 1.0, %v4872_v51 }
 0x447   : > { %v4876_v24 = vpop.eup %4875  ;;  %4885 = vrcp.f32 %v3353_v47  ;;  %v3356_v49 = vadd.f32 1.0, %v4874_v54 }
 0x448   : > { %v4878_v61 = vpop.eup %4877  ;;  %4887 = vrcp.f32 %v2868_v32  ;;  %v2866_v23 = vadd.f32 1.0, %v4876_v24 }
 0x449   : > { %4889 = vrcp.f32 %v3356_v49  ;;  %v3354_v39 = vadd.f32 1.0, %v4878_v61 }
 0x44a   : > { %4891 = vrcp.f32 %v2866_v23 }
 0x44b   : > { %4893 = vrcp.f32 %v3354_v39 }
 0x44e   : > { %v4880_v18 = vpop.eup %4879 }
 0x44f   : > { %v4882_v50 = vpop.eup %4881  ;;  %v2963_v53 = vmul.f32 %v4880_v18, %v7401_v2 }
 0x450   : > { %v4884_v17 = vpop.eup %4883  ;;  %v3451_v26 = vmul.f32 %v4882_v50, %v7404_v37  ;;  %v4478_v10 = vpop.f32.mrb[36].mxu1 }
 0x451   : > { %v4526_v56 = vpop.f32.mrb[68].mxu0  ;;  %v4886_v51 = vpop.eup %4885  ;;  %v2961_v47 = vmul.f32 %v4884_v17, %v7407_v11  ;;  %v7442_v54 = vadd.f32 %v4478_v10, %v7393_v59 }
 0x452   : > { %v7445_v32 = vadd.f32 %v4526_v56, %v7398_v41  ;;  %v2626_v24 = vpop.f32.mrb[37].mxu1  ;;  %v3114_v49 = vpop.f32.mrb[69].mxu0  ;;  %v3483_v23 = vadd.f32 %v3451_v26, %v2963_v53  ;;  %v3449_v2 = vmul.f32 %v4886_v51, %v7410_v14 }
 0x453   : > { %v4888_v61 = vpop.eup %4887  ;;  %v7449_v39 = vadd.f32 %v7393_v59, %v2626_v24  ;;  %v7452_v37 = vadd.f32 %v7398_v41, %v3114_v49  ;;  %v4479_v18 = vpop.f32.mrb[38].mxu1  ;;  %v4105_v10 = vmul.f32 -4.0, %v7442_v54 }
 0x454   : > { %v4527_v11 = vpop.f32.mrb[70].mxu0  ;;  %v4890_v50 = vpop.eup %4889  ;;  %v2964_v17 = vmul.f32 %v4888_v61, %v7418_v4  ;;  %v4146_v56 = vmul.f32 -4.0, %v7445_v32  ;;  %v7458_v0 = vadd.f32 %v4479_v18, %v7393_v59  ;;  %v3481_v51 = vadd.f32 %v3449_v2, %v2961_v47 }
 0x455   : > { %v2629_v53 = vpop.f32.mrb[39].mxu1  ;;  %v3117_v14 = vpop.f32.mrb[71].mxu0  ;;  %v3452_v24 = vmul.f32 %v4890_v50, %v7421_v52  ;;  %v4103_v49 = vmul.f32 -4.0, %v7449_v39  ;;  %v4144_v20 = vmul.f32 -4.0, %v7452_v37  ;;  %v2813_v61 = vmul.f32 1.442695, %v4105_v10 }
 0x456   : > { %v4892_v26 = vpop.eup %4891  ;;  %v3301_v60 = vmul.f32 1.442695, %v4146_v56  ;;  %v4106_v48 = vmul.f32 -4.0, %v7458_v0  ;;  %v7467_v52 = vadd.f32 %v4527_v11, %v7398_v41  ;;  %v7470_v2 = vadd.f32 %v7393_v59, %v2629_v53 }
 0x457   : > { %v4894_v33 = vpop.eup %4893  ;;  %v2962_v4 = vmul.f32 %v4892_v26, %v7426_v8  ;;  %v3484_v42 = vadd.f32 %v3452_v24, %v2964_v17  ;;  %v2809_v45 = vmul.f32 1.442695, %v4103_v49  ;;  %v3297_v31 = vmul.f32 1.442695, %v4144_v20 }
 0x458   : > { %v3450_v18 = vmul.f32 %v4894_v33, %v7429_v15  ;;  %4895 = vpow2.f32 %v2813_v61  ;;  %v2815_v47 = vmul.f32 1.442695, %v4106_v48  ;;  %v7473_v8 = vadd.f32 %v7398_v41, %v3117_v14 }
 0x459   : > { %v3514_v50 = vpack.c.bf16 %v3484_v42, %v3483_v23  ;;  %4897 = vpow2.f32 %v3301_v60  ;;  %v4147_v17 = vmul.f32 -4.0, %v7467_v52  ;;  %v4104_v33 = vmul.f32 -4.0, %v7470_v2 }
 0x45a   : > { %v3482_v30 = vadd.f32 %v3450_v18, %v2962_v4  ;;  %4899 = vpow2.f32 %v2809_v45  ;;  %v4145_v20 = vmul.f32 -4.0, %v7473_v8 }
 0x45b   : > { %4901 = vpow2.f32 %v3297_v31  ;;  %v3303_v15 = vmul.f32 1.442695, %v4147_v17  ;;  %v2811_v11 = vmul.f32 1.442695, %v4104_v33 }
 0x45c   : > { %v3513_v48 = vpack.c.bf16 %v3482_v30, %v3481_v51  ;;  %4903 = vpow2.f32 %v2815_v47  ;;  %v3299_v10 = vmul.f32 1.442695, %v4145_v20 }
 0x45d   : > { %4905 = vpow2.f32 %v3303_v15 }
 0x45e   : > { %4568 = vmatprep.mubr.bf16.mxu0 %v3513_v48  ;;  %4907 = vpow2.f32 %v2811_v11 }
 0x45f   : > { %4569 = vmatmul.mubr.bf16.vlgmr.msra.gmra.mrb[96].mxu0 %v3514_v50  ;;  %4909 = vpow2.f32 %v3299_v10 }
 0x462   : > { %v4896_v60 = vpop.eup %4895 }
 0x463   : > { %v4898_v42 = vpop.eup %4897  ;;  %v2871_v45 = vadd.f32 1.0, %v4896_v60 }
 0x464   : > { %v4900_v23 = vpop.eup %4899  ;;  %v3359_v56 = vadd.f32 1.0, %v4898_v42 }
 0x465   : > { %v4902_v53 = vpop.eup %4901  ;;  %4911 = vrcp.f32 %v2871_v45  ;;  %v2869_v31 = vadd.f32 1.0, %v4900_v23 }
 0x466   : > { %v4904_v14 = vpop.eup %4903  ;;  %4913 = vrcp.f32 %v3359_v56  ;;  %v3357_v30 = vadd.f32 1.0, %v4902_v53 }
 0x467   : > { %4915 = vrcp.f32 %v2869_v31  ;;  %v2872_v26 = vadd.f32 1.0, %v4904_v14  ;;  %v4906_v49 = vpop.eup %4905 }
 0x468   : > { %v4482_v51 = vpop.f32.mrb[40].mxu1  ;;  %v4530_v24 = vpop.f32.mrb[72].mxu0  ;;  %4917 = vrcp.f32 %v3357_v30  ;;  %v3360_v17 = vadd.f32 1.0, %v4906_v49 }
 0x469   : > { %v7479_v4 = vadd.f32 %v4482_v51, %v7393_v59  ;;  %v7482_v61 = vadd.f32 %v4530_v24, %v7398_v41  ;;  %v2642_v18 = vpop.f32.mrb[41].mxu1  ;;  %v3130_v47 = vpop.f32.mrb[73].mxu0  ;;  %4919 = vrcp.f32 %v2872_v26 }
 0x46a   : > { %v4908_v50 = vpop.eup %4907  ;;  %v7485_v33 = vadd.f32 %v7393_v59, %v2642_v18  ;;  %v7488_v20 = vadd.f32 %v7398_v41, %v3130_v47  ;;  %v4483_v48 = vpop.f32.mrb[42].mxu1  ;;  %4921 = vrcp.f32 %v3360_v17 }
 0x46b   : > { %v4531_v15 = vpop.f32.mrb[74].mxu0  ;;  %v4910_v11 = vpop.eup %4909  ;;  %v2870_v10 = vadd.f32 1.0, %v4908_v50  ;;  %v4109_v60 = vmul.f32 -4.0, %v7479_v4  ;;  %v4150_v42 = vmul.f32 -4.0, %v7482_v61  ;;  %v7493_v45 = vadd.f32 %v4483_v48, %v7393_v59 }
 0x46c   : > { %v2645_v23 = vpop.f32.mrb[43].mxu1  ;;  %v3133_v56 = vpop.f32.mrb[75].mxu0  ;;  %v3358_v53 = vadd.f32 1.0, %v4910_v11  ;;  %v4107_v31 = vmul.f32 -4.0, %v7485_v33  ;;  %v4148_v14 = vmul.f32 -4.0, %v7488_v20  ;;  %v7499_v18 = vadd.f32 %v4531_v15, %v7398_v41 }
 0x46d   : > { %4923 = vrcp.f32 %v2870_v10  ;;  %v2821_v30 = vmul.f32 1.442695, %v4109_v60  ;;  %v3309_v26 = vmul.f32 1.442695, %v4150_v42  ;;  %v4110_v51 = vmul.f32 -4.0, %v7493_v45 }
 0x46e   : > { %4925 = vrcp.f32 %v3358_v53  ;;  %v2817_v24 = vmul.f32 1.442695, %v4107_v31  ;;  %v3305_v49 = vmul.f32 1.442695, %v4148_v14  ;;  %v7502_v50 = vadd.f32 %v7393_v59, %v2645_v23 }
 0x46f   : > { %4927 = vpow2.f32 %v2821_v30  ;;  %v2823_v47 = vmul.f32 1.442695, %v4110_v51  ;;  %v7505_v17 = vadd.f32 %v7398_v41, %v3133_v56  ;;  %v4912_v48 = vpop.eup %4911  ;;  %v4151_v11 = vmul.f32 -4.0, %v7499_v18 }
 0x470   : > { %4929 = vpow2.f32 %v3309_v26  ;;  %v4914_v10 = vpop.eup %4913  ;;  %v2967_v60 = vmul.f32 %v4912_v48, %v7442_v54  ;;  %v4108_v42 = vmul.f32 -4.0, %v7502_v50 }
 0x471   : > { %4931 = vpow2.f32 %v2817_v24  ;;  %v4149_v15 = vmul.f32 -4.0, %v7505_v17  ;;  %v4916_v53 = vpop.eup %4915  ;;  %v3455_v31 = vmul.f32 %v4914_v10, %v7445_v32  ;;  %v3311_v23 = vmul.f32 1.442695, %v4151_v11 }
 0x472   : > { %4933 = vpow2.f32 %v3305_v49  ;;  %v4918_v14 = vpop.eup %4917  ;;  %v2965_v56 = vmul.f32 %v4916_v53, %v7449_v39  ;;  %v2819_v30 = vmul.f32 1.442695, %v4108_v42 }
 0x473   : > { %4935 = vpow2.f32 %v2823_v47  ;;  %v3307_v26 = vmul.f32 1.442695, %v4149_v15  ;;  %v4920_v51 = vpop.eup %4919  ;;  %v7513_v25 = vadd.f32 %v3455_v31, %v2967_v60  ;;  %v3453_v54 = vmul.f32 %v4918_v14, %v7452_v37 }
 0x474   : > { %4937 = vpow2.f32 %v3311_v23  ;;  %v2968_v24 = vmul.f32 %v4920_v51, %v7458_v0  ;;  %v4922_v48 = vpop.eup %4921 }
 0x475   : > { %4939 = vpow2.f32 %v2819_v30  ;;  %v7517_v28 = vadd.f32 %v3453_v54, %v2965_v56  ;;  %v3456_v49 = vmul.f32 %v4922_v48, %v7467_v52 }
 0x476   : > { %4941 = vpow2.f32 %v3307_v26 }
 0x477   : > { %v4924_v32 = vpop.eup %4923  ;;  %v7521_v10 = vadd.f32 %v3456_v49, %v2968_v24 }
 0x478   : > { %v4926_v39 = vpop.eup %4925  ;;  %v2966_v47 = vmul.f32 %v4924_v32, %v7470_v2 }
 0x479   : > { %v4928_v11 = vpop.eup %4927  ;;  %v3454_v60 = vmul.f32 %v4926_v39, %v7473_v8  ;;  %v3516_v0 = vpack.c.bf16 %v7521_v10, %v7513_v25 }
 0x47a   : > { %v4930_v37 = vpop.eup %4929  ;;  %v2875_v42 = vadd.f32 1.0, %v4928_v11 }
 0x47b   : > { %v4932_v15 = vpop.eup %4931  ;;  %v3486_v53 = vadd.f32 %v3454_v60, %v2966_v47  ;;  %v3363_v31 = vadd.f32 1.0, %v4930_v37 }
 0x47c   : > { %v4934_v23 = vpop.eup %4933  ;;  %4943 = vrcp.f32 %v2875_v42  ;;  %v2873_v14 = vadd.f32 1.0, %v4932_v15 }
 0x47d   : > { %v4936_v30 = vpop.eup %4935  ;;  %4945 = vrcp.f32 %v3363_v31  ;;  %v3361_v2 = vadd.f32 1.0, %v4934_v23 }
 0x47e   : > { %v4486_v52 = vpop.f32.mrb[44].mxu1  ;;  %v4534_v56 = vpop.f32.mrb[76].mxu0  ;;  %4947 = vrcp.f32 %v2873_v14  ;;  %v2876_v25 = vadd.f32 1.0, %v4936_v30 }
 0x47f   : > { %v7527_v26 = vadd.f32 %v4486_v52, %v7393_v59  ;;  %v7530_v8 = vadd.f32 %v4534_v56, %v7398_v41  ;;  %v2658_v51 = vpop.f32.mrb[45].mxu1  ;;  %v3146_v54 = vpop.f32.mrb[77].mxu0  ;;  %4949 = vrcp.f32 %v3361_v2 }
 0x480   : > { %v4938_v24 = vpop.eup %4937  ;;  %v7533_v48 = vadd.f32 %v7393_v59, %v2658_v51  ;;  %v7536_v32 = vadd.f32 %v7398_v41, %v3146_v54  ;;  %v4487_v49 = vpop.f32.mrb[46].mxu1  ;;  %4951 = vrcp.f32 %v2876_v25 }
 0x481   : > { %v4535_v39 = vpop.f32.mrb[78].mxu0  ;;  %v4940_v47 = vpop.eup %4939  ;;  %v3364_v11 = vadd.f32 1.0, %v4938_v24  ;;  %v4113_v10 = vmul.f32 -4.0, %v7527_v26  ;;  %v4154_v60 = vmul.f32 -4.0, %v7530_v8  ;;  %v7543_v54 = vadd.f32 %v4487_v49, %v7393_v59 }
 0x482   : > { %v2661_v37 = vpop.f32.mrb[47].mxu1  ;;  %v3149_v42 = vpop.f32.mrb[79].mxu0  ;;  %v2874_v31 = vadd.f32 1.0, %v4940_v47  ;;  %v4111_v23 = vmul.f32 -4.0, %v7533_v48  ;;  %v4152_v14 = vmul.f32 -4.0, %v7536_v32  ;;  %v7546_v24 = vadd.f32 %v4535_v39, %v7398_v41 }
 0x483   : > { %v4942_v15 = vpop.eup %4941  ;;  %4953 = vrcp.f32 %v3364_v11  ;;  %v2829_v56 = vmul.f32 1.442695, %v4113_v10  ;;  %v3317_v30 = vmul.f32 1.442695, %v4154_v60  ;;  %v7549_v25 = vadd.f32 %v7393_v59, %v2661_v37 }
 0x484   : > { %v3362_v52 = vadd.f32 1.0, %v4942_v15  ;;  %4955 = vrcp.f32 %v2874_v31  ;;  %v2825_v2 = vmul.f32 1.442695, %v4111_v23  ;;  %v3313_v51 = vmul.f32 1.442695, %v4152_v14 }
 0x485   : > { %v7552_v47 = vadd.f32 %v7398_v41, %v3149_v42  ;;  %v4114_v11 = vmul.f32 -4.0, %v7543_v54  ;;  %v3515_v10 = vpack.c.bf16 %v3486_v53, %v7517_v28  ;;  %v4155_v60 = vmul.f32 -4.0, %v7546_v24 }
 0x486   : > { %4957 = vrcp.f32 %v3362_v52  ;;  %v4112_v49 = vmul.f32 -4.0, %v7549_v25  ;;  %v4944_v39 = vpop.eup %4943 }
 0x487   : > { %4959 = vpow2.f32 %v2829_v56  ;;  %v4153_v15 = vmul.f32 -4.0, %v7552_v47  ;;  %v2831_v31 = vmul.f32 1.442695, %v4114_v11  ;;  %4572 = vmatprep.mubr.bf16.mxu1 %v3515_v10  ;;  %v4946_v37 = vpop.eup %4945  ;;  %v2971_v42 = vmul.f32 %v4944_v39, %v7479_v4 }
 0x488   : > { %4961 = vpow2.f32 %v3317_v30  ;;  %v3319_v23 = vmul.f32 1.442695, %v4155_v60  ;;  %v2827_v14 = vmul.f32 1.442695, %v4112_v49  ;;  %4573 = vmatmul.mubr.bf16.vlgmr.msra.gmra.mrb[64].mxu1 %v3516_v0  ;;  %v4948_v52 = vpop.eup %4947  ;;  %v3459_v28 = vmul.f32 %v4946_v37, %v7482_v61 }
 0x489   : > { %4963 = vpow2.f32 %v2825_v2  ;;  %v3315_v53 = vmul.f32 1.442695, %v4153_v15  ;;  %v4950_v56 = vpop.eup %4949  ;;  %v2969_v30 = vmul.f32 %v4948_v52, %v7485_v33 }
 0x48a   : > { %4965 = vpow2.f32 %v3313_v51  ;;  %v4952_v16 = vpop.eup %4951  ;;  %v7562_v2 = vadd.f32 %v3459_v28, %v2971_v42  ;;  %v3457_v11 = vmul.f32 %v4950_v56, %v7488_v20 }
 0x48b   : > { %4967 = vpow2.f32 %v2831_v31  ;;  %v2972_v51 = vmul.f32 %v4952_v16, %v7493_v45 }
 0x48c   : > { %4969 = vpow2.f32 %v3319_v23  ;;  %v7566_v10 = vadd.f32 %v3457_v11, %v2969_v30 }
 0x48d   : > { %4971 = vpow2.f32 %v2827_v14  ;;  %v4954_v4 = vpop.eup %4953 }
 0x48e   : > { %4973 = vpow2.f32 %v3315_v53  ;;  %v4956_v0 = vpop.eup %4955  ;;  %v3460_v61 = vmul.f32 %v4954_v4, %v7499_v18 }
 0x48f   : > { %v2970_v49 = vmul.f32 %v4956_v0, %v7502_v50 }
 0x490   : > { %v4958_v60 = vpop.eup %4957  ;;  %v7570_v15 = vadd.f32 %v3460_v61, %v2972_v51 }
 0x491   : > { %v4960_v33 = vpop.eup %4959  ;;  %v3458_v39 = vmul.f32 %v4958_v60, %v7505_v17 }
 0x492   : > { %v4962_v31 = vpop.eup %4961  ;;  %v2879_v20 = vadd.f32 1.0, %v4960_v33  ;;  %v3518_v16 = vpack.c.bf16 %v7570_v15, %v7562_v2 }
 0x493   : > { %v4964_v37 = vpop.eup %4963  ;;  %v3490_v42 = vadd.f32 %v3458_v39, %v2970_v49  ;;  %v3367_v23 = vadd.f32 1.0, %v4962_v31 }
 0x494   : > { %v4966_v45 = vpop.eup %4965  ;;  %4975 = vrcp.f32 %v2879_v20  ;;  %v2877_v14 = vadd.f32 1.0, %v4964_v37 }
 0x495   : > { %v4490_v18 = vpop.f32.mrb[48].mxu1  ;;  %v4538_v52 = vpop.f32.mrb[80].mxu0  ;;  %4977 = vrcp.f32 %v3367_v23  ;;  %v3365_v50 = vadd.f32 1.0, %v4966_v45 }
 0x496   : > { %v4968_v28 = vpop.eup %4967  ;;  %v7576_v53 = vadd.f32 %v4490_v18, %v7393_v59  ;;  %v7579_v17 = vadd.f32 %v4538_v52, %v7398_v41  ;;  %v2674_v56 = vpop.f32.mrb[49].mxu1  ;;  %4979 = vrcp.f32 %v2877_v14 }
 0x497   : > { %v3162_v30 = vpop.f32.mrb[81].mxu0  ;;  %v4970_v11 = vpop.eup %4969  ;;  %v2880_v4 = vadd.f32 1.0, %v4968_v28  ;;  %v7582_v2 = vadd.f32 %v7393_v59, %v2674_v56  ;;  %4981 = vrcp.f32 %v3365_v50 }
 0x498   : > { %v7585_v51 = vadd.f32 %v7398_v41, %v3162_v30  ;;  %v4491_v0 = vpop.f32.mrb[50].mxu1  ;;  %v4539_v61 = vpop.f32.mrb[82].mxu0  ;;  %v3368_v49 = vadd.f32 1.0, %v4970_v11  ;;  %v4117_v33 = vmul.f32 -4.0, %v7576_v53  ;;  %v4158_v15 = vmul.f32 -4.0, %v7579_v17 }
 0x499   : > { %v4972_v60 = vpop.eup %4971  ;;  %v2677_v39 = vpop.f32.mrb[51].mxu1  ;;  %4983 = vrcp.f32 %v2880_v4  ;;  %v4115_v23 = vmul.f32 -4.0, %v7582_v2  ;;  %v7592_v56 = vadd.f32 %v4491_v0, %v7393_v59  ;;  %v7595_v30 = vadd.f32 %v4539_v61, %v7398_v41 }
 0x49a   : > { %v3165_v31 = vpop.f32.mrb[83].mxu0  ;;  %v4974_v20 = vpop.eup %4973  ;;  %v2878_v37 = vadd.f32 1.0, %v4972_v60  ;;  %v4156_v45 = vmul.f32 -4.0, %v7585_v51  ;;  %4985 = vrcp.f32 %v3368_v49  ;;  %v2837_v18 = vmul.f32 1.442695, %v4117_v33 }
 0x49b   : > { %v3366_v14 = vadd.f32 1.0, %v4974_v20  ;;  %v3325_v52 = vmul.f32 1.442695, %v4158_v15  ;;  %v2833_v28 = vmul.f32 1.442695, %v4115_v23  ;;  %v7598_v11 = vadd.f32 %v7393_v59, %v2677_v39 }
 0x49c   : > { %4987 = vrcp.f32 %v2878_v37  ;;  %v3321_v50 = vmul.f32 1.442695, %v4156_v45  ;;  %v7601_v4 = vadd.f32 %v7398_v41, %v3165_v31  ;;  %v4118_v60 = vmul.f32 -4.0, %v7592_v56 }
 0x49d   : > { %4989 = vrcp.f32 %v3366_v14  ;;  %v3517_v49 = vpack.c.bf16 %v3490_v42, %v7566_v10  ;;  %v4159_v33 = vmul.f32 -4.0, %v7595_v30  ;;  %v4116_v0 = vmul.f32 -4.0, %v7598_v11 }
 0x49e   : > { %4991 = vpow2.f32 %v2837_v18  ;;  %v4157_v15 = vmul.f32 -4.0, %v7601_v4  ;;  %v4976_v61 = vpop.eup %4975  ;;  %v2839_v20 = vmul.f32 1.442695, %v4118_v60 }
 0x49f   : > { %4993 = vpow2.f32 %v3325_v52  ;;  %4576 = vmatprep.mubr.bf16.mxu1 %v3517_v49  ;;  %v4978_v39 = vpop.eup %4977  ;;  %v2975_v31 = vmul.f32 %v4976_v61, %v7527_v26  ;;  %v3327_v37 = vmul.f32 1.442695, %v4159_v33  ;;  %v2835_v23 = vmul.f32 1.442695, %v4116_v0 }
 0x4a0   : > { %4995 = vpow2.f32 %v2833_v28  ;;  %4577 = vmatmul.mubr.bf16.gmra.mrb[68].mxu1 %v3518_v16  ;;  %v4980_v45 = vpop.eup %4979  ;;  %v3463_v10 = vmul.f32 %v4978_v39, %v7530_v8  ;;  %v3323_v42 = vmul.f32 1.442695, %v4157_v15 }
 0x4a1   : > { %4997 = vpow2.f32 %v3321_v50  ;;  %v4982_v14 = vpop.eup %4981  ;;  %v2973_v18 = vmul.f32 %v4980_v45, %v7533_v48 }
 0x4a2   : > { %4999 = vpow2.f32 %v2839_v20  ;;  %v7611_v28 = vadd.f32 %v3463_v10, %v2975_v31  ;;  %v3461_v60 = vmul.f32 %v4982_v14, %v7536_v32 }
 0x4a3   : > { %5001 = vpow2.f32 %v3327_v37  ;;  %v4984_v52 = vpop.eup %4983 }
 0x4a4   : > { %5003 = vpow2.f32 %v2835_v23  ;;  %v4986_v26 = vpop.eup %4985  ;;  %v2976_v50 = vmul.f32 %v4984_v52, %v7543_v54  ;;  %v7615_v49 = vadd.f32 %v3461_v60, %v2973_v18 }
 0x4a5   : > { %5005 = vpow2.f32 %v3323_v42  ;;  %v3464_v8 = vmul.f32 %v4986_v26, %v7546_v24 }
 0x4a6   : > { %v4988_v16 = vpop.eup %4987 }
 0x4a7   : > { %v4990_v33 = vpop.eup %4989  ;;  %v2974_v0 = vmul.f32 %v4988_v16, %v7549_v25  ;;  %v7619_v15 = vadd.f32 %v3464_v8, %v2976_v50 }
 0x4a8   : > { %v4992_v48 = vpop.eup %4991  ;;  %v3462_v61 = vmul.f32 %v4990_v33, %v7552_v47 }
 0x4a9   : > { %v4994_v20 = vpop.eup %4993  ;;  %v2883_v32 = vadd.f32 1.0, %v4992_v48  ;;  %v3520_v45 = vpack.c.bf16 %v7619_v15, %v7611_v28 }
 0x4aa   : > { %v4996_v39 = vpop.eup %4995  ;;  %v3494_v31 = vadd.f32 %v3462_v61, %v2974_v0  ;;  %v3371_v37 = vadd.f32 1.0, %v4994_v20 }
 0x4ab   : > { %v4494_v54 = vpop.f32.mrb[52].mxu1  ;;  %v4542_v23 = vpop.f32.mrb[84].mxu0  ;;  %5007 = vrcp.f32 %v2883_v32  ;;  %v2881_v24 = vadd.f32 1.0, %v4996_v39 }
 0x4ac   : > { %v4998_v10 = vpop.eup %4997  ;;  %v7625_v25 = vadd.f32 %v4494_v54, %v7393_v59  ;;  %v7628_v42 = vadd.f32 %v4542_v23, %v7398_v41  ;;  %v2690_v47 = vpop.f32.mrb[53].mxu1  ;;  %5009 = vrcp.f32 %v3371_v37 }
 0x4ad   : > { %v3178_v14 = vpop.f32.mrb[85].mxu0  ;;  %v5000_v18 = vpop.eup %4999  ;;  %v3369_v52 = vadd.f32 1.0, %v4998_v10  ;;  %v7631_v60 = vadd.f32 %v7393_v59, %v2690_v47  ;;  %5011 = vrcp.f32 %v2881_v24 }
 0x4ae   : > { %v7634_v26 = vadd.f32 %v7398_v41, %v3178_v14  ;;  %v4495_v28 = vpop.f32.mrb[54].mxu1  ;;  %v4543_v50 = vpop.f32.mrb[86].mxu0  ;;  %v2884_v8 = vadd.f32 1.0, %v5000_v18  ;;  %v4121_v33 = vmul.f32 -4.0, %v7625_v25  ;;  %v4162_v0 = vmul.f32 -4.0, %v7628_v42 }
 0x4af   : > { %v5002_v16 = vpop.eup %5001  ;;  %v2693_v48 = vpop.f32.mrb[55].mxu1  ;;  %5013 = vrcp.f32 %v3369_v52  ;;  %v4119_v32 = vmul.f32 -4.0, %v7631_v60  ;;  %v7641_v14 = vadd.f32 %v4495_v28, %v7393_v59  ;;  %v7644_v18 = vadd.f32 %v4543_v50, %v7398_v41 }
 0x4b0   : > { %v3181_v15 = vpop.f32.mrb[87].mxu0  ;;  %v5004_v61 = vpop.eup %5003  ;;  %v3372_v20 = vadd.f32 1.0, %v5002_v16  ;;  %v4160_v39 = vmul.f32 -4.0, %v7634_v26  ;;  %5015 = vrcp.f32 %v2884_v8  ;;  %v2845_v23 = vmul.f32 1.442695, %v4121_v33 }
 0x4b1   : > { %v5006_v37 = vpop.eup %5005  ;;  %v2882_v54 = vadd.f32 1.0, %v5004_v61  ;;  %v3333_v24 = vmul.f32 1.442695, %v4162_v0  ;;  %v2841_v47 = vmul.f32 1.442695, %v4119_v32  ;;  %v7647_v52 = vadd.f32 %v7393_v59, %v2693_v48 }
 0x4b2   : > { %5017 = vrcp.f32 %v3372_v20  ;;  %v3370_v10 = vadd.f32 1.0, %v5006_v37  ;;  %v3329_v16 = vmul.f32 1.442695, %v4160_v39  ;;  %v7650_v8 = vadd.f32 %v7398_v41, %v3181_v15 }
 0x4b3   : > { %5019 = vrcp.f32 %v2882_v54  ;;  %v3519_v33 = vpack.c.bf16 %v3494_v31, %v7615_v49  ;;  %v4122_v0 = vmul.f32 -4.0, %v7641_v14  ;;  %v4163_v61 = vmul.f32 -4.0, %v7644_v18 }
 0x4b4   : > { %5021 = vrcp.f32 %v3370_v10  ;;  %v4120_v28 = vmul.f32 -4.0, %v7647_v52  ;;  %v4161_v50 = vmul.f32 -4.0, %v7650_v8 }
 0x4b5   : > { %5023 = vpow2.f32 %v2845_v23  ;;  %4580 = vmatprep.mubr.bf16.mxu1 %v3519_v33  ;;  %v5008_v48 = vpop.eup %5007  ;;  %v2847_v20 = vmul.f32 1.442695, %v4122_v0  ;;  %v3335_v32 = vmul.f32 1.442695, %v4163_v61 }
 0x4b6   : > { %5025 = vpow2.f32 %v3333_v24  ;;  %v2843_v39 = vmul.f32 1.442695, %v4120_v28  ;;  %4581 = vmatmul.mubr.bf16.gmra.mrb[72].mxu1 %v3520_v45  ;;  %v5010_v15 = vpop.eup %5009  ;;  %v2979_v49 = vmul.f32 %v5008_v48, %v7576_v53  ;;  %v3331_v31 = vmul.f32 1.442695, %v4161_v50 }
 0x4b7   : > { %5027 = vpow2.f32 %v2841_v47  ;;  %v5012_v37 = vpop.eup %5011  ;;  %v3467_v54 = vmul.f32 %v5010_v15, %v7579_v17 }
 0x4b8   : > { %5029 = vpow2.f32 %v3329_v16  ;;  %v2977_v10 = vmul.f32 %v5012_v37, %v7582_v2 }
 0x4b9   : > { %5031 = vpow2.f32 %v2847_v20  ;;  %v5014_v23 = vpop.eup %5013  ;;  %v7660_v33 = vadd.f32 %v3467_v54, %v2979_v49 }
 0x4ba   : > { %5033 = vpow2.f32 %v3335_v32  ;;  %v5016_v24 = vpop.eup %5015  ;;  %v3465_v47 = vmul.f32 %v5014_v23, %v7585_v51 }
 0x4bb   : > { %5035 = vpow2.f32 %v2843_v39  ;;  %v2980_v0 = vmul.f32 %v5016_v24, %v7592_v56 }
 0x4bc   : > { %v5018_v45 = vpop.eup %5017  ;;  %5037 = vpow2.f32 %v3331_v31  ;;  %v7664_v16 = vadd.f32 %v3465_v47, %v2977_v10 }
 0x4bd   : > { %v5020_v53 = vpop.eup %5019  ;;  %v3468_v17 = vmul.f32 %v5018_v45, %v7595_v30 }
 0x4be   : > { %v5022_v61 = vpop.eup %5021  ;;  %v2978_v28 = vmul.f32 %v5020_v53, %v7598_v11 }
 0x4bf   : > { %v5024_v2 = vpop.eup %5023  ;;  %v7668_v50 = vadd.f32 %v3468_v17, %v2980_v0  ;;  %v3466_v48 = vmul.f32 %v5022_v61, %v7601_v4 }
 0x4c0   : > { %v5026_v20 = vpop.eup %5025  ;;  %v2887_v51 = vadd.f32 1.0, %v5024_v2 }
 0x4c1   : > { %v5028_v32 = vpop.eup %5027  ;;  %v3498_v39 = vadd.f32 %v3466_v48, %v2978_v28  ;;  %v3375_v15 = vadd.f32 1.0, %v5026_v20  ;;  %v3522_v31 = vpack.c.bf16 %v7668_v50, %v7660_v33 }
 0x4c2   : > { %v5030_v37 = vpop.eup %5029  ;;  %5039 = vrcp.f32 %v2887_v51  ;;  %v2885_v30 = vadd.f32 1.0, %v5028_v32 }
 0x4c3   : > { %v4498_v56 = vpop.f32.mrb[56].mxu1  ;;  %v4546_v49 = vpop.f32.mrb[88].mxu0  ;;  %5041 = vrcp.f32 %v3375_v15  ;;  %v3373_v24 = vadd.f32 1.0, %v5030_v37 }
 0x4c4   : > { %v7674_v11 = vadd.f32 %v4498_v56, %v7393_v59  ;;  %v7677_v54 = vadd.f32 %v4546_v49, %v7398_v41  ;;  %v2706_v4 = vpop.f32.mrb[57].mxu1  ;;  %v3194_v23 = vpop.f32.mrb[89].mxu0  ;;  %5043 = vrcp.f32 %v2885_v30  ;;  %v7692_v30 = vld [vmem:[%s8009_s10] ss:$0 sm:$0xff] }
 0x4c5   : > { %v5032_v10 = vpop.eup %5031  ;;  %v7680_v47 = vadd.f32 %v7393_v59, %v2706_v4  ;;  %v7683_v45 = vadd.f32 %v7398_v41, %v3194_v23  ;;  %v4499_v33 = vpop.f32.mrb[58].mxu1  ;;  %5045 = vrcp.f32 %v3373_v24  ;;  %v7700_v23 = vld [vmem:[%s8011_s12] ss:$0 sm:$0xff] }
 0x4c6   : > { %v4547_v0 = vpop.f32.mrb[90].mxu0  ;;  %v5034_v53 = vpop.eup %5033  ;;  %v2888_v17 = vadd.f32 1.0, %v5032_v10  ;;  %v4125_v61 = vmul.f32 -4.0, %v7674_v11  ;;  %v4166_v28 = vmul.f32 -4.0, %v7677_v54  ;;  %v7695_v4 = vadd.f32 %v7692_v30, %v4499_v33 }
 0x4c7   : > { %v2709_v2 = vpop.f32.mrb[59].mxu1  ;;  %v3197_v50 = vpop.f32.mrb[91].mxu0  ;;  %v3376_v20 = vadd.f32 1.0, %v5034_v53  ;;  %v4123_v59 = vmul.f32 -4.0, %v7680_v47  ;;  %v4164_v51 = vmul.f32 -4.0, %v7683_v45  ;;  %v7703_v10 = vadd.f32 %v7700_v23, %v4547_v0 }
 0x4c8   : > { %v5036_v48 = vpop.eup %5035  ;;  %5047 = vrcp.f32 %v2888_v17  ;;  %v2853_v15 = vmul.f32 1.442695, %v4125_v61  ;;  %v3341_v49 = vmul.f32 1.442695, %v4166_v28  ;;  %v7706_v24 = vadd.f32 %v7692_v30, %v2709_v2 }
 0x4c9   : > { %v5038_v41 = vpop.eup %5037  ;;  %v2886_v32 = vadd.f32 1.0, %v5036_v48  ;;  %5049 = vrcp.f32 %v3376_v20  ;;  %v2849_v37 = vmul.f32 1.442695, %v4123_v59  ;;  %v3337_v53 = vmul.f32 1.442695, %v4164_v51 }
 0x4ca   : > { %v3374_v56 = vadd.f32 1.0, %v5038_v41  ;;  %v7709_v17 = vadd.f32 %v7700_v23, %v3197_v50  ;;  %v3521_v61 = vpack.c.bf16 %v3498_v39, %v7664_v16  ;;  %v4126_v33 = vmul.f32 -4.0, %v7695_v4 }
 0x4cb   : > { %5051 = vrcp.f32 %v2886_v32  ;;  %v4167_v28 = vmul.f32 -4.0, %v7703_v10  ;;  %v4124_v48 = vmul.f32 -4.0, %v7706_v24 }
 0x4cc   : > { %5053 = vrcp.f32 %v3374_v56  ;;  %v4165_v0 = vmul.f32 -4.0, %v7709_v17  ;;  %4584 = vmatprep.mubr.bf16.mxu1 %v3521_v61  ;;  %v5040_v2 = vpop.eup %5039  ;;  %v2855_v20 = vmul.f32 1.442695, %v4126_v33 }
 0x4cd   : > { %5055 = vpow2.f32 %v2853_v15  ;;  %v3343_v59 = vmul.f32 1.442695, %v4167_v28  ;;  %v2851_v51 = vmul.f32 1.442695, %v4124_v48  ;;  %4585 = vmatmul.mubr.bf16.gmra.mrb[76].mxu1 %v3522_v31  ;;  %v5042_v50 = vpop.eup %5041  ;;  %v2983_v16 = vmul.f32 %v5040_v2, %v7625_v25 }
 0x4ce   : > { %5057 = vpow2.f32 %v3341_v49  ;;  %v3339_v39 = vmul.f32 1.442695, %v4165_v0  ;;  %v5044_v15 = vpop.eup %5043  ;;  %v3471_v56 = vmul.f32 %v5042_v50, %v7628_v42 }
 0x4cf   : > { %5059 = vpow2.f32 %v2849_v37  ;;  %v4502_v41 = vpop.f32.mrb[60].mxu1  ;;  %v4550_v32 = vpop.f32.mrb[92].mxu0  ;;  %v2981_v28 = vmul.f32 %v5044_v15, %v7631_v60 }
 0x4d0   : > { %5061 = vpow2.f32 %v3337_v53  ;;  %v7719_v49 = vadd.f32 %v7692_v30, %v4502_v41  ;;  %v7722_v37 = vadd.f32 %v7700_v23, %v4550_v32  ;;  %v2722_v61 = vpop.f32.mrb[61].mxu1  ;;  %v3210_v33 = vpop.f32.mrb[93].mxu0  ;;  %v3503_v42 = vadd.f32 %v3471_v56, %v2983_v16 }
 0x4d1   : > { %5063 = vpow2.f32 %v2855_v20  ;;  %v5046_v31 = vpop.eup %5045  ;;  %v7726_v25 = vadd.f32 %v7692_v30, %v2722_v61  ;;  %v4503_v53 = vpop.f32.mrb[62].mxu1  ;;  %v7736_v13 = vadd.f32 %v7700_v23, %v3210_v33 }
 0x4d2   : > { %5065 = vpow2.f32 %v3343_v59  ;;  %v4551_v48 = vpop.f32.mrb[94].mxu0  ;;  %v5048_v0 = vpop.eup %5047  ;;  %v3469_v2 = vmul.f32 %v5046_v31, %v7634_v26  ;;  %v4129_v20 = vmul.f32 -4.0, %v7719_v49  ;;  %v4170_v60 = vmul.f32 -4.0, %v7722_v37 }
 0x4d3   : > { %5067 = vpow2.f32 %v2851_v51  ;;  %v2725_v50 = vpop.f32.mrb[63].mxu1  ;;  %v3213_v41 = vpop.f32.mrb[95].mxu0  ;;  %v2984_v58 = vmul.f32 %v5048_v0, %v7641_v14  ;;  %v4127_v59 = vmul.f32 -4.0, %v7726_v25  ;;  %v7740_v0 = vadd.f32 %v7692_v30, %v4503_v53 }
 0x4d4   : > { %v5050_v32 = vpop.eup %5049  ;;  %5069 = vpow2.f32 %v3339_v39  ;;  %v3501_v61 = vadd.f32 %v3469_v2, %v2981_v28  ;;  %v2861_v16 = vmul.f32 1.442695, %v4129_v20  ;;  %v3349_v51 = vmul.f32 1.442695, %v4170_v60 }
 0x4d5   : > { %v5052_v15 = vpop.eup %5051  ;;  %v3472_v19 = vmul.f32 %v5050_v32, %v7644_v18  ;;  %v2857_v31 = vmul.f32 1.442695, %v4127_v59  ;;  %v4168_v33 = vmul.f32 -4.0, %v7736_v13 }
 0x4d6   : > { %v5054_v56 = vpop.eup %5053  ;;  %v2982_v26 = vmul.f32 %v5052_v15, %v7647_v52  ;;  %5071 = vpow2.f32 %v2861_v16  ;;  %v7748_v15 = vadd.f32 %v7692_v30, %v2725_v50 }
 0x4d7   : > { %v5056_v27 = vpop.eup %5055  ;;  %v3504_v14 = vadd.f32 %v3472_v19, %v2984_v58  ;;  %v3470_v39 = vmul.f32 %v5054_v56, %v7650_v8  ;;  %5073 = vpow2.f32 %v3349_v51  ;;  %v4130_v19 = vmul.f32 -4.0, %v7740_v0 }
 0x4d8   : > { %v5058_v28 = vpop.eup %5057  ;;  %v2891_v2 = vadd.f32 1.0, %v5056_v27  ;;  %5075 = vpow2.f32 %v2857_v31  ;;  %v7745_v8 = vadd.f32 %v7700_v23, %v4551_v48  ;;  %v7751_v51 = vadd.f32 %v7700_v23, %v3213_v41 }
 0x4d9   : > { %v5060_v18 = vpop.eup %5059  ;;  %v3502_v20 = vadd.f32 %v3470_v39, %v2982_v26  ;;  %v3379_v32 = vadd.f32 1.0, %v5058_v28  ;;  %v3345_v28 = vmul.f32 1.442695, %v4168_v33  ;;  %v3524_v48 = vpack.c.bf16 %v3504_v14, %v3503_v42 }
 0x4da   : > { %v5062_v52 = vpop.eup %5061  ;;  %5077 = vrcp.f32 %v2891_v2  ;;  %v2889_v60 = vadd.f32 1.0, %v5060_v18  ;;  %v2863_v18 = vmul.f32 1.442695, %v4130_v19  ;;  %v4128_v30 = vmul.f32 -4.0, %v7748_v15 }
 0x4db   : > { %v5064_v59 = vpop.eup %5063  ;;  %5079 = vrcp.f32 %v3379_v32  ;;  %v3377_v58 = vadd.f32 1.0, %v5062_v52  ;;  %v3523_v16 = vpack.c.bf16 %v3502_v20, %v3501_v61  ;;  %v4171_v32 = vmul.f32 -4.0, %v7745_v8 }
 0x4dc   : > { %v5066_v53 = vpop.eup %5065  ;;  %5081 = vrcp.f32 %v2889_v60  ;;  %v2892_v27 = vadd.f32 1.0, %v5064_v59  ;;  %v4169_v23 = vmul.f32 -4.0, %v7751_v51  ;;  %v2859_v60 = vmul.f32 1.442695, %v4128_v30 }
 0x4dd   : > { %v5068_v56 = vpop.eup %5067  ;;  %5083 = vrcp.f32 %v3377_v58  ;;  %v3380_v26 = vadd.f32 1.0, %v5066_v53  ;;  %4588 = vmatprep.mubr.bf16.mxu1 %v3523_v16  ;;  %v3351_v42 = vmul.f32 1.442695, %v4171_v32 }
 0x4de   : > { %v5070_v31 = vpop.eup %5069  ;;  %5085 = vrcp.f32 %v2892_v27  ;;  %v2890_v39 = vadd.f32 1.0, %v5068_v56  ;;  %4589 = vmatmul.mubr.bf16.gmra.mrb[80].mxu1 %v3524_v48  ;;  %v3347_v58 = vmul.f32 1.442695, %v4169_v23 }
 0x4df   : > { %5087 = vrcp.f32 %v3380_v26  ;;  %v3378_v2 = vadd.f32 1.0, %v5070_v31 }
 0x4e0   : > { %5089 = vrcp.f32 %v2890_v39  ;;  %v5072_v50 = vpop.eup %5071 }
 0x4e1   : > { %5091 = vrcp.f32 %v3378_v2  ;;  %v5074_v41 = vpop.eup %5073  ;;  %v2895_v61 = vadd.f32 1.0, %v5072_v50 }
 0x4e2   : > { %5093 = vpow2.f32 %v3345_v28  ;;  %v5076_v20 = vpop.eup %5075  ;;  %v3383_v52 = vadd.f32 1.0, %v5074_v41 }
 0x4e3   : > { %5095 = vpow2.f32 %v2863_v18  ;;  %v2893_v56 = vadd.f32 1.0, %v5076_v20 }
 0x4e4   : > { %v5078_v14 = vpop.eup %5077  ;;  %5097 = vrcp.f32 %v2895_v61 }
 0x4e5   : > { %v5080_v33 = vpop.eup %5079  ;;  %v2987_v59 = vmul.f32 %v5078_v14, %v7674_v11  ;;  %5099 = vrcp.f32 %v3383_v52 }
 0x4e6   : > { %v5082_v19 = vpop.eup %5081  ;;  %v3475_v53 = vmul.f32 %v5080_v33, %v7677_v54  ;;  %5101 = vpow2.f32 %v3351_v42 }
 0x4e7   : > { %v5084_v27 = vpop.eup %5083  ;;  %v2985_v16 = vmul.f32 %v5082_v19, %v7680_v47  ;;  %5103 = vpow2.f32 %v2859_v60 }
 0x4e8   : > { %v5086_v26 = vpop.eup %5085  ;;  %v3507_v31 = vadd.f32 %v3475_v53, %v2987_v59  ;;  %v3473_v39 = vmul.f32 %v5084_v27, %v7683_v45  ;;  %5105 = vpow2.f32 %v3347_v58 }
 0x4e9   : > { %v5088_v28 = vpop.eup %5087  ;;  %v2988_v48 = vmul.f32 %v5086_v26, %v7695_v4  ;;  %5107 = vrcp.f32 %v2893_v56 }
 0x4ea   : > { %v5090_v11 = vpop.eup %5089  ;;  %v3505_v2 = vadd.f32 %v3473_v39, %v2985_v16  ;;  %v3476_v18 = vmul.f32 %v5088_v28, %v7703_v10 }
 0x4eb   : > { %v5092_v32 = vpop.eup %5091  ;;  %v2986_v54 = vmul.f32 %v5090_v11, %v7706_v24 }
 0x4ec   : > { %v5094_v47 = vpop.eup %5093  ;;  %v3508_v30 = vadd.f32 %v3476_v18, %v2988_v48  ;;  %v3474_v50 = vmul.f32 %v5092_v32, %v7709_v17 }
 0x4ed   : > { %v5096_v23 = vpop.eup %5095  ;;  %v3381_v41 = vadd.f32 1.0, %v5094_v47 }
 0x4ee   : > { %v5098_v45 = vpop.eup %5097  ;;  %v3506_v61 = vadd.f32 %v3474_v50, %v2986_v54  ;;  %v2896_v20 = vadd.f32 1.0, %v5096_v23  ;;  %v3526_v52 = vpack.c.bf16 %v3508_v30, %v3507_v31 }
 0x4ef   : > { %v5100_v4 = vpop.eup %5099  ;;  %v2991_v42 = vmul.f32 %v5098_v45, %v7719_v49  ;;  %5109 = vrcp.f32 %v3381_v41  ;;  %v7787_v41 = vld [vmem:[%s8014_s15] ss:$0 sm:$0xff] }
 0x4f0   : > { %v3479_v10 = vmul.f32 %v5100_v4, %v7722_v37  ;;  %5111 = vrcp.f32 %v2896_v20  ;;  %v3525_v14 = vpack.c.bf16 %v3506_v61, %v3505_v2  ;;  %v5102_v24 = vpop.eup %5101 }
 0x4f1   : > { %v5104_v60 = vpop.eup %5103  ;;  %v3384_v59 = vadd.f32 1.0, %v5102_v24 }
 0x4f2   : > { %v3511_v33 = vadd.f32 %v3479_v10, %v2991_v42  ;;  %4592 = vmatprep.mubr.bf16.mxu1 %v3525_v14  ;;  %v5106_v17 = vpop.eup %5105  ;;  %v2894_v58 = vadd.f32 1.0, %v5104_v60 }
 0x4f3   : > { %4593 = vmatmul.mubr.bf16.gmra.mrb[84].mxu1 %v3526_v52  ;;  %5113 = vrcp.f32 %v3384_v59  ;;  %v3382_v19 = vadd.f32 1.0, %v5106_v17  ;;  %v5108_v53 = vpop.eup %5107 }
 0x4f4   : > { %5115 = vrcp.f32 %v2894_v58  ;;  %v2989_v49 = vmul.f32 %v5108_v53, %v7726_v25 }
 0x4f5   : > { %5117 = vrcp.f32 %v3382_v19 }
 0x4f9   : > { %v5110_v27 = vpop.eup %5109 }
 0x4fa   : > { %v5112_v16 = vpop.eup %5111  ;;  %v3477_v37 = vmul.f32 %v5110_v27, %v7736_v13  ;;  %v7775_v13 = vld [vmem:[%s8013_s14] ss:$0 sm:$0xff] }
 0x4fb   : > { %v2992_v26 = vmul.f32 %v5112_v16, %v7740_v0 }
 0x4fc   : > { %v3509_v56 = vadd.f32 %v3477_v37, %v2989_v49 }
 0x4fd   : > { %v5114_v31 = vpop.eup %5113 }
 0x4fe   : > { %v5116_v39 = vpop.eup %5115  ;;  %v3480_v28 = vmul.f32 %v5114_v31, %v7745_v8 }
 0x4ff   : > { %v5118_v48 = vpop.eup %5117  ;;  %v2990_v11 = vmul.f32 %v5116_v39, %v7748_v15 }
 0x500   : > { %v3512_v2 = vadd.f32 %v3480_v28, %v2992_v26  ;;  %v3478_v18 = vmul.f32 %v5118_v48, %v7751_v51 }
 0x502   : > { %v3510_v25 = vadd.f32 %v3478_v18, %v2990_v11  ;;  %v3528_v32 = vpack.c.bf16 %v3512_v2, %v3511_v33 }
 0x504   : > { %v3527_v54 = vpack.c.bf16 %v3510_v25, %v3509_v56 }
 0x506   : > { %4596 = vmatprep.mubr.bf16.mxu1 %v3527_v54 }
 0x507   : > { %4597 = vmatmul.mubr.bf16.gmra.mrb[88].mxu1 %v3528_v32 }
 0x532   : > { %v4570_v0 = vpop.f32.mrb[96].mxu0 }
 0x533   : > { %v3643_v8 = vadd.f32 %v4570_v0, %v7775_v13  ;;  %v3634_v47 = vpop.f32.mrb[97].mxu0 }
 0x534   : > { %v3635_v15 = vadd.f32 %v7775_v13, %v3634_v47  ;;  %v4571_v30 = vpop.f32.mrb[98].mxu0 }
 0x535   : > { %v3763_v51 = vadd.f32 %v3643_v8, %v7226_v6  ;;  %v3646_v50 = vadd.f32 %v4571_v30, %v7775_v13  ;;  %v3637_v23 = vpop.f32.mrb[99].mxu0  ;;  %v8458_v8 = vld [vmem:[#allocation27_spill] sm:$0xff] }
 0x536   : > { %v3761_v45 = vadd.f32 %v3635_v15, %v7220_v3  ;;  %v3638_v61 = vadd.f32 %v7775_v13, %v3637_v23 }
 0x537   : > { %v3795_v20 = vadd.f32 %v3763_v51, %v8408_v63  ;;  %v3764_v52 = vadd.f32 %v3646_v50, %v7217_v5  ;;  %v8459_v51 = vld [vmem:[#allocation69_spill] sm:$0xff] }
 0x538   : > { %v3793_v4 = vadd.f32 %v3761_v45, %v8406_v44  ;;  %v3762_v6 = vadd.f32 %v3638_v61, %v7223_v35  ;;  %v8460_v61 = vld [vmem:[#allocation75_spill] sm:$0xff] }
 0x539   : > { %v3834_v42 = vmul.f32 %v7787_v41, %v3795_v20  ;;  %v3796_v10 = vadd.f32 %v3764_v52, %v8405_v21 }
 0x53a   : > { %v3832_v14 = vmul.f32 %v7787_v41, %v3793_v4  ;;  %v3794_v24 = vadd.f32 %v3762_v6, %v8407_v22  ;;  %v8461_v4 = vld [vmem:[#allocation32_spill] sm:$0xff] }
 0x53b   : > { %3866 = vst [vmem:[%s7799_s30 + $0x10] sm:$0xff] %v3834_v42  ;;  %v3835_v5 = vmul.f32 %v7787_v41, %v3796_v10  ;;  %v8462_v42 = vld [vmem:[#allocation64_spill] sm:$0xff] }
 0x53c   : > { %3864 = vst [vmem:[%s7799_s30] sm:$0xff] %v3832_v14  ;;  %v3833_v44 = vmul.f32 %v7787_v41, %v3794_v24  ;;  %v8463_v14 = vld [vmem:[#allocation30_spill] sm:$0xff] }
 0x53d   : > { %3867 = vst [vmem:[%s7799_s30 + $0x18] sm:$0xff] %v3835_v5  ;;  %v8464_v5 = vld [vmem:[#allocation68_spill] sm:$0xff] }
 0x53e   : > { %3865 = vst [vmem:[%s7799_s30 + $0x8] sm:$0xff] %v3833_v44 }
 0x55b   : > { %v4574_v3 = vpop.f32.mrb[64].mxu1 }
 0x55c   : > { %v3659_v21 = vadd.f32 %v4574_v3, %v7775_v13  ;;  %v3650_v35 = vpop.f32.mrb[65].mxu1 }
 0x55d   : > { %v3651_v22 = vadd.f32 %v7775_v13, %v3650_v35  ;;  %v4575_v63 = vpop.f32.mrb[66].mxu1 }
 0x55e   : > { %v3767_v60 = vadd.f32 %v3659_v21, %v7252_v40  ;;  %v3662_v33 = vadd.f32 %v4575_v63, %v7775_v13  ;;  %v3653_v59 = vpop.f32.mrb[67].mxu1  ;;  %v8465_v21 = vld [vmem:[#allocation29_spill] sm:$0xff]  ;;  %v8466_v63 = vld [vmem:[#allocation31_spill] sm:$0xff] }
 0x55f   : > { %v3765_v17 = vadd.f32 %v3651_v22, %v7246_v38  ;;  %v3654_v58 = vadd.f32 %v7775_v13, %v3653_v59 }
 0x560   : > { %v3799_v19 = vadd.f32 %v3767_v60, %v8412_v55  ;;  %v3768_v53 = vadd.f32 %v3662_v33, %v7243_v36 }
 0x561   : > { %v3797_v49 = vadd.f32 %v3765_v17, %v8410_v12  ;;  %v3766_v27 = vadd.f32 %v3654_v58, %v7249_v1 }
 0x562   : > { %v3838_v16 = vmul.f32 %v7787_v41, %v3799_v19  ;;  %v3800_v40 = vadd.f32 %v3768_v53, %v8409_v7 }
 0x563   : > { %v3836_v37 = vmul.f32 %v7787_v41, %v3797_v49  ;;  %v3798_v56 = vadd.f32 %v3766_v27, %v8411_v34  ;;  %v8467_v27 = vld [vmem:[#allocation67_spill] sm:$0xff] }
 0x564   : > { %3870 = vst [vmem:[%s7799_s30 + $0x30] sm:$0xff] %v3838_v16  ;;  %v3839_v38 = vmul.f32 %v7787_v41, %v3800_v40 }
 0x565   : > { %3868 = vst [vmem:[%s7799_s30 + $0x20] sm:$0xff] %v3836_v37  ;;  %v3837_v55 = vmul.f32 %v7787_v41, %v3798_v56  ;;  %v8468_v56 = vld [vmem:[#allocation80_spill] sm:$0xff] }
 0x566   : > { %3871 = vst [vmem:[%s7799_s30 + $0x38] sm:$0xff] %v3839_v38 }
 0x567   : > { %3869 = vst [vmem:[%s7799_s30 + $0x28] sm:$0xff] %v3837_v55 }
 0x573   : > { %v4578_v36 = vpop.f32.mrb[68].mxu1 }
 0x574   : > { %v3675_v12 = vadd.f32 %v4578_v36, %v7775_v13  ;;  %v3666_v1 = vpop.f32.mrb[69].mxu1  ;;  %v8469_v36 = vld [vmem:[#allocation36_spill] sm:$0xff] }
 0x575   : > { %v3667_v26 = vadd.f32 %v7775_v13, %v3666_v1  ;;  %v4579_v7 = vpop.f32.mrb[70].mxu1  ;;  %v8470_v1 = vld [vmem:[#allocation59_spill] sm:$0xff] }
 0x576   : > { %v3771_v31 = vadd.f32 %v3675_v12, %v7272_v62  ;;  %v3678_v34 = vadd.f32 %v4579_v7, %v7775_v13  ;;  %v3669_v39 = vpop.f32.mrb[71].mxu1  ;;  %v8457_v62 = vld [vmem:[#allocation25_spill] sm:$0xff]  ;;  %v8471_v7 = vld [vmem:[#allocation34_spill] sm:$0xff] }
 0x577   : > { %v3769_v28 = vadd.f32 %v3667_v26, %v7266_v46  ;;  %v3670_v48 = vadd.f32 %v7775_v13, %v3669_v39 }
 0x578   : > { %v3803_v11 = vadd.f32 %v3771_v31, %v8416_v29  ;;  %v3772_v2 = vadd.f32 %v3678_v34, %v7263_v9  ;;  %v8472_v34 = vld [vmem:[#allocation72_spill] sm:$0xff] }
 0x579   : > { %v3801_v18 = vadd.f32 %v3769_v28, %v8414_v57  ;;  %v3770_v25 = vadd.f32 %v3670_v48, %v7269_v43  ;;  %v8473_v48 = vld [vmem:[#allocation33_spill] sm:$0xff] }
 0x57a   : > { %v3842_v32 = vmul.f32 %v7787_v41, %v3803_v11  ;;  %v3804_v54 = vadd.f32 %v3772_v2, %v8457_v62 }
 0x57b   : > { %v3840_v0 = vmul.f32 %v7787_v41, %v3801_v18  ;;  %v3802_v47 = vadd.f32 %v3770_v25, %v8458_v8  ;;  %v8474_v18 = vld [vmem:[#allocation35_spill] sm:$0xff] }
 0x57c   : > { %3874 = vst [vmem:[%s7799_s30 + $0x50] sm:$0xff] %v3842_v32  ;;  %v3843_v46 = vmul.f32 %v7787_v41, %v3804_v54 }
 0x57d   : > { %3872 = vst [vmem:[%s7799_s30 + $0x40] sm:$0xff] %v3840_v0  ;;  %v3841_v29 = vmul.f32 %v7787_v41, %v3802_v47 }
 0x57e   : > { %3875 = vst [vmem:[%s7799_s30 + $0x58] sm:$0xff] %v3843_v46 }
 0x57f   : > { %3873 = vst [vmem:[%s7799_s30 + $0x48] sm:$0xff] %v3841_v29  ;;  %v8475_v29 = vld [vmem:[#allocation66_spill] sm:$0xff] }
 0x589   : > { %v4582_v9 = vpop.f32.mrb[72].mxu1 }
 0x58a   : > { %v3691_v57 = vadd.f32 %v4582_v9, %v7775_v13  ;;  %v3682_v43 = vpop.f32.mrb[73].mxu1 }
 0x58b   : > { %v3683_v15 = vadd.f32 %v7775_v13, %v3682_v43  ;;  %v4583_v30 = vpop.f32.mrb[74].mxu1 }
 0x58c   : > { %v3775_v50 = vadd.f32 %v3691_v57, %v8459_v51  ;;  %v3694_v23 = vadd.f32 %v4583_v30, %v7775_v13  ;;  %v3685_v45 = vpop.f32.mrb[75].mxu1 }
 0x58d   : > { %v3773_v20 = vadd.f32 %v3683_v15, %v8460_v61  ;;  %v3686_v52 = vadd.f32 %v7775_v13, %v3685_v45  ;;  %v8476_v15 = vld [vmem:[#allocation63_spill] sm:$0xff]  ;;  %v8478_v45 = vld [vmem:[#allocation58_spill] sm:$0xff] }
 0x58e   : > { %v3807_v6 = vadd.f32 %v3775_v50, %v8461_v4  ;;  %v3776_v10 = vadd.f32 %v3694_v23, %v8462_v42  ;;  %v8477_v50 = vld [vmem:[#allocation40_spill] sm:$0xff]  ;;  %v8480_v4 = vld [vmem:[#allocation73_spill] sm:$0xff] }
 0x58f   : > { %v3805_v24 = vadd.f32 %v3773_v20, %v8463_v14  ;;  %v3774_v44 = vadd.f32 %v3686_v52, %v8464_v5  ;;  %v8479_v20 = vld [vmem:[#allocation38_spill] sm:$0xff]  ;;  %v8482_v5 = vld [vmem:[#allocation39_spill] sm:$0xff] }
 0x590   : > { %v3846_v3 = vmul.f32 %v7787_v41, %v3807_v6  ;;  %v3808_v35 = vadd.f32 %v3776_v10, %v8465_v21  ;;  %v8481_v10 = vld [vmem:[#allocation37_spill] sm:$0xff] }
 0x591   : > { %v3844_v22 = vmul.f32 %v7787_v41, %v3805_v24  ;;  %v3806_v60 = vadd.f32 %v3774_v44, %v8466_v63 }
 0x592   : > { %3878 = vst [vmem:[%s7799_s30 + $0x70] sm:$0xff] %v3846_v3  ;;  %v3847_v33 = vmul.f32 %v7787_v41, %v3808_v35 }
 0x593   : > { %3876 = vst [vmem:[%s7799_s30 + $0x60] sm:$0xff] %v3844_v22  ;;  %v3845_v59 = vmul.f32 %v7787_v41, %v3806_v60 }
 0x594   : > { %3879 = vst [vmem:[%s7799_s30 + $0x78] sm:$0xff] %v3847_v33 }
 0x595   : > { %3877 = vst [vmem:[%s7799_s30 + $0x68] sm:$0xff] %v3845_v59  ;;  %v8483_v59 = vld [vmem:[#allocation81_spill] sm:$0xff] }
 0x5a0   : > { %v4586_v17 = vpop.f32.mrb[76].mxu1 }
 0x5a1   : > { %v3707_v58 = vadd.f32 %v4586_v17, %v7775_v13  ;;  %v3698_v19 = vpop.f32.mrb[77].mxu1 }
 0x5a2   : > { %v3699_v53 = vadd.f32 %v7775_v13, %v3698_v19  ;;  %v4587_v49 = vpop.f32.mrb[78].mxu1 }
 0x5a3   : > { %v3779_v16 = vadd.f32 %v3707_v58, %v8467_v27  ;;  %v3710_v40 = vadd.f32 %v4587_v49, %v7775_v13  ;;  %v3701_v37 = vpop.f32.mrb[79].mxu1 }
 0x5a4   : > { %v3777_v38 = vadd.f32 %v3699_v53, %v8468_v56  ;;  %v3702_v55 = vadd.f32 %v7775_v13, %v3701_v37  ;;  %v8484_v53 = vld [vmem:[#allocation70_spill] sm:$0xff] }
 0x5a5   : > { %v3811_v12 = vadd.f32 %v3779_v16, %v8469_v36  ;;  %v3780_v26 = vadd.f32 %v3710_v40, %v8470_v1  ;;  %v8485_v16 = vld [vmem:[#allocation44_spill] sm:$0xff]  ;;  %v8486_v37 = vld [vmem:[#allocation78_spill] sm:$0xff] }
 0x5a6   : > { %v3809_v31 = vadd.f32 %v3777_v38, %v8471_v7  ;;  %v3778_v39 = vadd.f32 %v3702_v55, %v8472_v34  ;;  %v8487_v38 = vld [vmem:[#allocation42_spill] sm:$0xff]  ;;  %v8488_v36 = vld [vmem:[#allocation76_spill] sm:$0xff]  ;;  %v8490_v34 = vld [vmem:[#allocation43_spill] sm:$0xff] }
 0x5a7   : > { %v3850_v28 = vmul.f32 %v7787_v41, %v3811_v12  ;;  %v3812_v11 = vadd.f32 %v3780_v26, %v8473_v48  ;;  %v8489_v26 = vld [vmem:[#allocation41_spill] sm:$0xff] }
 0x5a8   : > { %v3848_v2 = vmul.f32 %v7787_v41, %v3809_v31  ;;  %v3810_v25 = vadd.f32 %v3778_v39, %v8474_v18 }
 0x5a9   : > { %3882 = vst [vmem:[%s7799_s30 + $0x90] sm:$0xff] %v3850_v28  ;;  %v3851_v32 = vmul.f32 %v7787_v41, %v3812_v11 }
 0x5aa   : > { %3880 = vst [vmem:[%s7799_s30 + $0x80] sm:$0xff] %v3848_v2  ;;  %v3849_v62 = vmul.f32 %v7787_v41, %v3810_v25 }
 0x5ab   : > { %3883 = vst [vmem:[%s7799_s30 + $0x98] sm:$0xff] %v3851_v32 }
 0x5ac   : > { %3881 = vst [vmem:[%s7799_s30 + $0x88] sm:$0xff] %v3849_v62  ;;  %v8491_v62 = vld [vmem:[#allocation77_spill] sm:$0xff] }
 0x5b1   : > { %v4590_v54 = vpop.f32.mrb[80].mxu1 }
 0x5b2   : > { %v3723_v0 = vadd.f32 %v4590_v54, %v7775_v13  ;;  %v3714_v8 = vpop.f32.mrb[81].mxu1 }
 0x5b3   : > { %v3715_v47 = vadd.f32 %v7775_v13, %v3714_v8  ;;  %v4591_v46 = vpop.f32.mrb[82].mxu1 }
 0x5b4   : > { %v3783_v9 = vadd.f32 %v3723_v0, %v8475_v29  ;;  %v3726_v57 = vadd.f32 %v4591_v46, %v7775_v13  ;;  %v3717_v43 = vpop.f32.mrb[83].mxu1 }
 0x5b5   : > { %v3781_v30 = vadd.f32 %v3715_v47, %v8476_v15  ;;  %v3718_v51 = vadd.f32 %v7775_v13, %v3717_v43  ;;  %v8492_v47 = vld [vmem:[#allocation79_spill] sm:$0xff] }
 0x5b6   : > { %v3815_v23 = vadd.f32 %v3783_v9, %v8477_v50  ;;  %v3784_v61 = vadd.f32 %v3726_v57, %v8478_v45  ;;  %v8493_v9 = vld [vmem:[#allocation48_spill] sm:$0xff]  ;;  %v8494_v43 = vld [vmem:[#allocation71_spill] sm:$0xff] }
 0x5b7   : > { %v3813_v52 = vadd.f32 %v3781_v30, %v8479_v20  ;;  %v3782_v6 = vadd.f32 %v3718_v51, %v8480_v4  ;;  %v8495_v30 = vld [vmem:[#allocation46_spill] sm:$0xff]  ;;  %v8496_v50 = vld [vmem:[#allocation84_spill] sm:$0xff] }
 0x5b8   : > { %v3854_v42 = vmul.f32 %v7787_v41, %v3815_v23  ;;  %v3816_v14 = vadd.f32 %v3784_v61, %v8481_v10  ;;  %v8497_v61 = vld [vmem:[#allocation45_spill] sm:$0xff] }
 0x5b9   : > { %v3852_v24 = vmul.f32 %v7787_v41, %v3813_v52  ;;  %v3814_v44 = vadd.f32 %v3782_v6, %v8482_v5  ;;  %v8498_v52 = vld [vmem:[#allocation47_spill] sm:$0xff] }
 0x5ba   : > { %3886 = vst [vmem:[%s7799_s30 + $0xb0] sm:$0xff] %v3854_v42  ;;  %v3855_v3 = vmul.f32 %v7787_v41, %v3816_v14 }
 0x5bb   : > { %3884 = vst [vmem:[%s7799_s30 + $0xa0] sm:$0xff] %v3852_v24  ;;  %v3853_v21 = vmul.f32 %v7787_v41, %v3814_v44 }
 0x5bc   : > { %3887 = vst [vmem:[%s7799_s30 + $0xb8] sm:$0xff] %v3855_v3 }
 0x5bd   : > { %3885 = vst [vmem:[%s7799_s30 + $0xa8] sm:$0xff] %v3853_v21 }
 0x5c6   : > { %v4594_v35 = vpop.f32.mrb[84].mxu1 }
 0x5c7   : > { %v3739_v22 = vadd.f32 %v4594_v35, %v7775_v13  ;;  %v3730_v63 = vpop.f32.mrb[85].mxu1 }
 0x5c8   : > { %v3731_v60 = vadd.f32 %v7775_v13, %v3730_v63  ;;  %v4595_v33 = vpop.f32.mrb[86].mxu1 }
 0x5c9   : > { %v3787_v17 = vadd.f32 %v3739_v22, %v8483_v59  ;;  %v3742_v58 = vadd.f32 %v4595_v33, %v7775_v13  ;;  %v3733_v19 = vpop.f32.mrb[87].mxu1 }
 0x5ca   : > { %v3785_v49 = vadd.f32 %v3731_v60, %v8484_v53  ;;  %v3734_v27 = vadd.f32 %v7775_v13, %v3733_v19 }
 0x5cb   : > { %v3819_v40 = vadd.f32 %v3787_v17, %v8485_v16  ;;  %v3788_v56 = vadd.f32 %v3742_v58, %v8486_v37 }
 0x5cc   : > { %v3817_v55 = vadd.f32 %v3785_v49, %v8487_v38  ;;  %v3786_v12 = vadd.f32 %v3734_v27, %v8488_v36 }
 0x5cd   : > { %v3858_v1 = vmul.f32 %v7787_v41, %v3819_v40  ;;  %v3820_v7 = vadd.f32 %v3788_v56, %v8489_v26 }
 0x5ce   : > { %v3856_v31 = vmul.f32 %v7787_v41, %v3817_v55  ;;  %v3818_v39 = vadd.f32 %v3786_v12, %v8490_v34 }
 0x5cf   : > { %3890 = vst [vmem:[%s7799_s30 + $0xd0] sm:$0xff] %v3858_v1  ;;  %v3859_v28 = vmul.f32 %v7787_v41, %v3820_v7 }
 0x5d0   : > { %3888 = vst [vmem:[%s7799_s30 + $0xc0] sm:$0xff] %v3856_v31  ;;  %v3857_v48 = vmul.f32 %v7787_v41, %v3818_v39 }
 0x5d1   : > { %3891 = vst [vmem:[%s7799_s30 + $0xd8] sm:$0xff] %v3859_v28 }
 0x5d2   : > { %3889 = vst [vmem:[%s7799_s30 + $0xc8] sm:$0xff] %v3857_v48 }
 0x5da   : > { %v4598_v11 = vpop.f32.mrb[88].mxu1 }
 0x5db   : > { %v3755_v2 = vadd.f32 %v4598_v11, %v7775_v13  ;;  %v3746_v18 = vpop.f32.mrb[89].mxu1 }
 0x5dc   : > { %v3747_v25 = vadd.f32 %v7775_v13, %v3746_v18  ;;  %v4599_v32 = vpop.f32.mrb[90].mxu1 }
 0x5dd   : > { %v3791_v54 = vadd.f32 %v3755_v2, %v8491_v62  ;;  %v3758_v0 = vadd.f32 %v4599_v32, %v7775_v13  ;;  %v3749_v8 = vpop.f32.mrb[91].mxu1 }
 0x5de   : > { %v3789_v46 = vadd.f32 %v3747_v25, %v8492_v47  ;;  %v3750_v29 = vadd.f32 %v7775_v13, %v3749_v8 }
 0x5df   : > { %v3823_v57 = vadd.f32 %v3791_v54, %v8493_v9  ;;  %v3792_v15 = vadd.f32 %v3758_v0, %v8494_v43 }
 0x5e0   : > { %v3821_v51 = vadd.f32 %v3789_v46, %v8495_v30  ;;  %v3790_v23 = vadd.f32 %v3750_v29, %v8496_v50 }
 0x5e1   : > { %v3862_v45 = vmul.f32 %v7787_v41, %v3823_v57  ;;  %v3824_v20 = vadd.f32 %v3792_v15, %v8497_v61 }
 0x5e2   : > { %v3860_v13 = vmul.f32 %v7787_v41, %v3821_v51  ;;  %v3822_v4 = vadd.f32 %v3790_v23, %v8498_v52 }
 0x5e3   : > { %3894 = vst [vmem:[%s7799_s30 + $0xf0] sm:$0xff] %v3862_v45  ;;  %v3863_v6 = vmul.f32 %v7787_v41, %v3824_v20 }
 0x5e4   : > { %3892 = vst [vmem:[%s7799_s30 + $0xe0] sm:$0xff] %v3860_v13  ;;  %v3861_v42 = vmul.f32 %v7787_v41, %v3822_v4 }
 0x5e5   : > { %3895 = vst [vmem:[%s7799_s30 + $0xf8] sm:$0xff] %v3863_v6 }
 0x5e6   : > { %3893 = vst [vmem:[%s7799_s30 + $0xe8] sm:$0xff] %v3861_v42 }
 0x5e7   : > { %5192 = shalt.err (!%p5189_p11)
}
 0x5e8   : > { %s5193_s24 = scalar_lea.hbm %s7948_s27, 4096  ;;  %s5197_s21 = scalar_lea.hbm %s8499_s18, 8192 }
 0x5e9   : > { %p5194_p13 = scmp.ne.s32.totalorder %s7948_s27, %s5193_s24  ;;  %p5198_p5 = scmp.lt.u32.totalorder %s7948_s27, %s8499_s18 }
 0x5ea   : > { %p5199_p9 = scmp.lt.u32.totalorder %s5197_s21, %s5193_s24  ;;  %p5201_p12 = scmp.lt.u32.totalorder %s5193_s24, %s7948_s27 }
 0x5eb   : > { %p5195_p0 = pnand %p5194_p13, %p8500_p1 }
 0x5ec   : > { %p5200_p10 = por %p5199_p9, %p5198_p5 }
 0x5ed   : > { %p5196_p6 = pneg %p5195_p0 }
 0x5ee   : > { %p5202_p2 = por %p5201_p12, %p5200_p10 }
 0x5f0   : > { %p5203_p3 = pnand %p5202_p2, %p5196_p6 }
 0x5f2   : > { %5206 = shalt.err (!%p5203_p3)
}
 0x5f3   : > { %s5254_s17 = smov 128   ;;  %s5255_s26 = smov 8  }
 0x5f4   : > { %4625 = dma.vmem_to_hbm [thread:$0]  (%p8500_p1), %s7950_s29, 4096, %s7948_s27, %s7958_s25, %s5254_s17, %s5254_s17, %s5255_s26  }
 0x5f5 PF: > { %s8501_s23 = sld [smem:[#allocation13_spill]]  ;;  %s8502_s20 = sld [smem:[#allocation11_spill]] }
 0x5f6   : > { %s8503_s16 = sld [smem:[#allocation16_spill]] }
 0x5fb   : > { %p4642_p4 = scmp.ge.s32.totalorder %s8501_s23, 2  ;;  %s3925_s30 = sand.u32 1, %s8502_s20  }
 0x5fc   : > { %p8504_p7 = scmp.ne.s32.totalorder %s8503_s16, 0  ;;  %s3926_s24 = scalar_lea.sflag [#allocation4], %s3925_s30 }
 0x5fe   : > { %p4635_p8 = pnand %p4642_p4, %p8504_p7 }
 0x600   : > { %5232 = dma.done.wait (!%p4635_p8), %s3926_s24, 4096  }
 0x601   : > { %5234 = vsyncadd (!%p4635_p8), %s3926_s24, 4294963200  ;;  %s8505_s24 = sld [smem:[#allocation14_spill]]  ;;  %s8506_s19 = sld [smem:[#allocation12_spill]] }
 0x602   : > { %s8507_s23 = sld [smem:[#allocation15_spill]]  ;;  %s8508_s21 = smov %s5241_s22 }
 0x607   : > { %p28_p11 = scmp.ge.s32.totalorder %s8505_s24, 4   ;;  %s8509_s22 = smov %s8506_s19 }
 0x609   :  { %30 = sbr.rel (!%p28_p11) target bundleno = 8 (0x8), region = 128 }
 0x610   :  { %3931 = vsyncpa [#allocation3], 1 }
 0x611   :  { %3933 = vsyncpa [#allocation3 + $0x1], 1 }
 0x612   :  { %3934 = vsyncpa [#allocation6], 1 }
 0x613   :  { %3935 = vsyncpa [#allocation4], 1 }
 0x614   :  { %3937 = vsyncpa [#allocation4 + $0x1], 1 }

</bundles_post_ra>
